<compile_context>
chip_gen: v6e
topology: v6e:2x2x1
jax: 0.10.0
libtpu: 0.0.40
codegen_flags: <defaults>
</compile_context>

<pallas_src>
import functools

import jax
import jax.numpy as jnp
from jax import lax
from jax.experimental import pallas as pl
from jax.experimental.pallas import tpu as pltpu


# ------------------------------ fused kernel ------------------------------- #

def _basic_block_kernel(*refs, stride, TH, W, H_out, W_out,
                        Cin, Cmid, Cout, has_ds):
    """Whole BasicBlock forward for one image (one grid step per sample)."""
    if has_ds:
        (x_ref, w1_ref, s1_ref, b1_ref, w2_ref, s2_ref, b2_ref,
         wd_ref, sd_ref, bd_ref, o_ref, xpad_ref, out1_ref) = refs
    else:
        (x_ref, w1_ref, s1_ref, b1_ref, w2_ref, s2_ref, b2_ref,
         o_ref, xpad_ref, out1_ref) = refs
        wd_ref = sd_ref = bd_ref = None

    T = H_out // TH
    Wh = W // 2            # input column pairs (stride-2 lane pairing)
    Wq = Wh + 1            # padded pairs in the scratch (pair 0 = zero pad)

    # ---- 0. zero the padding halo of both VMEM scratches --------------------
    xpad_ref[...] = jnp.zeros_like(xpad_ref)
    out1_ref[...] = jnp.zeros_like(out1_ref)

    # ---- 1. assemble the zero-padded input in VMEM (no XLA-level jnp.pad) ---
    @pl.loop(0, T)
    def _fill(t):
        r0 = t * TH
        if stride == 1:
            # xpad_ref: (H+2, W+2, Cin), row/col 0 and last stay zero.
            xpad_ref[pl.ds(r0 + 1, TH), 1:W + 1, :] = \
                x_ref[0, pl.ds(r0, TH), :, :]
        else:
            # xpad_ref: (2, H_out+1, Wq, 2*Cin).
            # plane 1 <- original even rows, plane 0 <- original odd rows;
            # column pairs are stored shifted by one pair (pair 0 = W pad), so
            # scratch pair q = original columns (2q-2, 2q-1).
            xv = x_ref[0, pl.ds(2 * r0, 2 * TH), :, :]
            xv = xv.reshape(TH, 2, Wh, 2 * Cin)
            xpad_ref[1, pl.ds(r0, TH), 1:Wq, :] = xv[:, 0]
            xpad_ref[0, pl.ds(r0 + 1, TH), 1:Wq, :] = xv[:, 1]

    # ---- helpers: one kh row of taps, bf16 input shifts, aligned f32 acc ----
    def _taps_s1(src_ref, r0, kh, cin, w9_ref):
        acc = None
        for kw in range(3):
            flat = src_ref[pl.ds(r0 + kh, TH), kw:kw + W_out, :]
            z = jnp.dot(flat.reshape(TH * W_out, cin), w9_ref[3 * kh + kw],
                        preferred_element_type=jnp.float32)
            acc = z if acc is None else acc + z
        return acc

    def _taps_s2(r0, kh):
        # padded input row 2r+kh lives in plane kh%2 at index r + kh//2.
        par, roff = kh % 2, kh // 2
        hi = xpad_ref[par, pl.ds(r0 + roff, TH), 1:W_out + 1, :]   # kw = 1, 2
        lo = xpad_ref[par, pl.ds(r0 + roff, TH), 0:W_out, :]       # kw = 0
        z = jnp.dot(hi.reshape(TH * W_out, 2 * Cin), w1_ref[kh],
                    preferred_element_type=jnp.float32)
        return z + jnp.dot(lo.reshape(TH * W_out, 2 * Cin), w1_ref[3 + kh],
                           preferred_element_type=jnp.float32)

    # ---- 2. conv1 (3x3, stride s) + bn1 + relu -> out1 (VMEM only) ----------
    @pl.loop(0, T)
    def _conv1(t):
        r0 = t * TH
        acc = None
        for kh in range(3):
            z = (_taps_s1(xpad_ref, r0, kh, Cin, w1_ref) if stride == 1
                 else _taps_s2(r0, kh))
            acc = z if acc is None else acc + z
        y = jnp.maximum(acc * s1_ref[...] + b1_ref[...], 0.0)
        out1_ref[pl.ds(r0 + 1, TH), 1:W_out + 1, :] = (
            y.reshape(TH, W_out, Cmid).astype(out1_ref.dtype))

    # ---- 3. conv2 (3x3) + bn2 + residual (+1x1 downsample bn) + relu --------
    @pl.loop(0, T)
    def _conv2(t):
        r0 = t * TH
        acc = None
        for kh in range(3):
            z = _taps_s1(out1_ref, r0, kh, Cmid, w2_ref)
            acc = z if acc is None else acc + z
        y = acc * s2_ref[...] + b2_ref[...]

        if has_ds:
            if stride == 1:
                flat = x_ref[0, pl.ds(r0, TH), :, :].reshape(TH * W_out, Cin)
            else:
                # even rows = plane 1; even columns = slot 0 of pairs 1..W_out
                # (weights carry zeros for slot 1).
                flat = xpad_ref[1, pl.ds(r0, TH), 1:W_out + 1, :].reshape(
                    TH * W_out, 2 * Cin)
            res = (jnp.dot(flat, wd_ref[...],
                           preferred_element_type=jnp.float32)
                   * sd_ref[...] + bd_ref[...])
        else:
            res = x_ref[0, pl.ds(r0, TH), :, :].reshape(
                TH * W_out, Cin).astype(jnp.float32)

        y = jnp.maximum(y + res, 0.0)
        o_ref[0, pl.ds(r0, TH), :, :] = (
            y.reshape(TH, W_out, Cout).astype(o_ref.dtype))


# ------------------------------ host wrappers ------------------------------ #

def _fold_bn(gamma, beta, mean, var, eps=1e-5):
    scale = (gamma / jnp.sqrt(var + eps)).astype(jnp.float32)
    bias = (beta - mean * scale).astype(jnp.float32)
    return scale.reshape(1, -1), bias.reshape(1, -1)


def _row_tile(h_out, w_out, c_big):
    """Pick a row tile so the f32 accumulator stays ~<= 96 KiB (Cout-aware)."""
    m_cap = max(1, (96 * 1024) // (4 * max(c_big, 1)))
    m_min = min(128, h_out * w_out)
    divisors = [d for d in range(1, h_out + 1) if h_out % d == 0]
    fit = [d for d in divisors if d * w_out <= m_cap]
    th = max(fit) if fit else 1
    if th * w_out < m_min:
        bigger = [d for d in divisors if d * w_out >= m_min]
        th = min(bigger) if bigger else h_out
    return th


def basic_block_forward(x_nchw, p, *, in_planes, planes, stride):
    """Pallas implementation of BasicBlock.forward.  Input/output are NCHW f32."""
    assert stride in (1, 2), "ResNet BasicBlock only uses stride 1 or 2"
    cdt = jnp.bfloat16

    x = jnp.transpose(x_nchw, (0, 2, 3, 1))                   # NHWC
    N, H, W, Cin = x.shape
    assert Cin == in_planes
    if stride == 2:
        assert H % 2 == 0 and W % 2 == 0
    H_out, W_out = H // stride, W // stride
    TH = _row_tile(H_out, W_out, planes)

    xb = x.astype(cdt)

    # conv weights in the (tap, K, Cout) layouts the kernel consumes (bf16).
    w1t = jnp.transpose(p["w1"], (2, 3, 1, 0)).astype(cdt)    # (3,3,Cin,planes)
    w2k = jnp.transpose(p["w2"], (2, 3, 1, 0)).reshape(9, planes, planes)
    w2k = w2k.astype(cdt)
    s1, b1 = _fold_bn(p["g1"], p["b1"], p["m1"], p["v1"])
    s2, b2 = _fold_bn(p["g2"], p["b2"], p["m2"], p["v2"])

    has_ds = (stride != 1) or (in_planes != planes)

    if stride == 1:
        x_in = xb
        w1k = w1t.reshape(9, Cin, planes)
        xpad_shape = (H + 2, W + 2, Cin)
    else:
        # fold W column pairs into lanes: contiguous (free) reshape, no pad.
        x_in = xb.reshape(N, H, W // 2, 2 * Cin)
        # scratch pair q = original columns (2q-2, 2q-1):
        #   pairs j+1 x [W[kh,1]; W[kh,2]]  (taps kw = 1, 2)
        #   pairs j   x [0      ; W[kh,0]]  (tap  kw = 0)
        wA = jnp.concatenate([w1t[:, 1], w1t[:, 2]], axis=1)   # (3, 2Cin, Cm)
        wB = jnp.concatenate([jnp.zeros_like(w1t[:, 0]), w1t[:, 0]], axis=1)
        w1k = jnp.concatenate([wA, wB], axis=0)                # (6, 2Cin, Cm)
        xpad_shape = (2, H_out + 1, W // 2 + 1, 2 * Cin)

    args = [x_in, w1k, s1, b1, w2k, s2, b2]
    in_specs = [
        pl.BlockSpec((1,) + tuple(x_in.shape[1:]), lambda n: (n, 0, 0, 0)),
        pl.BlockSpec(w1k.shape, lambda n: (0, 0, 0)),
        pl.BlockSpec(s1.shape, lambda n: (0, 0)),
        pl.BlockSpec(b1.shape, lambda n: (0, 0)),
        pl.BlockSpec(w2k.shape, lambda n: (0, 0, 0)),
        pl.BlockSpec(s2.shape, lambda n: (0, 0)),
        pl.BlockSpec(b2.shape, lambda n: (0, 0)),
    ]

    if has_ds:
        wd_t = jnp.transpose(p["wd"][:, :, 0, 0], (1, 0)).astype(cdt)
        if stride == 2:
            # slot 0 (even original columns) carries the data; slot 1 zeroed.
            wd_t = jnp.concatenate([wd_t, jnp.zeros_like(wd_t)], axis=0)
        sd, bd = _fold_bn(p["gd"], p["bd"], p["md"], p["vd"])
        args += [wd_t, sd, bd]
        in_specs += [
            pl.BlockSpec(wd_t.shape, lambda n: (0, 0)),
            pl.BlockSpec(sd.shape, lambda n: (0, 0)),
            pl.BlockSpec(bd.shape, lambda n: (0, 0)),
        ]

    kern = functools.partial(
        _basic_block_kernel, stride=stride, TH=TH, W=W,
        H_out=H_out, W_out=W_out, Cin=Cin, Cmid=planes, Cout=planes,
        has_ds=has_ds)

    out = pl.pallas_call(
        kern,
        out_shape=jax.ShapeDtypeStruct((N, H_out, W_out, planes), jnp.float32),
        grid=(N,),
        in_specs=in_specs,
        out_specs=pl.BlockSpec((1, H_out, W_out, planes),
                               lambda n: (n, 0, 0, 0)),
        scratch_shapes=[
            pltpu.VMEM(xpad_shape, cdt),                      # padded input
            pltpu.VMEM((H_out + 2, W_out + 2, planes), cdt),  # out1 + halo
        ],
        compiler_params=pltpu.CompilerParams(
            dimension_semantics=("parallel",),
            vmem_limit_bytes=48 * 1024 * 1024),
    )(*args)

    return jnp.transpose(out, (0, 3, 1, 2))                   # back to NCHW


# ------------------------- reference + param init --------------------------- #

def reference_forward(x, p, *, in_planes, planes, stride, eps=1e-5):
    def conv(x, w, s, pad):
        return lax.conv_general_dilated(
            x, w, (s, s), ((pad, pad), (pad, pad)),
            dimension_numbers=("NCHW", "OIHW", "NCHW"))

    def bn(x, g, b, m, v):
        g, b = g[None, :, None, None], b[None, :, None, None]
        m, v = m[None, :, None, None], v[None, :, None, None]
        return (x - m) / jnp.sqrt(v + eps) * g + b

    out = jax.nn.relu(bn(conv(x, p["w1"], stride, 1),
                         p["g1"], p["b1"], p["m1"], p["v1"]))
    out = bn(conv(out, p["w2"], 1, 1), p["g2"], p["b2"], p["m2"], p["v2"])
    if stride != 1 or in_planes != planes:
        res = bn(conv(x, p["wd"], stride, 0), p["gd"], p["bd"], p["md"], p["vd"])
    else:
        res = x
    return jax.nn.relu(out + res)


def init_params(key, in_planes, planes):
    ks = jax.random.split(key, 15)
    f32 = jnp.float32
    return {
        "w1": 0.1 * jax.random.normal(ks[0], (planes, in_planes, 3, 3), f32),
        "g1": 1.0 + 0.1 * jax.random.normal(ks[1], (planes,), f32),
        "b1": 0.1 * jax.random.normal(ks[2], (planes,), f32),
        "m1": 0.1 * jax.random.normal(ks[3], (planes,), f32),
        "v1": 0.5 + jnp.abs(jax.random.normal(ks[4], (planes,), f32)),
        "w2": 0.1 * jax.random.normal(ks[5], (planes, planes, 3, 3), f32),
        "g2": 1.0 + 0.1 * jax.random.normal(ks[6], (planes,), f32),
        "b2": 0.1 * jax.random.normal(ks[7], (planes,), f32),
        "m2": 0.1 * jax.random.normal(ks[8], (planes,), f32),
        "v2": 0.5 + jnp.abs(jax.random.normal(ks[9], (planes,), f32)),
        "wd": 0.1 * jax.random.normal(ks[10], (planes, in_planes, 1, 1), f32),
        "gd": 1.0 + 0.1 * jax.random.normal(ks[11], (planes,), f32),
        "bd": 0.1 * jax.random.normal(ks[12], (planes,), f32),
        "md": 0.1 * jax.random.normal(ks[13], (planes,), f32),
        "vd": 0.5 + jnp.abs(jax.random.normal(ks[14], (planes,), f32)),
    }


if __name__ == "__main__":
    key = jax.random.PRNGKey(0)
    k_x, k_p, k_x2, k_p2 = jax.random.split(key, 4)

    def _run_case(name, x, params, in_planes, planes, stride):
        # Pre-round activations / conv weights to bf16 so the f32 reference
        # only measures the kernel's internal bf16 effects.
        xq = x.astype(jnp.bfloat16).astype(jnp.float32)
        pq = dict(params)
        for k in ("w1", "w2", "wd"):
            pq[k] = params[k].astype(jnp.bfloat16).astype(jnp.float32)
        out = basic_block_forward(xq, pq, in_planes=in_planes, planes=planes,
                                  stride=stride)
        out = jax.block_until_ready(out)
        ref = reference_forward(xq, pq, in_planes=in_planes, planes=planes,
                                stride=stride)
        assert out.shape == ref.shape, (name, out.shape, ref.shape)
        if not jnp.allclose(out, ref, atol=3e-2, rtol=3e-2):
            err = float(jnp.max(jnp.abs(out - ref)))
            raise AssertionError(f"{name}: mismatch, max abs err = {err}")

    # stride-2 block with 1x1 downsample (exercises the strided conv1 path,
    # the strided 1x1 downsample and the fused conv2 + residual path).
    in_planes, planes, stride = 4, 8, 2
    x = jax.random.normal(k_x, (2, in_planes, 16, 16), jnp.float32)    # NCHW
    params = init_params(k_p, in_planes, planes)
    _run_case("stride2", x, params, in_planes, planes, stride)

    # stride-1 identity block (stride-1 conv1 path + identity residual).
    in_planes2 = planes2 = 8
    x2 = jax.random.normal(k_x2, (2, in_planes2, 16, 16), jnp.float32)
    params2 = init_params(k_p2, in_planes2, planes2)
    _run_case("stride1", x2, params2, in_planes2, planes2, 1)

    print("KERNEL_OK")
</pallas_src>

<mosaic_0001>
module attributes {stable_mosaic.version = 11 : i64} {
  func.func @_basic_block_kernel(%arg0: i32, %arg1: memref<1x16x8x8xbf16, #tpu.memory_space<vmem>>, %arg2: memref<6x8x8xbf16, #tpu.memory_space<vmem>>, %arg3: memref<1x8xf32, #tpu.memory_space<vmem>>, %arg4: memref<1x8xf32, #tpu.memory_space<vmem>>, %arg5: memref<9x8x8xbf16, #tpu.memory_space<vmem>>, %arg6: memref<1x8xf32, #tpu.memory_space<vmem>>, %arg7: memref<1x8xf32, #tpu.memory_space<vmem>>, %arg8: memref<8x8xbf16, #tpu.memory_space<vmem>>, %arg9: memref<1x8xf32, #tpu.memory_space<vmem>>, %arg10: memref<1x8xf32, #tpu.memory_space<vmem>>, %arg11: memref<1x8x8x8xf32, #tpu.memory_space<vmem>>, %arg12: memref<2x9x9x8xbf16, #tpu.memory_space<vmem>>, %arg13: memref<10x10x8xbf16, #tpu.memory_space<vmem>>) attributes {dimension_semantics = [#tpu.dimension_semantics<parallel>], iteration_bounds = array<i64: 2>, scalar_prefetch = 0 : i64, scratch_operands = 2 : i64, tpu.core_type = #tpu.core_type<tc>, window_params = [{transform_indices = @transform_0, window_bounds = array<i64: 1, 16, 8, 8>}, {pipeline_mode = #tpu.pipeline_mode<synchronous>, transform_indices = @transform_1, window_bounds = array<i64: 6, 8, 8>}, {pipeline_mode = #tpu.pipeline_mode<synchronous>, transform_indices = @transform_2, window_bounds = array<i64: 1, 8>}, {pipeline_mode = #tpu.pipeline_mode<synchronous>, transform_indices = @transform_3, window_bounds = array<i64: 1, 8>}, {pipeline_mode = #tpu.pipeline_mode<synchronous>, transform_indices = @transform_4, window_bounds = array<i64: 9, 8, 8>}, {pipeline_mode = #tpu.pipeline_mode<synchronous>, transform_indices = @transform_5, window_bounds = array<i64: 1, 8>}, {pipeline_mode = #tpu.pipeline_mode<synchronous>, transform_indices = @transform_6, window_bounds = array<i64: 1, 8>}, {pipeline_mode = #tpu.pipeline_mode<synchronous>, transform_indices = @transform_7, window_bounds = array<i64: 8, 8>}, {pipeline_mode = #tpu.pipeline_mode<synchronous>, transform_indices = @transform_8, window_bounds = array<i64: 1, 8>}, {pipeline_mode = #tpu.pipeline_mode<synchronous>, transform_indices = @transform_9, window_bounds = array<i64: 1, 8>}, {transform_indices = @transform_10, window_bounds = array<i64: 1, 8, 8, 8>}]} {
    %cst = arith.constant 0.000000e+00 : bf16
    %0 = vector.broadcast %cst : bf16 to vector<2x9x9x8xbf16>
    %c0 = arith.constant 0 : index
    %c0_0 = arith.constant 0 : index
    %c0_1 = arith.constant 0 : index
    %c0_2 = arith.constant 0 : index
    %1 = vector.load %arg12[%c0, %c0_0, %c0_1, %c0_2] : memref<2x9x9x8xbf16, #tpu.memory_space<vmem>>, vector<2x9x9x8xbf16>
    tpu.vector_store %arg12[%c0, %c0_0, %c0_1, %c0_2], %0 {strides = array<i32>} : memref<2x9x9x8xbf16, #tpu.memory_space<vmem>>, vector<2x9x9x8xbf16>,
    %cst_3 = arith.constant 0.000000e+00 : bf16
    %2 = vector.broadcast %cst_3 : bf16 to vector<10x10x8xbf16>
    %c0_4 = arith.constant 0 : index
    %c0_5 = arith.constant 0 : index
    %c0_6 = arith.constant 0 : index
    %3 = vector.load %arg13[%c0_4, %c0_5, %c0_6] : memref<10x10x8xbf16, #tpu.memory_space<vmem>>, vector<10x10x8xbf16>
    tpu.vector_store %arg13[%c0_4, %c0_5, %c0_6], %2 {strides = array<i32>} : memref<10x10x8xbf16, #tpu.memory_space<vmem>>, vector<10x10x8xbf16>,
    %c0_i32 = arith.constant 0 : i32
    %c1_i32 = arith.constant 1 : i32
    %4 = arith.muli %c0_i32, %c1_i32 : i32
    %c0_i32_7 = arith.constant 0 : i32
    %5 = arith.addi %c0_i32_7, %4 : i32
    %c8_i32 = arith.constant 8 : i32
    %6 = arith.muli %5, %c8_i32 : i32
    %c2_i32 = arith.constant 2 : i32
    %7 = arith.muli %c2_i32, %6 : i32
    %c0_8 = arith.constant 0 : index
    %8 = arith.index_cast %7 : i32 to index
    %c0_9 = arith.constant 0 : index
    %c0_10 = arith.constant 0 : index
    %9 = vector.load %arg1[%c0_8, %8, %c0_9, %c0_10] : memref<1x16x8x8xbf16, #tpu.memory_space<vmem>>, vector<1x16x8x8xbf16>
    %10 = vector.shape_cast %9 : vector<1x16x8x8xbf16> to vector<16x8x8xbf16>
    %11 = vector.shape_cast %10 : vector<16x8x8xbf16> to vector<8x2x8x8xbf16>
    %12 = vector.extract_strided_slice %11 {offsets = [0, 0, 0, 0], sizes = [8, 1, 8, 8], strides = [1, 1, 1, 1]} : vector<8x2x8x8xbf16> to vector<8x1x8x8xbf16>
    %13 = vector.shape_cast %12 : vector<8x1x8x8xbf16> to vector<8x8x8xbf16>
    %c1 = arith.constant 1 : index
    %14 = arith.index_cast %6 : i32 to index
    %c1_11 = arith.constant 1 : index
    %c0_12 = arith.constant 0 : index
    %15 = vector.load %arg12[%c1, %14, %c1_11, %c0_12] : memref<2x9x9x8xbf16, #tpu.memory_space<vmem>>, vector<1x8x8x8xbf16>
    %16 = vector.shape_cast %15 : vector<1x8x8x8xbf16> to vector<8x8x8xbf16>
    %17 = vector.shape_cast %13 : vector<8x8x8xbf16> to vector<1x8x8x8xbf16>
    tpu.vector_store %arg12[%c1, %14, %c1_11, %c0_12], %17 {strides = array<i32>} : memref<2x9x9x8xbf16, #tpu.memory_space<vmem>>, vector<1x8x8x8xbf16>,
    %18 = vector.extract_strided_slice %11 {offsets = [0, 1, 0, 0], sizes = [8, 1, 8, 8], strides = [1, 1, 1, 1]} : vector<8x2x8x8xbf16> to vector<8x1x8x8xbf16>
    %19 = vector.shape_cast %18 : vector<8x1x8x8xbf16> to vector<8x8x8xbf16>
    %c1_i32_13 = arith.constant 1 : i32
    %20 = arith.addi %6, %c1_i32_13 : i32
    %c0_14 = arith.constant 0 : index
    %21 = arith.index_cast %20 : i32 to index
    %c1_15 = arith.constant 1 : index
    %c0_16 = arith.constant 0 : index
    %22 = vector.load %arg12[%c0_14, %21, %c1_15, %c0_16] : memref<2x9x9x8xbf16, #tpu.memory_space<vmem>>, vector<1x8x8x8xbf16>
    %23 = vector.shape_cast %22 : vector<1x8x8x8xbf16> to vector<8x8x8xbf16>
    %24 = vector.shape_cast %19 : vector<8x8x8xbf16> to vector<1x8x8x8xbf16>
    tpu.vector_store %arg12[%c0_14, %21, %c1_15, %c0_16], %24 {strides = array<i32>} : memref<2x9x9x8xbf16, #tpu.memory_space<vmem>>, vector<1x8x8x8xbf16>,
    %c1_i32_17 = arith.constant 1 : i32
    %c0_i32_18 = arith.constant 0 : i32
    %c1_i32_19 = arith.constant 1 : i32
    %25 = arith.muli %c0_i32_18, %c1_i32_19 : i32
    %c0_i32_20 = arith.constant 0 : i32
    %26 = arith.addi %c0_i32_20, %25 : i32
    %c8_i32_21 = arith.constant 8 : i32
    %27 = arith.muli %26, %c8_i32_21 : i32
    %c0_i32_22 = arith.constant 0 : i32
    %28 = arith.addi %27, %c0_i32_22 : i32
    %c0_23 = arith.constant 0 : index
    %29 = arith.index_cast %28 : i32 to index
    %c1_24 = arith.constant 1 : index
    %c0_25 = arith.constant 0 : index
    %30 = vector.load %arg12[%c0_23, %29, %c1_24, %c0_25] : memref<2x9x9x8xbf16, #tpu.memory_space<vmem>>, vector<1x8x8x8xbf16>
    %31 = vector.shape_cast %30 : vector<1x8x8x8xbf16> to vector<8x8x8xbf16>
    %c0_i32_26 = arith.constant 0 : i32
    %32 = arith.addi %27, %c0_i32_26 : i32
    %c0_27 = arith.constant 0 : index
    %33 = arith.index_cast %32 : i32 to index
    %c0_28 = arith.constant 0 : index
    %c0_29 = arith.constant 0 : index
    %34 = vector.load %arg12[%c0_27, %33, %c0_28, %c0_29] : memref<2x9x9x8xbf16, #tpu.memory_space<vmem>>, vector<1x8x8x8xbf16>
    %35 = vector.shape_cast %34 : vector<1x8x8x8xbf16> to vector<8x8x8xbf16>
    %36 = vector.shape_cast %31 : vector<8x8x8xbf16> to vector<64x8xbf16>
    %c0_30 = arith.constant 0 : index
    %c0_31 = arith.constant 0 : index
    %c0_32 = arith.constant 0 : index
    %37 = vector.load %arg2[%c0_30, %c0_31, %c0_32] : memref<6x8x8xbf16, #tpu.memory_space<vmem>>, vector<1x8x8xbf16>
    %38 = vector.shape_cast %37 : vector<1x8x8xbf16> to vector<8x8xbf16>
    %cst_33 = arith.constant dense<0.000000e+00> : vector<64x8xf32>
    %39 = tpu.matmul %36, %38, %cst_33 {dimension_numbers = #tpu.dot_dimension_numbers<[1], [0], [0], [1], [0, 0, 1, 1], [], []>} : vector<64x8xbf16>, vector<8x8xbf16>, vector<64x8xf32> -> vector<64x8xf32>
    %40 = vector.shape_cast %35 : vector<8x8x8xbf16> to vector<64x8xbf16>
    %c3 = arith.constant 3 : index
    %c0_34 = arith.constant 0 : index
    %c0_35 = arith.constant 0 : index
    %41 = vector.load %arg2[%c3, %c0_34, %c0_35] : memref<6x8x8xbf16, #tpu.memory_space<vmem>>, vector<1x8x8xbf16>
    %42 = vector.shape_cast %41 : vector<1x8x8xbf16> to vector<8x8xbf16>
    %cst_36 = arith.constant dense<0.000000e+00> : vector<64x8xf32>
    %43 = tpu.matmul %40, %42, %cst_36 {dimension_numbers = #tpu.dot_dimension_numbers<[1], [0], [0], [1], [0, 0, 1, 1], [], []>} : vector<64x8xbf16>, vector<8x8xbf16>, vector<64x8xf32> -> vector<64x8xf32>
    %44 = arith.addf %39, %43 : vector<64x8xf32>
    %c0_i32_37 = arith.constant 0 : i32
    %45 = arith.addi %27, %c0_i32_37 : i32
    %c1_38 = arith.constant 1 : index
    %46 = arith.index_cast %45 : i32 to index
    %c1_39 = arith.constant 1 : index
    %c0_40 = arith.constant 0 : index
    %47 = vector.load %arg12[%c1_38, %46, %c1_39, %c0_40] : memref<2x9x9x8xbf16, #tpu.memory_space<vmem>>, vector<1x8x8x8xbf16>
    %48 = vector.shape_cast %47 : vector<1x8x8x8xbf16> to vector<8x8x8xbf16>
    %c0_i32_41 = arith.constant 0 : i32
    %49 = arith.addi %27, %c0_i32_41 : i32
    %c1_42 = arith.constant 1 : index
    %50 = arith.index_cast %49 : i32 to index
    %c0_43 = arith.constant 0 : index
    %c0_44 = arith.constant 0 : index
    %51 = vector.load %arg12[%c1_42, %50, %c0_43, %c0_44] : memref<2x9x9x8xbf16, #tpu.memory_space<vmem>>, vector<1x8x8x8xbf16>
    %52 = vector.shape_cast %51 : vector<1x8x8x8xbf16> to vector<8x8x8xbf16>
    %53 = vector.shape_cast %48 : vector<8x8x8xbf16> to vector<64x8xbf16>
    %c1_45 = arith.constant 1 : index
    %c0_46 = arith.constant 0 : index
    %c0_47 = arith.constant 0 : index
    %54 = vector.load %arg2[%c1_45, %c0_46, %c0_47] : memref<6x8x8xbf16, #tpu.memory_space<vmem>>, vector<1x8x8xbf16>
    %55 = vector.shape_cast %54 : vector<1x8x8xbf16> to vector<8x8xbf16>
    %cst_48 = arith.constant dense<0.000000e+00> : vector<64x8xf32>
    %56 = tpu.matmul %53, %55, %cst_48 {dimension_numbers = #tpu.dot_dimension_numbers<[1], [0], [0], [1], [0, 0, 1, 1], [], []>} : vector<64x8xbf16>, vector<8x8xbf16>, vector<64x8xf32> -> vector<64x8xf32>
    %57 = vector.shape_cast %52 : vector<8x8x8xbf16> to vector<64x8xbf16>
    %c4 = arith.constant 4 : index
    %c0_49 = arith.constant 0 : index
    %c0_50 = arith.constant 0 : index
    %58 = vector.load %arg2[%c4, %c0_49, %c0_50] : memref<6x8x8xbf16, #tpu.memory_space<vmem>>, vector<1x8x8xbf16>
    %59 = vector.shape_cast %58 : vector<1x8x8xbf16> to vector<8x8xbf16>
    %cst_51 = arith.constant dense<0.000000e+00> : vector<64x8xf32>
    %60 = tpu.matmul %57, %59, %cst_51 {dimension_numbers = #tpu.dot_dimension_numbers<[1], [0], [0], [1], [0, 0, 1, 1], [], []>} : vector<64x8xbf16>, vector<8x8xbf16>, vector<64x8xf32> -> vector<64x8xf32>
    %61 = arith.addf %56, %60 : vector<64x8xf32>
    %62 = arith.addf %44, %61 : vector<64x8xf32>
    %c1_i32_52 = arith.constant 1 : i32
    %63 = arith.addi %27, %c1_i32_52 : i32
    %c0_53 = arith.constant 0 : index
    %64 = arith.index_cast %63 : i32 to index
    %c1_54 = arith.constant 1 : index
    %c0_55 = arith.constant 0 : index
    %65 = vector.load %arg12[%c0_53, %64, %c1_54, %c0_55] : memref<2x9x9x8xbf16, #tpu.memory_space<vmem>>, vector<1x8x8x8xbf16>
    %66 = vector.shape_cast %65 : vector<1x8x8x8xbf16> to vector<8x8x8xbf16>
    %c1_i32_56 = arith.constant 1 : i32
    %67 = arith.addi %27, %c1_i32_56 : i32
    %c0_57 = arith.constant 0 : index
    %68 = arith.index_cast %67 : i32 to index
    %c0_58 = arith.constant 0 : index
    %c0_59 = arith.constant 0 : index
    %69 = vector.load %arg12[%c0_57, %68, %c0_58, %c0_59] : memref<2x9x9x8xbf16, #tpu.memory_space<vmem>>, vector<1x8x8x8xbf16>
    %70 = vector.shape_cast %69 : vector<1x8x8x8xbf16> to vector<8x8x8xbf16>
    %71 = vector.shape_cast %66 : vector<8x8x8xbf16> to vector<64x8xbf16>
    %c2 = arith.constant 2 : index
    %c0_60 = arith.constant 0 : index
    %c0_61 = arith.constant 0 : index
    %72 = vector.load %arg2[%c2, %c0_60, %c0_61] : memref<6x8x8xbf16, #tpu.memory_space<vmem>>, vector<1x8x8xbf16>
    %73 = vector.shape_cast %72 : vector<1x8x8xbf16> to vector<8x8xbf16>
    %cst_62 = arith.constant dense<0.000000e+00> : vector<64x8xf32>
    %74 = tpu.matmul %71, %73, %cst_62 {dimension_numbers = #tpu.dot_dimension_numbers<[1], [0], [0], [1], [0, 0, 1, 1], [], []>} : vector<64x8xbf16>, vector<8x8xbf16>, vector<64x8xf32> -> vector<64x8xf32>
    %75 = vector.shape_cast %70 : vector<8x8x8xbf16> to vector<64x8xbf16>
    %c5 = arith.constant 5 : index
    %c0_63 = arith.constant 0 : index
    %c0_64 = arith.constant 0 : index
    %76 = vector.load %arg2[%c5, %c0_63, %c0_64] : memref<6x8x8xbf16, #tpu.memory_space<vmem>>, vector<1x8x8xbf16>
    %77 = vector.shape_cast %76 : vector<1x8x8xbf16> to vector<8x8xbf16>
    %cst_65 = arith.constant dense<0.000000e+00> : vector<64x8xf32>
    %78 = tpu.matmul %75, %77, %cst_65 {dimension_numbers = #tpu.dot_dimension_numbers<[1], [0], [0], [1], [0, 0, 1, 1], [], []>} : vector<64x8xbf16>, vector<8x8xbf16>, vector<64x8xf32> -> vector<64x8xf32>
    %79 = arith.addf %74, %78 : vector<64x8xf32>
    %80 = arith.addf %62, %79 : vector<64x8xf32>
    %c0_66 = arith.constant 0 : index
    %c0_67 = arith.constant 0 : index
    %81 = vector.load %arg3[%c0_66, %c0_67] : memref<1x8xf32, #tpu.memory_space<vmem>>, vector<1x8xf32>
    %82 = vector.broadcast %81 : vector<1x8xf32> to vector<64x8xf32>
    %83 = arith.mulf %80, %82 : vector<64x8xf32>
    %c0_68 = arith.constant 0 : index
    %c0_69 = arith.constant 0 : index
    %84 = vector.load %arg4[%c0_68, %c0_69] : memref<1x8xf32, #tpu.memory_space<vmem>>, vector<1x8xf32>
    %85 = vector.broadcast %84 : vector<1x8xf32> to vector<64x8xf32>
    %86 = arith.addf %83, %85 : vector<64x8xf32>
    %cst_70 = arith.constant 0.000000e+00 : f32
    %87 = vector.broadcast %cst_70 : f32 to vector<64x8xf32>
    %88 = arith.maximumf %86, %87 : vector<64x8xf32>
    %89 = vector.shape_cast %88 : vector<64x8xf32> to vector<8x8x8xf32>
    %90 = arith.truncf %89 : vector<8x8x8xf32> to vector<8x8x8xbf16>
    %c1_i32_71 = arith.constant 1 : i32
    %91 = arith.addi %27, %c1_i32_71 : i32
    %92 = arith.index_cast %91 : i32 to index
    %c1_72 = arith.constant 1 : index
    %c0_73 = arith.constant 0 : index
    %93 = vector.load %arg13[%92, %c1_72, %c0_73] : memref<10x10x8xbf16, #tpu.memory_space<vmem>>, vector<8x8x8xbf16>
    tpu.vector_store %arg13[%92, %c1_72, %c0_73], %90 {strides = array<i32>} : memref<10x10x8xbf16, #tpu.memory_space<vmem>>, vector<8x8x8xbf16>,
    %c1_i32_74 = arith.constant 1 : i32
    %c0_i32_75 = arith.constant 0 : i32
    %c1_i32_76 = arith.constant 1 : i32
    %94 = arith.muli %c0_i32_75, %c1_i32_76 : i32
    %c0_i32_77 = arith.constant 0 : i32
    %95 = arith.addi %c0_i32_77, %94 : i32
    %c8_i32_78 = arith.constant 8 : i32
    %96 = arith.muli %95, %c8_i32_78 : i32
    %c0_i32_79 = arith.constant 0 : i32
    %97 = arith.addi %96, %c0_i32_79 : i32
    %98 = arith.index_cast %97 : i32 to index
    %c0_80 = arith.constant 0 : index
    %c0_81 = arith.constant 0 : index
    %99 = vector.load %arg13[%98, %c0_80, %c0_81] : memref<10x10x8xbf16, #tpu.memory_space<vmem>>, vector<8x8x8xbf16>
    %100 = vector.shape_cast %99 : vector<8x8x8xbf16> to vector<64x8xbf16>
    %c0_82 = arith.constant 0 : index
    %c0_83 = arith.constant 0 : index
    %c0_84 = arith.constant 0 : index
    %101 = vector.load %arg5[%c0_82, %c0_83, %c0_84] : memref<9x8x8xbf16, #tpu.memory_space<vmem>>, vector<1x8x8xbf16>
    %102 = vector.shape_cast %101 : vector<1x8x8xbf16> to vector<8x8xbf16>
    %cst_85 = arith.constant dense<0.000000e+00> : vector<64x8xf32>
    %103 = tpu.matmul %100, %102, %cst_85 {dimension_numbers = #tpu.dot_dimension_numbers<[1], [0], [0], [1], [0, 0, 1, 1], [], []>} : vector<64x8xbf16>, vector<8x8xbf16>, vector<64x8xf32> -> vector<64x8xf32>
    %c0_i32_86 = arith.constant 0 : i32
    %104 = arith.addi %96, %c0_i32_86 : i32
    %105 = arith.index_cast %104 : i32 to index
    %c1_87 = arith.constant 1 : index
    %c0_88 = arith.constant 0 : index
    %106 = vector.load %arg13[%105, %c1_87, %c0_88] : memref<10x10x8xbf16, #tpu.memory_space<vmem>>, vector<8x8x8xbf16>
    %107 = vector.shape_cast %106 : vector<8x8x8xbf16> to vector<64x8xbf16>
    %c1_89 = arith.constant 1 : index
    %c0_90 = arith.constant 0 : index
    %c0_91 = arith.constant 0 : index
    %108 = vector.load %arg5[%c1_89, %c0_90, %c0_91] : memref<9x8x8xbf16, #tpu.memory_space<vmem>>, vector<1x8x8xbf16>
    %109 = vector.shape_cast %108 : vector<1x8x8xbf16> to vector<8x8xbf16>
    %cst_92 = arith.constant dense<0.000000e+00> : vector<64x8xf32>
    %110 = tpu.matmul %107, %109, %cst_92 {dimension_numbers = #tpu.dot_dimension_numbers<[1], [0], [0], [1], [0, 0, 1, 1], [], []>} : vector<64x8xbf16>, vector<8x8xbf16>, vector<64x8xf32> -> vector<64x8xf32>
    %111 = arith.addf %103, %110 : vector<64x8xf32>
    %c0_i32_93 = arith.constant 0 : i32
    %112 = arith.addi %96, %c0_i32_93 : i32
    %113 = arith.index_cast %112 : i32 to index
    %c2_94 = arith.constant 2 : index
    %c0_95 = arith.constant 0 : index
    %114 = vector.load %arg13[%113, %c2_94, %c0_95] : memref<10x10x8xbf16, #tpu.memory_space<vmem>>, vector<8x8x8xbf16>
    %115 = vector.shape_cast %114 : vector<8x8x8xbf16> to vector<64x8xbf16>
    %c2_96 = arith.constant 2 : index
    %c0_97 = arith.constant 0 : index
    %c0_98 = arith.constant 0 : index
    %116 = vector.load %arg5[%c2_96, %c0_97, %c0_98] : memref<9x8x8xbf16, #tpu.memory_space<vmem>>, vector<1x8x8xbf16>
    %117 = vector.shape_cast %116 : vector<1x8x8xbf16> to vector<8x8xbf16>
    %cst_99 = arith.constant dense<0.000000e+00> : vector<64x8xf32>
    %118 = tpu.matmul %115, %117, %cst_99 {dimension_numbers = #tpu.dot_dimension_numbers<[1], [0], [0], [1], [0, 0, 1, 1], [], []>} : vector<64x8xbf16>, vector<8x8xbf16>, vector<64x8xf32> -> vector<64x8xf32>
    %119 = arith.addf %111, %118 : vector<64x8xf32>
    %c1_i32_100 = arith.constant 1 : i32
    %120 = arith.addi %96, %c1_i32_100 : i32
    %121 = arith.index_cast %120 : i32 to index
    %c0_101 = arith.constant 0 : index
    %c0_102 = arith.constant 0 : index
    %122 = vector.load %arg13[%121, %c0_101, %c0_102] : memref<10x10x8xbf16, #tpu.memory_space<vmem>>, vector<8x8x8xbf16>
    %123 = vector.shape_cast %122 : vector<8x8x8xbf16> to vector<64x8xbf16>
    %c3_103 = arith.constant 3 : index
    %c0_104 = arith.constant 0 : index
    %c0_105 = arith.constant 0 : index
    %124 = vector.load %arg5[%c3_103, %c0_104, %c0_105] : memref<9x8x8xbf16, #tpu.memory_space<vmem>>, vector<1x8x8xbf16>
    %125 = vector.shape_cast %124 : vector<1x8x8xbf16> to vector<8x8xbf16>
    %cst_106 = arith.constant dense<0.000000e+00> : vector<64x8xf32>
    %126 = tpu.matmul %123, %125, %cst_106 {dimension_numbers = #tpu.dot_dimension_numbers<[1], [0], [0], [1], [0, 0, 1, 1], [], []>} : vector<64x8xbf16>, vector<8x8xbf16>, vector<64x8xf32> -> vector<64x8xf32>
    %c1_i32_107 = arith.constant 1 : i32
    %127 = arith.addi %96, %c1_i32_107 : i32
    %128 = arith.index_cast %127 : i32 to index
    %c1_108 = arith.constant 1 : index
    %c0_109 = arith.constant 0 : index
    %129 = vector.load %arg13[%128, %c1_108, %c0_109] : memref<10x10x8xbf16, #tpu.memory_space<vmem>>, vector<8x8x8xbf16>
    %130 = vector.shape_cast %129 : vector<8x8x8xbf16> to vector<64x8xbf16>
    %c4_110 = arith.constant 4 : index
    %c0_111 = arith.constant 0 : index
    %c0_112 = arith.constant 0 : index
    %131 = vector.load %arg5[%c4_110, %c0_111, %c0_112] : memref<9x8x8xbf16, #tpu.memory_space<vmem>>, vector<1x8x8xbf16>
    %132 = vector.shape_cast %131 : vector<1x8x8xbf16> to vector<8x8xbf16>
    %cst_113 = arith.constant dense<0.000000e+00> : vector<64x8xf32>
    %133 = tpu.matmul %130, %132, %cst_113 {dimension_numbers = #tpu.dot_dimension_numbers<[1], [0], [0], [1], [0, 0, 1, 1], [], []>} : vector<64x8xbf16>, vector<8x8xbf16>, vector<64x8xf32> -> vector<64x8xf32>
    %134 = arith.addf %126, %133 : vector<64x8xf32>
    %c1_i32_114 = arith.constant 1 : i32
    %135 = arith.addi %96, %c1_i32_114 : i32
    %136 = arith.index_cast %135 : i32 to index
    %c2_115 = arith.constant 2 : index
    %c0_116 = arith.constant 0 : index
    %137 = vector.load %arg13[%136, %c2_115, %c0_116] : memref<10x10x8xbf16, #tpu.memory_space<vmem>>, vector<8x8x8xbf16>
    %138 = vector.shape_cast %137 : vector<8x8x8xbf16> to vector<64x8xbf16>
    %c5_117 = arith.constant 5 : index
    %c0_118 = arith.constant 0 : index
    %c0_119 = arith.constant 0 : index
    %139 = vector.load %arg5[%c5_117, %c0_118, %c0_119] : memref<9x8x8xbf16, #tpu.memory_space<vmem>>, vector<1x8x8xbf16>
    %140 = vector.shape_cast %139 : vector<1x8x8xbf16> to vector<8x8xbf16>
    %cst_120 = arith.constant dense<0.000000e+00> : vector<64x8xf32>
    %141 = tpu.matmul %138, %140, %cst_120 {dimension_numbers = #tpu.dot_dimension_numbers<[1], [0], [0], [1], [0, 0, 1, 1], [], []>} : vector<64x8xbf16>, vector<8x8xbf16>, vector<64x8xf32> -> vector<64x8xf32>
    %142 = arith.addf %134, %141 : vector<64x8xf32>
    %143 = arith.addf %119, %142 : vector<64x8xf32>
    %c2_i32_121 = arith.constant 2 : i32
    %144 = arith.addi %96, %c2_i32_121 : i32
    %145 = arith.index_cast %144 : i32 to index
    %c0_122 = arith.constant 0 : index
    %c0_123 = arith.constant 0 : index
    %146 = vector.load %arg13[%145, %c0_122, %c0_123] : memref<10x10x8xbf16, #tpu.memory_space<vmem>>, vector<8x8x8xbf16>
    %147 = vector.shape_cast %146 : vector<8x8x8xbf16> to vector<64x8xbf16>
    %c6 = arith.constant 6 : index
    %c0_124 = arith.constant 0 : index
    %c0_125 = arith.constant 0 : index
    %148 = vector.load %arg5[%c6, %c0_124, %c0_125] : memref<9x8x8xbf16, #tpu.memory_space<vmem>>, vector<1x8x8xbf16>
    %149 = vector.shape_cast %148 : vector<1x8x8xbf16> to vector<8x8xbf16>
    %cst_126 = arith.constant dense<0.000000e+00> : vector<64x8xf32>
    %150 = tpu.matmul %147, %149, %cst_126 {dimension_numbers = #tpu.dot_dimension_numbers<[1], [0], [0], [1], [0, 0, 1, 1], [], []>} : vector<64x8xbf16>, vector<8x8xbf16>, vector<64x8xf32> -> vector<64x8xf32>
    %c2_i32_127 = arith.constant 2 : i32
    %151 = arith.addi %96, %c2_i32_127 : i32
    %152 = arith.index_cast %151 : i32 to index
    %c1_128 = arith.constant 1 : index
    %c0_129 = arith.constant 0 : index
    %153 = vector.load %arg13[%152, %c1_128, %c0_129] : memref<10x10x8xbf16, #tpu.memory_space<vmem>>, vector<8x8x8xbf16>
    %154 = vector.shape_cast %153 : vector<8x8x8xbf16> to vector<64x8xbf16>
    %c7 = arith.constant 7 : index
    %c0_130 = arith.constant 0 : index
    %c0_131 = arith.constant 0 : index
    %155 = vector.load %arg5[%c7, %c0_130, %c0_131] : memref<9x8x8xbf16, #tpu.memory_space<vmem>>, vector<1x8x8xbf16>
    %156 = vector.shape_cast %155 : vector<1x8x8xbf16> to vector<8x8xbf16>
    %cst_132 = arith.constant dense<0.000000e+00> : vector<64x8xf32>
    %157 = tpu.matmul %154, %156, %cst_132 {dimension_numbers = #tpu.dot_dimension_numbers<[1], [0], [0], [1], [0, 0, 1, 1], [], []>} : vector<64x8xbf16>, vector<8x8xbf16>, vector<64x8xf32> -> vector<64x8xf32>
    %158 = arith.addf %150, %157 : vector<64x8xf32>
    %c2_i32_133 = arith.constant 2 : i32
    %159 = arith.addi %96, %c2_i32_133 : i32
    %160 = arith.index_cast %159 : i32 to index
    %c2_134 = arith.constant 2 : index
    %c0_135 = arith.constant 0 : index
    %161 = vector.load %arg13[%160, %c2_134, %c0_135] : memref<10x10x8xbf16, #tpu.memory_space<vmem>>, vector<8x8x8xbf16>
    %162 = vector.shape_cast %161 : vector<8x8x8xbf16> to vector<64x8xbf16>
    %c8 = arith.constant 8 : index
    %c0_136 = arith.constant 0 : index
    %c0_137 = arith.constant 0 : index
    %163 = vector.load %arg5[%c8, %c0_136, %c0_137] : memref<9x8x8xbf16, #tpu.memory_space<vmem>>, vector<1x8x8xbf16>
    %164 = vector.shape_cast %163 : vector<1x8x8xbf16> to vector<8x8xbf16>
    %cst_138 = arith.constant dense<0.000000e+00> : vector<64x8xf32>
    %165 = tpu.matmul %162, %164, %cst_138 {dimension_numbers = #tpu.dot_dimension_numbers<[1], [0], [0], [1], [0, 0, 1, 1], [], []>} : vector<64x8xbf16>, vector<8x8xbf16>, vector<64x8xf32> -> vector<64x8xf32>
    %166 = arith.addf %158, %165 : vector<64x8xf32>
    %167 = arith.addf %143, %166 : vector<64x8xf32>
    %c0_139 = arith.constant 0 : index
    %c0_140 = arith.constant 0 : index
    %168 = vector.load %arg6[%c0_139, %c0_140] : memref<1x8xf32, #tpu.memory_space<vmem>>, vector<1x8xf32>
    %169 = vector.broadcast %168 : vector<1x8xf32> to vector<64x8xf32>
    %170 = arith.mulf %167, %169 : vector<64x8xf32>
    %c0_141 = arith.constant 0 : index
    %c0_142 = arith.constant 0 : index
    %171 = vector.load %arg7[%c0_141, %c0_142] : memref<1x8xf32, #tpu.memory_space<vmem>>, vector<1x8xf32>
    %172 = vector.broadcast %171 : vector<1x8xf32> to vector<64x8xf32>
    %173 = arith.addf %170, %172 : vector<64x8xf32>
    %c1_143 = arith.constant 1 : index
    %174 = arith.index_cast %96 : i32 to index
    %c1_144 = arith.constant 1 : index
    %c0_145 = arith.constant 0 : index
    %175 = vector.load %arg12[%c1_143, %174, %c1_144, %c0_145] : memref<2x9x9x8xbf16, #tpu.memory_space<vmem>>, vector<1x8x8x8xbf16>
    %176 = vector.shape_cast %175 : vector<1x8x8x8xbf16> to vector<8x8x8xbf16>
    %177 = vector.shape_cast %176 : vector<8x8x8xbf16> to vector<64x8xbf16>
    %c0_146 = arith.constant 0 : index
    %c0_147 = arith.constant 0 : index
    %178 = vector.load %arg8[%c0_146, %c0_147] : memref<8x8xbf16, #tpu.memory_space<vmem>>, vector<8x8xbf16>
    %cst_148 = arith.constant dense<0.000000e+00> : vector<64x8xf32>
    %179 = tpu.matmul %177, %178, %cst_148 {dimension_numbers = #tpu.dot_dimension_numbers<[1], [0], [0], [1], [0, 0, 1, 1], [], []>} : vector<64x8xbf16>, vector<8x8xbf16>, vector<64x8xf32> -> vector<64x8xf32>
    %c0_149 = arith.constant 0 : index
    %c0_150 = arith.constant 0 : index
    %180 = vector.load %arg9[%c0_149, %c0_150] : memref<1x8xf32, #tpu.memory_space<vmem>>, vector<1x8xf32>
    %181 = vector.broadcast %180 : vector<1x8xf32> to vector<64x8xf32>
    %182 = arith.mulf %179, %181 : vector<64x8xf32>
    %c0_151 = arith.constant 0 : index
    %c0_152 = arith.constant 0 : index
    %183 = vector.load %arg10[%c0_151, %c0_152] : memref<1x8xf32, #tpu.memory_space<vmem>>, vector<1x8xf32>
    %184 = vector.broadcast %183 : vector<1x8xf32> to vector<64x8xf32>
    %185 = arith.addf %182, %184 : vector<64x8xf32>
    %186 = arith.addf %173, %185 : vector<64x8xf32>
    %cst_153 = arith.constant 0.000000e+00 : f32
    %187 = vector.broadcast %cst_153 : f32 to vector<64x8xf32>
    %188 = arith.maximumf %186, %187 : vector<64x8xf32>
    %189 = vector.shape_cast %188 : vector<64x8xf32> to vector<8x8x8xf32>
    %c0_154 = arith.constant 0 : index
    %190 = arith.index_cast %96 : i32 to index
    %c0_155 = arith.constant 0 : index
    %c0_156 = arith.constant 0 : index
    %191 = vector.load %arg11[%c0_154, %190, %c0_155, %c0_156] : memref<1x8x8x8xf32, #tpu.memory_space<vmem>>, vector<1x8x8x8xf32>
    %192 = vector.shape_cast %191 : vector<1x8x8x8xf32> to vector<8x8x8xf32>
    %193 = vector.shape_cast %189 : vector<8x8x8xf32> to vector<1x8x8x8xf32>
    tpu.vector_store %arg11[%c0_154, %190, %c0_155, %c0_156], %193 {strides = array<i32>} : memref<1x8x8x8xf32, #tpu.memory_space<vmem>>, vector<1x8x8x8xf32>,
    %c1_i32_157 = arith.constant 1 : i32
    return
  }
  func.func @transform_0(%arg0: i32) -> (i32, i32, i32, i32) {
    %c0_i32 = arith.constant 0 : i32
    %c0_i32_0 = arith.constant 0 : i32
    %c0_i32_1 = arith.constant 0 : i32
    %c0_i32_2 = arith.constant 0 : i32
    return %arg0, %c0_i32, %c0_i32_0, %c0_i32_1 : i32, i32, i32, i32
  }
  func.func @transform_1(%arg0: i32) -> (i32, i32, i32) {
    %c0_i32 = arith.constant 0 : i32
    %c0_i32_0 = arith.constant 0 : i32
    %c0_i32_1 = arith.constant 0 : i32
    %c0_i32_2 = arith.constant 0 : i32
    return %c0_i32, %c0_i32_0, %c0_i32_1 : i32, i32, i32
  }
  func.func @transform_2(%arg0: i32) -> (i32, i32) {
    %c0_i32 = arith.constant 0 : i32
    %c0_i32_0 = arith.constant 0 : i32
    %c0_i32_1 = arith.constant 0 : i32
    return %c0_i32, %c0_i32_0 : i32, i32
  }
  func.func @transform_3(%arg0: i32) -> (i32, i32) {
    %c0_i32 = arith.constant 0 : i32
    %c0_i32_0 = arith.constant 0 : i32
    %c0_i32_1 = arith.constant 0 : i32
    return %c0_i32, %c0_i32_0 : i32, i32
  }
  func.func @transform_4(%arg0: i32) -> (i32, i32, i32) {
    %c0_i32 = arith.constant 0 : i32
    %c0_i32_0 = arith.constant 0 : i32
    %c0_i32_1 = arith.constant 0 : i32
    %c0_i32_2 = arith.constant 0 : i32
    return %c0_i32, %c0_i32_0, %c0_i32_1 : i32, i32, i32
  }
  func.func @transform_5(%arg0: i32) -> (i32, i32) {
    %c0_i32 = arith.constant 0 : i32
    %c0_i32_0 = arith.constant 0 : i32
    %c0_i32_1 = arith.constant 0 : i32
    return %c0_i32, %c0_i32_0 : i32, i32
  }
  func.func @transform_6(%arg0: i32) -> (i32, i32) {
    %c0_i32 = arith.constant 0 : i32
    %c0_i32_0 = arith.constant 0 : i32
    %c0_i32_1 = arith.constant 0 : i32
    return %c0_i32, %c0_i32_0 : i32, i32
  }
  func.func @transform_7(%arg0: i32) -> (i32, i32) {
    %c0_i32 = arith.constant 0 : i32
    %c0_i32_0 = arith.constant 0 : i32
    %c0_i32_1 = arith.constant 0 : i32
    return %c0_i32, %c0_i32_0 : i32, i32
  }
  func.func @transform_8(%arg0: i32) -> (i32, i32) {
    %c0_i32 = arith.constant 0 : i32
    %c0_i32_0 = arith.constant 0 : i32
    %c0_i32_1 = arith.constant 0 : i32
    return %c0_i32, %c0_i32_0 : i32, i32
  }
  func.func @transform_9(%arg0: i32) -> (i32, i32) {
    %c0_i32 = arith.constant 0 : i32
    %c0_i32_0 = arith.constant 0 : i32
    %c0_i32_1 = arith.constant 0 : i32
    return %c0_i32, %c0_i32_0 : i32, i32
  }
  func.func @transform_10(%arg0: i32) -> (i32, i32, i32, i32) {
    %c0_i32 = arith.constant 0 : i32
    %c0_i32_0 = arith.constant 0 : i32
    %c0_i32_1 = arith.constant 0 : i32
    %c0_i32_2 = arith.constant 0 : i32
    return %arg0, %c0_i32, %c0_i32_0, %c0_i32_1 : i32, i32, i32, i32
  }
}

</mosaic_0001>

<bundles_post_ra>
// kernel: tpu_custom_call.1
= control target key start
LH: loop header
LB: loop body
LE: loop exit
PB: predicated region body
PF: predicated region fallthrough
CT: control target
= control target key end

     0   :  { %15 = vsyncpa [#allocation5], 0  ;;  %s5700_s0 = inlined_call_operand.vmem [shape: bf16[2,16,8,8], index: 0, kind: input, shape index: {}]   ;;  %s5701_s1 = inlined_call_operand.vmem [shape: bf16[6,8,8], index: 1, kind: input, shape index: {}]   ;;  %s5702_s2 = inlined_call_operand.vmem [shape: f32[1,8], index: 2, kind: input, shape index: {}]   ;;  %s5703_s3 = inlined_call_operand.vmem [shape: f32[1,8], index: 3, kind: input, shape index: {}]   ;;  %s5704_s4 = inlined_call_operand.vmem [shape: bf16[9,8,8], index: 4, kind: input, shape index: {}]   ;;  %s5705_s5 = inlined_call_operand.vmem [shape: f32[1,8], index: 5, kind: input, shape index: {}]   ;;  %s5706_s6 = inlined_call_operand.vmem [shape: f32[1,8], index: 6, kind: input, shape index: {}]   ;;  %s5707_s7 = inlined_call_operand.vmem [shape: bf16[8,8], index: 7, kind: input, shape index: {}]   ;;  %s5708_s8 = inlined_call_operand.vmem [shape: f32[1,8], index: 8, kind: input, shape index: {}]   ;;  %s5709_s9 = inlined_call_operand.vmem [shape: f32[1,8], index: 9, kind: input, shape index: {}]   ;;  %s5710_s10 = inlined_call_operand.hbm [shape: f32[2,8,8,8], index: 10, kind: output, shape index: {}]  }
   0x1   :  { %17 = vsyncpa [#allocation5 + $0x1], 0  ;;  %s4418_s13 = smov 0   ;;  %s4420_s14 = smov 0  }
   0x2   :  { %s4422_s15 = smov 0   ;;  %s4424_s16 = smov 0  }
   0x3 LB: > { %s4439_s17 = sadd.s32 4294967295, %s4357_s16   ;;  %s3770_s18 = sadd.s32 4294967294, %s4357_s16   ;;  %s4357_s16 = sphi %s4424_s16, %s5756_s16   ;;  %s4353_s15 = sphi %s4422_s15, %s5755_s15   ;;  %s4349_s14 = sphi %s4420_s14, %s5754_s14   ;;  %s4345_s13 = sphi %s4418_s13, %s5753_s13  }
   0x4   : > { %s4443_s19 = sadd.s32 1, %s4357_s16   ;;  %s245_s20 = sadd.s32 1, %s4353_s15 }
   0x5   : > { %s242_s21 = ssub.s32 %s4357_s16, %s4443_s19  ;;  %p255_p0 = scmp.ne.s32.totalorder %s4353_s15, %s4349_s14 }
   0x6   : > { %p243_p1 = scmp.eq.s32.totalorder %s242_s21, 0  ;;  %p256_p2 = scmp.eq.s32.totalorder %s4439_s17, 1 }
   0x7   : > { %p261_p3 = scmp.ne.s32.totalorder %s4349_s14, %s4345_s13  ;;  %p262_p4 = scmp.eq.s32.totalorder %s3770_s18, 1 }
   0x8   : > { %s4454_s22 = scalar_select %p243_p1, %s4353_s15, %s245_s20  }
   0x9   : > { %p4456_p5 = por %p256_p2, %p255_p0  ;;  %p4460_p6 = por %p262_p4, %p261_p3 }
   0xa   : > { %p3773_p7 = scmp.ge.s32.totalorder %s4357_s16, 1  ;;  %p315_p8 = scmp.lt.s32.totalorder %s4357_s16, 3 }
   0xc   : > { %p316_p9 = pnand %p3773_p7, %p315_p8 }
   0xe   : > { %319 = sbr.rel (%p316_p9) target bundleno = 696 (0x2b8), region = 60 }
  0x13   : > { %v3777_v0 = vld [vmem:[%s5701_s1 + $0xc] sm:$0xf]  ;;  %vm900_vm0 = vcmask 1043456   ;;  %p353_p10 = scmp.lt.s32.totalorder %s4439_s17, 1  ;;  %vm359_vm1 = vcmask 60416   ;;  %v4359_v3 = vmov 0  }
  0x14   : > { %4211 = vmatprep.subr.msk.bf16.mxu0 %vm900_vm0, %v3777_v0  ;;  %v902_v1 = vsel %vm900_vm0, %v3777_v0, 0  ;;  %v432_v2 = vld [vmem:[#allocation2 + $0x8c] sm:$0x1]  ;;  %360 = vst.msk [vmem:[#allocation2] sm:$0xf] %vm359_vm1, %v4359_v3  ;;  %vm361_vm2 = vcmask 57344  }
  0x15   : > { %4052 = vmatpush3.bf16.msra.mxu0 %v902_v1  ;;  %s4473_s27 = scalar_select %p353_p10, %s4439_s17, 1  ;;  %367 = vst.msk [vmem:[#allocation2 + $0x8] sm:$0xf] %vm359_vm1, %v4359_v3  ;;  %371 = vst.msk [vmem:[#allocation2 + $0x10] sm:$0xf] %vm359_vm1, %v4359_v3  ;;  %vm887_vm9 = vcmask 64512  }
  0x16   : > { %375 = vst.msk [vmem:[#allocation2 + $0x18] sm:$0xf] %vm359_vm1, %v4359_v3  ;;  %379 = vst.msk [vmem:[#allocation2 + $0x20] sm:$0xf] %vm359_vm1, %v4359_v3  ;;  %v864_v4 = vld [vmem:[%s5701_s1] sm:$0xf] }
  0x17   : > { %383 = vst.msk [vmem:[#allocation2 + $0x28] sm:$0xf] %vm359_vm1, %v4359_v3  ;;  %387 = vst.msk [vmem:[#allocation2 + $0x30] sm:$0xf] %vm359_vm1, %v4359_v3  ;;  %4212 = vmatprep.subr.msk.bf16.mxu1 %vm900_vm0, %v864_v4  ;;  %v994_v5 = vsel %vm900_vm0, %v864_v4, 0  ;;  %s3961_s30 = sshll.u32 %s4473_s27, 6 }
  0x18   : > { %391 = vst.msk [vmem:[#allocation2 + $0x38] sm:$0xf] %vm359_vm1, %v4359_v3  ;;  %395 = vst.msk [vmem:[#allocation2 + $0x40] sm:$0xf] %vm359_vm1, %v4359_v3  ;;  %vm362_vm3 = vsmask.f32 256  ;;  %4062 = vmatpush3.bf16.msra.mxu1 %v994_v5  ;;  %s4526_s18 = scalar_lea.vmem %s5700_s0, %s3961_s30 }
  0x19   : > { %399 = vst.msk [vmem:[#allocation2 + $0x48] sm:$0xf] %vm359_vm1, %v4359_v3  ;;  %403 = vst.msk [vmem:[#allocation2 + $0x50] sm:$0xf] %vm359_vm1, %v4359_v3  ;;  %v364_v6 = vld [vmem:[#allocation2 + $0x4] sm:$0x1] }
  0x1a   : > { %407 = vst.msk [vmem:[#allocation2 + $0x58] sm:$0xf] %vm359_vm1, %v4359_v3  ;;  %411 = vst.msk [vmem:[#allocation2 + $0x60] sm:$0xf] %vm359_vm1, %v4359_v3  ;;  %v368_v8 = vld [vmem:[#allocation2 + $0xc] sm:$0x1] }
  0x1b   : > { %415 = vst.msk [vmem:[#allocation2 + $0x68] sm:$0xf] %vm359_vm1, %v4359_v3  ;;  %419 = vst.msk [vmem:[#allocation2 + $0x70] sm:$0xf] %vm359_vm1, %v4359_v3  ;;  %vm554_vm5 = vsmask.f32 7938 }
  0x1c   : > { %423 = vst.msk [vmem:[#allocation2 + $0x78] sm:$0xf] %vm359_vm1, %v4359_v3  ;;  %427 = vst.msk [vmem:[#allocation2 + $0x80] sm:$0xf] %vm359_vm1, %v4359_v3  ;;  %v457_v12 = vld [vmem:[%s4526_s18 + $0x4] sm:$0xf] }
  0x1d   : > { %435 = vst.msk [vmem:[#allocation3] sm:$0xf] %vm359_vm1, %v4359_v3  ;;  %438 = vst.msk [vmem:[#allocation3 + $0x8] sm:$0xf] %vm359_vm1, %v4359_v3  ;;  %v459_v13 = vld [vmem:[%s4526_s18 + $0xc] sm:$0xf] }
  0x1e   : > { %440 = vst.msk [vmem:[#allocation3 + $0x10] sm:$0xf] %vm359_vm1, %v4359_v3  ;;  %442 = vst.msk [vmem:[#allocation3 + $0x18] sm:$0xf] %vm359_vm1, %v4359_v3  ;;  %v461_v14 = vld [vmem:[%s4526_s18 + $0x14] sm:$0xf] }
  0x1f   : > { %444 = vst.msk [vmem:[#allocation3 + $0x20] sm:$0xf] %vm359_vm1, %v4359_v3  ;;  %446 = vst.msk [vmem:[#allocation3 + $0x28] sm:$0xf] %vm359_vm1, %v4359_v3  ;;  %v605_v15 = vshrl.u32 %v457_v12, 16  ;;  %v608_v16 = vshll.u32 %v457_v12, 16 }
  0x20   : > { %448 = vst.msk [vmem:[#allocation3 + $0x30] sm:$0xf] %vm359_vm1, %v4359_v3  ;;  %450 = vst.msk [vmem:[#allocation3 + $0x38] sm:$0xf] %vm359_vm1, %v4359_v3  ;;  %v613_v17 = vshrl.u32 %v459_v13, 16  ;;  %v616_v18 = vshll.u32 %v459_v13, 16 }
  0x21   : > { %452 = vst.msk [vmem:[#allocation3 + $0x40] sm:$0xf] %vm359_vm1, %v4359_v3  ;;  %454 = vst.msk [vmem:[#allocation3 + $0x48] sm:$0xf] %vm359_vm1, %v4359_v3  ;;  %v3795_v19 = vld [vmem:[%s5701_s1 + $0x10] sm:$0xf] }
  0x22   : > { %437 = vst.msk [vmem:[#allocation3 + $0x4] sm:$0x1] %vm361_vm2, %v4359_v3  ;;  %439 = vst.msk [vmem:[#allocation3 + $0xc] sm:$0x1] %vm361_vm2, %v4359_v3  ;;  %v621_v20 = vshrl.u32 %v461_v14, 16  ;;  %v624_v21 = vshll.u32 %v461_v14, 16  ;;  %4213 = vmatprep.subr.msk.bf16.mxu0 %vm900_vm0, %v3795_v19 }
  0x23   : > { %441 = vst.msk [vmem:[#allocation3 + $0x14] sm:$0x1] %vm361_vm2, %v4359_v3  ;;  %443 = vst.msk [vmem:[#allocation3 + $0x1c] sm:$0x1] %vm361_vm2, %v4359_v3  ;;  %v3794_v22 = vld [vmem:[%s5701_s1 + $0x4] sm:$0xf] }
  0x24   : > { %445 = vst.msk [vmem:[#allocation3 + $0x24] sm:$0x1] %vm361_vm2, %v4359_v3  ;;  %447 = vst.msk [vmem:[#allocation3 + $0x2c] sm:$0x1] %vm361_vm2, %v4359_v3  ;;  %v372_v23 = vld [vmem:[#allocation2 + $0x14] sm:$0x1]  ;;  %4214 = vmatprep.subr.msk.bf16.mxu1 %vm900_vm0, %v3794_v22 }
  0x25   : > { %449 = vst.msk [vmem:[#allocation3 + $0x34] sm:$0x1] %vm361_vm2, %v4359_v3  ;;  %451 = vst.msk [vmem:[#allocation3 + $0x3c] sm:$0x1] %vm361_vm2, %v4359_v3  ;;  %v607_v24 = vrot.slane %v605_v15, 7  ;;  %v615_v27 = vrot.slane %v613_v17, 7 }
  0x26   : > { %453 = vst.msk [vmem:[#allocation3 + $0x44] sm:$0x1] %vm361_vm2, %v4359_v3  ;;  %455 = vst.msk [vmem:[#allocation3 + $0x4c] sm:$0x1] %vm361_vm2, %v4359_v3  ;;  %v685_v25 = vld [vmem:[#allocation2 + $0x8] sm:$0xf] }
  0x27   : > { %vm4519_vm4 = vmand %vm361_vm2, %vm362_vm3  ;;  %v4544_v26 = vld [vmem:[#allocation2] sm:$0xf]  ;;  %v4555_v31 = vrot.slane %v621_v20, 7  ;;  %v691_v32 = vld [vmem:[#allocation2 + $0x10] sm:$0xf]  ;;  %v610_v34 = vor.u32 %v608_v16, %v607_v24  ;;  %v611_v35 = vrot.slane %v607_v24, 4  ;;  %v618_v36 = vor.u32 %v616_v18, %v615_v27 }
  0x28   : > { %v365_v9 = vsel %vm4519_vm4, 0, %v364_v6  ;;  %v369_v10 = vsel %vm4519_vm4, 0, %v368_v8  ;;  %v433_v11 = vsel %vm4519_vm4, 0, %v432_v2  ;;  %vm4549_vm6 = vmand %vm359_vm1, %vm554_vm5  ;;  %v753_v29 = vshrl.u32 %v4544_v26, 16  ;;  %v697_v37 = vld [vmem:[#allocation2 + $0x18] sm:$0xf] }
  0x29   : > { %366 = vst [vmem:[#allocation2 + $0x4] sm:$0x1] %v365_v9  ;;  %370 = vst [vmem:[#allocation2 + $0xc] sm:$0x1] %v369_v10  ;;  %v756_v30 = vshll.u32 %v4544_v26, 16  ;;  %v373_v33 = vsel %vm4519_vm4, 0, %v372_v23  ;;  %v626_v41 = vor.u32 %v624_v21, %v4555_v31  ;;  %v686_v43 = vsel %vm4549_vm6, %v610_v34, %v685_v25 }
  0x2a   : > { %434 = vst [vmem:[#allocation2 + $0x8c] sm:$0x1] %v433_v11  ;;  %374 = vst [vmem:[#allocation2 + $0x14] sm:$0x1] %v373_v33  ;;  %v376_v38 = vld [vmem:[#allocation2 + $0x1c] sm:$0x1]  ;;  %v692_v45 = vsel %vm4549_vm6, %v618_v36, %v691_v32 }
  0x2b   : > { %v755_v39 = vrot.slane %v753_v29, 4  ;;  %v758_v40 = vrot.slane %v756_v30, 5  ;;  %vm749_vm7 = vsmask.f32 3328  ;;  %vm750_vm8 = vsmask.f32 7440 }
  0x2c   : > { %v463_v42 = vld [vmem:[%s4526_s18 + $0x1c] sm:$0xf]  ;;  %v619_v44 = vrot.slane %v615_v27, 4  ;;  %v377_v48 = vsel %vm4519_vm4, 0, %v376_v38  ;;  %687 = vst [vmem:[#allocation2 + $0x8] sm:$0xf] %v686_v43  ;;  %v698_v49 = vsel %vm4549_vm6, %v626_v41, %v697_v37  ;;  %vm4605_vm10 = vmor %vm749_vm7, %vm750_vm8 }
  0x2d   : > { %693 = vst [vmem:[#allocation2 + $0x10] sm:$0xf] %v692_v45  ;;  %v759_v51 = vor.u32 %v758_v40, %v755_v39  ;;  %378 = vst [vmem:[#allocation2 + $0x1c] sm:$0x1] %v377_v48  ;;  %v465_v53 = vld [vmem:[%s4526_s18 + $0x24] sm:$0xf] }
  0x2e   : > { %v627_v54 = vrot.slane %v4555_v31, 4  ;;  %699 = vst [vmem:[#allocation2 + $0x18] sm:$0xf] %v698_v49  ;;  %v629_v55 = vshrl.u32 %v463_v42, 16  ;;  %v632_v56 = vshll.u32 %v463_v42, 16  ;;  %v637_v57 = vshrl.u32 %v465_v53, 16 }
  0x2f   : > { %v1226_v58 = vsel %vm900_vm0, %v3795_v19, 0  ;;  %v640_v59 = vshll.u32 %v465_v53, 16  ;;  %v703_v60 = vld [vmem:[#allocation2 + $0x20] sm:$0xf]  ;;  %v709_v61 = vld [vmem:[#allocation2 + $0x28] sm:$0xf] }
  0x30   : > { %v688_v46 = vld [vmem:[#allocation2 + $0xc] sm:$0x1]  ;;  %v734_v47 = vld [vmem:[#allocation2 + $0x4] sm:$0x1]  ;;  %v4576_v63 = vsel %vm900_vm0, %v3794_v22, 0  ;;  %v4578_v0 = vrot.slane %v629_v55, 7 }
  0x31   : > { %v689_v50 = vsel %vm4519_vm4, %v611_v35, %v688_v46  ;;  %v762_v52 = vshll.u32 %v734_v47, 16  ;;  %v467_v62 = vld [vmem:[%s4526_s18 + $0x2c] sm:$0xf]  ;;  %v4580_v1 = vrot.slane %v637_v57, 7  ;;  %v469_v2 = vld [vmem:[%s4526_s18 + $0x34] sm:$0xf] }
  0x32   : > { %690 = vst [vmem:[#allocation2 + $0xc] sm:$0x1] %v689_v50  ;;  %v645_v3 = vshrl.u32 %v467_v62, 16  ;;  %v4583_v4 = vrot.slane %v759_v51, 4  ;;  %v694_v6 = vld [vmem:[#allocation2 + $0x14] sm:$0x1]  ;;  %v634_v11 = vor.u32 %v632_v56, %v4578_v0 }
  0x33   : > { %v4585_v5 = vrot.slane %v762_v52, 5  ;;  %v648_v8 = vshll.u32 %v467_v62, 16  ;;  %v653_v9 = vshrl.u32 %v469_v2, 16  ;;  %v695_v10 = vsel %vm4519_vm4, %v619_v44, %v694_v6  ;;  %v380_v14 = vld [vmem:[#allocation2 + $0x24] sm:$0x1]  ;;  %s350_s12 = sand.u32 1, %s4349_s14  }
  0x34   : > { %v642_v12 = vor.u32 %v640_v59, %v4580_v1  ;;  %v656_v13 = vshll.u32 %v469_v2, 16  ;;  %696 = vst [vmem:[#allocation2 + $0x14] sm:$0x1] %v695_v10  ;;  %v635_v15 = vrot.slane %v4578_v0, 4  ;;  %v4592_v16 = vrot.slane %v645_v3, 7  ;;  %s3774_s21 = sshll.u32 %s350_s12, 6 }
  0x35   : > { %v4594_v17 = vrot.slane %v653_v9, 7  ;;  %v381_v18 = vsel %vm4519_vm4, 0, %v380_v14  ;;  %v735_v19 = vld [vmem:[#allocation2 + $0x8] sm:$0xf]  ;;  %v737_v20 = vld [vmem:[#allocation2 + $0x10] sm:$0xf]  ;;  %v704_v22 = vsel %vm4549_vm6, %v634_v11, %v703_v60  ;;  %v765_v46 = vsel %vm4605_vm10, %v4583_v4, %v4585_v5 }
  0x36   : > { %v700_v21 = vld [vmem:[#allocation2 + $0x1c] sm:$0x1]  ;;  %v710_v23 = vsel %vm4549_vm6, %v642_v12, %v709_v61  ;;  %382 = vst [vmem:[#allocation2 + $0x24] sm:$0x1] %v381_v18  ;;  %v767_v24 = vshrl.u32 %v735_v19, 16  ;;  %v770_v25 = vshll.u32 %v735_v19, 16  ;;  %v3778_v27 = vcombine.low %v4544_v26, %v735_v19 }
  0x37   : > { %v739_v29 = vld [vmem:[#allocation2 + $0x18] sm:$0xf]  ;;  %v781_v30 = vshrl.u32 %v737_v20, 16  ;;  %705 = vst [vmem:[#allocation2 + $0x20] sm:$0xf] %v704_v22  ;;  %v784_v31 = vshll.u32 %v737_v20, 16  ;;  %v701_v44 = vsel %vm4519_vm4, %v627_v54, %v700_v21  ;;  %v650_v49 = vor.u32 %v648_v8, %v4592_v16 }
  0x38   : > { %711 = vst [vmem:[#allocation2 + $0x28] sm:$0xf] %v710_v23  ;;  %v795_v32 = vshrl.u32 %v739_v29, 16  ;;  %v798_v33 = vshll.u32 %v739_v29, 16  ;;  %v3779_v34 = vcombine.low %v737_v20, %v739_v29  ;;  %v769_v37 = vrot.slane %v767_v24, 4  ;;  %4053 = vmatprep.mubr.msk.bf16.mxu0 %vm887_vm9, %v3778_v27  ;;  %s5616_s25 = scalar_lea.vmem [#allocation4], %s3774_s21 }
  0x39   : > { %v736_v35 = vld [vmem:[#allocation2 + $0xc] sm:$0x1]  ;;  %v772_v38 = vrot.slane %v770_v25, 5  ;;  %v783_v26 = vrot.slane %v781_v30, 4  ;;  %v715_v40 = vld [vmem:[#allocation2 + $0x30] sm:$0xf]  ;;  %v658_v54 = vor.u32 %v656_v13, %v4594_v17 }
  0x3a   : > { %v776_v39 = vshll.u32 %v736_v35, 16  ;;  %v786_v41 = vrot.slane %v784_v31, 5  ;;  %v797_v42 = vrot.slane %v795_v32, 4  ;;  %v800_v43 = vrot.slane %v798_v33, 5  ;;  %4054 = vmatmul.mubr.msk.bf16.vlgmr.msra.gmra.mxu0 %vm887_vm9, %v3779_v34  ;;  %v384_v45 = vld [vmem:[#allocation2 + $0x2c] sm:$0x1] }
  0x3b   : > { %v773_v47 = vor.u32 %v772_v38, %v769_v37  ;;  %702 = vst [vmem:[#allocation2 + $0x1c] sm:$0x1] %v701_v44  ;;  %4072 = vmatpush3.bf16.msra.mxu0 %v1226_v58  ;;  %v721_v50 = vld [vmem:[#allocation2 + $0x38] sm:$0xf]  ;;  %v738_v51 = vld [vmem:[#allocation2 + $0x14] sm:$0x1]  ;;  %v716_v60 = vsel %vm4549_vm6, %v650_v49, %v715_v40 }
  0x3c   : > { %v778_v48 = vrot.slane %v776_v39, 5  ;;  %v787_v52 = vor.u32 %v786_v41, %v783_v26  ;;  %v643_v53 = vrot.slane %v4580_v1, 4  ;;  %v651_v55 = vrot.slane %v4592_v16, 4  ;;  %v388_v56 = vld [vmem:[#allocation2 + $0x34] sm:$0x1]  ;;  %s3970_s26 = sshll.u32 %s4439_s17, 10 }
  0x3d   : > { %v774_v57 = vrot.slane %v773_v47, 4  ;;  %v790_v59 = vshll.u32 %v738_v51, 16  ;;  %v385_v58 = vsel %vm4519_vm4, 0, %v384_v45  ;;  %v706_v61 = vld [vmem:[#allocation2 + $0x24] sm:$0x1]  ;;  %v801_v0 = vor.u32 %v800_v43, %v797_v42  ;;  %s3708_s27 = sshll.u32 %s5616_s25, 4  ;;  %s5650_s30 = scalar_lea.hbm %s5710_s10, %s3970_s26  ;;  %s5652_s27 = int_to_ptr.vmem [resolvable:$true] %s3708_s27 }
  0x3e   : > { %v392_v62 = vld [vmem:[#allocation2 + $0x3c] sm:$0x1]  ;;  %v741_v2 = vld [vmem:[#allocation2 + $0x20] sm:$0xf]  ;;  %v659_v1 = vrot.slane %v4594_v17, 4  ;;  %v722_v4 = vsel %vm4549_vm6, %v658_v54, %v721_v50  ;;  %v707_v5 = vsel %vm4519_vm4, %v635_v15, %v706_v61  ;;  %v788_v8 = vrot.slane %v787_v52, 4 }
  0x3f   : > { %v743_v3 = vld [vmem:[#allocation2 + $0x28] sm:$0xf]  ;;  %717 = vst [vmem:[#allocation2 + $0x30] sm:$0xf] %v716_v60  ;;  %386 = vst [vmem:[#allocation2 + $0x2c] sm:$0x1] %v385_v58  ;;  %v779_v6 = vsel %vm4605_vm10, %v774_v57, %v778_v48 }
  0x40   : > { %v809_v9 = vshrl.u32 %v741_v2, 16  ;;  %v812_v10 = vshll.u32 %v741_v2, 16  ;;  %723 = vst [vmem:[#allocation2 + $0x38] sm:$0xf] %v722_v4  ;;  %708 = vst [vmem:[#allocation2 + $0x24] sm:$0x1] %v707_v5  ;;  %v3786_v12 = vcombine.low %v765_v46, %v779_v6  ;;  %v3780_v18 = vcombine.low %v741_v2, %v743_v3 }
  0x41   : > { %v456_v11 = vld [vmem:[%s4526_s18] sm:$0xf]  ;;  %v823_v13 = vshrl.u32 %v743_v3, 16  ;;  %v826_v14 = vshll.u32 %v743_v3, 16  ;;  %v4634_v19 = vld [vmem:[%s4526_s18 + $0x8] sm:$0xf] }
  0x42   : > { %v792_v20 = vrot.slane %v790_v59, 5  ;;  %v811_v21 = vrot.slane %v809_v9, 4  ;;  %v814_v22 = vrot.slane %v812_v10, 5  ;;  %v389_v15 = vsel %vm4519_vm4, 0, %v388_v56  ;;  %v4639_v23 = vld [vmem:[%s4526_s18 + $0x10] sm:$0xf]  ;;  %4063 = vmatprep.mubr.msk.bf16.mxu1 %vm887_vm9, %v3786_v12  ;;  %4057 = vmatprep.mubr.msk.bf16.mxu0 %vm887_vm9, %v3780_v18 }
  0x43   : > { %v740_v24 = vld [vmem:[#allocation2 + $0x1c] sm:$0x1]  ;;  %v825_v25 = vrot.slane %v823_v13, 4  ;;  %v828_v27 = vrot.slane %v826_v14, 5  ;;  %390 = vst [vmem:[#allocation2 + $0x34] sm:$0x1] %v389_v15 }
  0x44   : > { %v393_v29 = vsel %vm4519_vm4, 0, %v392_v62  ;;  %v473_v30 = vshrl.u32 %v456_v11, 16  ;;  %v802_v31 = vrot.slane %v801_v0, 4  ;;  %v804_v32 = vshll.u32 %v740_v24, 16  ;;  %v556_v57 = vld [vmem:[#allocation2 + $0x48] sm:$0xf] }
  0x45   : > { %v815_v33 = vor.u32 %v814_v22, %v811_v21  ;;  %394 = vst [vmem:[#allocation2 + $0x3c] sm:$0x1] %v393_v29  ;;  %v476_v34 = vshll.u32 %v456_v11, 16  ;;  %v481_v37 = vshrl.u32 %v4634_v19, 16  ;;  %v484_v38 = vshll.u32 %v4634_v19, 16  ;;  %s5660_s17 = scalar_lea.sflag [#allocation5], %s350_s12 }
  0x46   : > { %v4645_v35 = vrot.slane %v473_v30, 7  ;;  %v489_v26 = vshrl.u32 %v4639_v23, 16  ;;  %v793_v39 = vsel %vm4605_vm10, %v788_v8, %v792_v20  ;;  %v806_v40 = vrot.slane %v804_v32, 5  ;;  %v745_v41 = vld [vmem:[#allocation2 + $0x30] sm:$0xf]  ;;  %s4297_s11 = scalar_lea.vmem %s5652_s27, 1024 }
  0x47   : > { %v712_v42 = vld [vmem:[#allocation2 + $0x2c] sm:$0x1]  ;;  %v4652_v43 = vrot.slane %v815_v33, 4  ;;  %v829_v44 = vor.u32 %v828_v27, %v825_v25  ;;  %v747_v45 = vld [vmem:[#allocation2 + $0x38] sm:$0xf]  ;;  %v837_v46 = vshrl.u32 %v745_v41, 16  ;;  %p4298_p11 = scmp.ne.s32.totalorder %s5652_s27, %s4297_s11 }
  0x48   : > { %v840_v47 = vshll.u32 %v745_v41, 16  ;;  %v713_v48 = vsel %vm4519_vm4, %v643_v53, %v712_v42  ;;  %v742_v49 = vld [vmem:[#allocation2 + $0x24] sm:$0x1]  ;;  %v478_v50 = vor.u32 %v476_v34, %v4645_v35  ;;  %v807_v51 = vsel %vm4605_vm10, %v802_v31, %v806_v40  ;;  %v3813_v59 = vld [vmem:[%s5701_s1 + $0x14] sm:$0xf] }
  0x49   : > { %v851_v52 = vshrl.u32 %v747_v45, 16  ;;  %v854_v54 = vshll.u32 %v747_v45, 16  ;;  %v3781_v56 = vcombine.low %v745_v41, %v747_v45  ;;  %714 = vst [vmem:[#allocation2 + $0x2c] sm:$0x1] %v713_v48  ;;  %v3787_v60 = vcombine.low %v793_v39, %v807_v51  ;;  %4215 = vmatprep.subr.msk.bf16.mxu0 %vm900_vm0, %v3813_v59  ;;  %v3812_v53 = vld [vmem:[%s5701_s1 + $0x8] sm:$0xf]  ;;  %p4299_p12 = pnand %p4298_p11, %p4456_p5 }
  0x4a   : > { %v839_v58 = vrot.slane %v837_v46, 4  ;;  %v842_v61 = vrot.slane %v840_v47, 5  ;;  %v818_v62 = vshll.u32 %v742_v49, 16  ;;  %v4667_v3 = vrot.slane %v829_v44, 4  ;;  %v718_v4 = vld [vmem:[#allocation2 + $0x34] sm:$0x1] }
  0x4b   : > { %v853_v0 = vrot.slane %v851_v52, 4  ;;  %v856_v2 = vrot.slane %v854_v54, 5  ;;  %4058 = vmatmul.mubr.msk.bf16.gmra.mxu0 %vm887_vm9, %v3781_v56  ;;  %v479_v5 = vrot.slane %v4645_v35, 4  ;;  %v562_v6 = vld [vmem:[#allocation2 + $0x50] sm:$0xf]  ;;  %4064 = vmatmul.mubr.msk.bf16.vlgmr.msra.gmra.mxu1 %vm887_vm9, %v3787_v60  ;;  %v719_v9 = vsel %vm4519_vm4, %v651_v55, %v718_v4  ;;  %p4300_p13 = pneg %p4299_p12 }
  0x4c   : > { %v4671_v8 = vrot.slane %v818_v62, 5  ;;  %v724_v10 = vld [vmem:[#allocation2 + $0x3c] sm:$0x1]  ;;  %v843_v11 = vor.u32 %v842_v61, %v839_v58  ;;  %v4677_v12 = vrot.slane %v481_v37, 7  ;;  %v462_v13 = vld [vmem:[%s4526_s18 + $0x18] sm:$0xf]  ;;  %4082 = vmatpush3.bf16.msra.mxu1 %v4576_v63  ;;  %v557_v16 = vsel %vm4549_vm6, %v478_v50, %v556_v57 }
  0x4d   : > { %720 = vst [vmem:[#allocation2 + $0x34] sm:$0x1] %v719_v9  ;;  %v725_v14 = vsel %vm4519_vm4, %v659_v1, %v724_v10  ;;  %v857_v18 = vor.u32 %v856_v2, %v853_v0  ;;  %v4687_v19 = vrot.slane %v489_v26, 7  ;;  %v400_v55 = vld [vmem:[#allocation2 + $0x4c] sm:$0x1]  ;;  %4216 = vmatprep.subr.msk.bf16.mxu1 %vm900_vm0, %v3812_v53  ;;  %v492_v27 = vshll.u32 %v4639_v23, 16 }
  0x4e   : > { %v404_v20 = vld [vmem:[#allocation2 + $0x54] sm:$0x1]  ;;  %v821_v63 = vsel %vm4605_vm10, %v4652_v43, %v4671_v8  ;;  %726 = vst [vmem:[#allocation2 + $0x3c] sm:$0x1] %v725_v14  ;;  %v4693_v21 = vrot.slane %v843_v11, 4  ;;  %v486_v17 = vor.u32 %v484_v38, %v4677_v12  ;;  %v487_v1 = vrot.slane %v4677_v12, 4 }
  0x4f   : > { %558 = vst [vmem:[#allocation2 + $0x48] sm:$0xf] %v557_v16  ;;  %v568_v22 = vld [vmem:[#allocation2 + $0x58] sm:$0xf]  ;;  %v408_v15 = vld [vmem:[#allocation2 + $0x5c] sm:$0x1]  ;;  %v494_v23 = vor.u32 %v492_v27, %v4687_v19 }
  0x50   : > { %v412_v24 = vld [vmem:[#allocation2 + $0x64] sm:$0x1]  ;;  %v4698_v25 = vrot.slane %v857_v18, 4  ;;  %v495_v29 = vrot.slane %v4687_v19, 4  ;;  %v497_v30 = vshrl.u32 %v462_v13, 16  ;;  %v563_v33 = vsel %vm4549_vm6, %v486_v17, %v562_v6 }
  0x51   : > { %v464_v31 = vld [vmem:[%s4526_s18 + $0x20] sm:$0xf]  ;;  %v744_v32 = vld [vmem:[#allocation2 + $0x2c] sm:$0x1]  ;;  %v500_v34 = vshll.u32 %v462_v13, 16  ;;  %v401_v38 = vsel %vm4519_vm4, 0, %v400_v55  ;;  %v569_v51 = vsel %vm4549_vm6, %v494_v23, %v568_v22 }
  0x52   : > { %v574_v37 = vld [vmem:[#allocation2 + $0x60] sm:$0xf]  ;;  %v405_v26 = vsel %vm4519_vm4, 0, %v404_v20  ;;  %v832_v39 = vshll.u32 %v744_v32, 16  ;;  %564 = vst [vmem:[#allocation2 + $0x50] sm:$0xf] %v563_v33 }
  0x53   : > { %v4710_v40 = vrot.slane %v497_v30, 7  ;;  %402 = vst [vmem:[#allocation2 + $0x4c] sm:$0x1] %v401_v38  ;;  %406 = vst [vmem:[#allocation2 + $0x54] sm:$0x1] %v405_v26  ;;  %v409_v41 = vsel %vm4519_vm4, 0, %v408_v15 }
  0x54   : > { %v4715_v42 = vld [vmem:[%s4526_s18 + $0x28] sm:$0xf]  ;;  %410 = vst [vmem:[#allocation2 + $0x5c] sm:$0x1] %v409_v41  ;;  %v413_v43 = vsel %vm4519_vm4, 0, %v412_v24  ;;  %v4720_v44 = vsel %vm900_vm0, %v3813_v59, 0 }
  0x55   : > { %v4723_v45 = vsel %vm900_vm0, %v3812_v53, 0  ;;  %v505_v46 = vshrl.u32 %v464_v31, 16  ;;  %v4726_v47 = vld [vmem:[%s4526_s18 + $0x30] sm:$0xf]  ;;  %v834_v48 = vrot.slane %v832_v39, 5  ;;  %v502_v49 = vor.u32 %v500_v34, %v4710_v40 }
  0x56   : > { %v503_v50 = vrot.slane %v4710_v40, 4  ;;  %414 = vst [vmem:[#allocation2 + $0x64] sm:$0x1] %v413_v43  ;;  %v746_v52 = vld [vmem:[#allocation2 + $0x34] sm:$0x1]  ;;  %v508_v56 = vshll.u32 %v464_v31, 16 }
  0x57   : > { %570 = vst [vmem:[#allocation2 + $0x58] sm:$0xf] %v569_v51  ;;  %v4732_v54 = vrot.slane %v505_v46, 7  ;;  %v513_v57 = vshrl.u32 %v4715_v42, 16  ;;  %v516_v59 = vshll.u32 %v4715_v42, 16  ;;  %v835_v60 = vsel %vm4605_vm10, %v4667_v3, %v834_v48 }
  0x58   : > { %v748_v58 = vld [vmem:[#allocation2 + $0x3c] sm:$0x1]  ;;  %v846_v61 = vshll.u32 %v746_v52, 16  ;;  %v1061_v62 = vld [vmem:[#allocation2 + $0x48] sm:$0xf]  ;;  %v575_v53 = vsel %vm4549_vm6, %v502_v49, %v574_v37  ;;  %v521_v0 = vshrl.u32 %v4726_v47, 16  ;;  %v3788_v2 = vcombine.low %v821_v63, %v835_v60 }
  0x59   : > { %v860_v4 = vshll.u32 %v748_v58, 16  ;;  %v1078_v6 = vshrl.u32 %v1061_v62, 16  ;;  %v1081_v8 = vshll.u32 %v1061_v62, 16  ;;  %576 = vst [vmem:[#allocation2 + $0x60] sm:$0xf] %v575_v53  ;;  %v510_v10 = vor.u32 %v508_v56, %v4732_v54 }
  0x5a   : > { %v848_v9 = vrot.slane %v846_v61, 5  ;;  %v511_v11 = vrot.slane %v4732_v54, 4  ;;  %v4744_v13 = vrot.slane %v513_v57, 7  ;;  %4067 = vmatprep.mubr.msk.bf16.mxu1 %vm887_vm9, %v3788_v2  ;;  %v1063_v14 = vld [vmem:[#allocation2 + $0x50] sm:$0xf]  ;;  %v4747_v55 = vrot.slane %v521_v0, 7 }
  0x5b   : > { %v862_v3 = vrot.slane %v860_v4, 5  ;;  %v1080_v18 = vrot.slane %v1078_v6, 4  ;;  %v1083_v16 = vrot.slane %v1081_v8, 5  ;;  %v1092_v63 = vshrl.u32 %v1063_v14, 16  ;;  %v559_v15 = vld [vmem:[#allocation2 + $0x4c] sm:$0x1] }
  0x5c   : > { %v849_v20 = vsel %vm4605_vm10, %v4693_v21, %v848_v9  ;;  %v1095_v17 = vshll.u32 %v1063_v14, 16  ;;  %v3796_v22 = vcombine.low %v1061_v62, %v1063_v14  ;;  %v565_v24 = vld [vmem:[#allocation2 + $0x54] sm:$0x1]  ;;  %v560_v30 = vsel %vm4519_vm4, %v479_v5, %v559_v15  ;;  %v571_v32 = vld [vmem:[#allocation2 + $0x5c] sm:$0x1] }
  0x5d   : > { %v863_v27 = vsel %vm4605_vm10, %v4698_v25, %v862_v3  ;;  %v566_v31 = vsel %vm4519_vm4, %v487_v1, %v565_v24  ;;  %v1084_v21 = vor.u32 %v1083_v16, %v1080_v18  ;;  %v577_v33 = vld [vmem:[#allocation2 + $0x64] sm:$0x1]  ;;  %v580_v34 = vld [vmem:[#allocation2 + $0x68] sm:$0xf]  ;;  %v1094_v38 = vrot.slane %v1092_v63, 4 }
  0x5e   : > { %v3789_v37 = vcombine.low %v849_v20, %v863_v27  ;;  %v1097_v26 = vrot.slane %v1095_v17, 5  ;;  %4073 = vmatprep.mubr.msk.bf16.mxu0 %vm887_vm9, %v3796_v22  ;;  %v1065_v25 = vld [vmem:[#allocation2 + $0x58] sm:$0xf]  ;;  %561 = vst [vmem:[#allocation2 + $0x4c] sm:$0x1] %v560_v30  ;;  %v572_v35 = vsel %vm4519_vm4, %v495_v29, %v571_v32  ;;  %v578_v23 = vsel %vm4519_vm4, %v503_v50, %v577_v33 }
  0x5f   : > { %567 = vst [vmem:[#allocation2 + $0x54] sm:$0x1] %v566_v31  ;;  %v586_v5 = vld [vmem:[#allocation2 + $0x70] sm:$0xf]  ;;  %v1106_v12 = vshrl.u32 %v1065_v25, 16  ;;  %v1109_v1 = vshll.u32 %v1065_v25, 16  ;;  %v518_v19 = vor.u32 %v516_v59, %v4744_v13  ;;  %v581_v29 = vsel %vm4549_vm6, %v510_v10, %v580_v34 }
  0x60   : > { %v4768_v39 = vrot.slane %v1084_v21, 4  ;;  %573 = vst [vmem:[#allocation2 + $0x5c] sm:$0x1] %v572_v35  ;;  %v470_v40 = vld [vmem:[%s4526_s18 + $0x38] sm:$0xf]  ;;  %4068 = vmatmul.mubr.msk.bf16.gmra.mxu1 %vm887_vm9, %v3789_v37  ;;  %v1098_v42 = vor.u32 %v1097_v26, %v1094_v38  ;;  %v519_v43 = vrot.slane %v4744_v13, 4 }
  0x61   : > { %v1067_v41 = vld [vmem:[#allocation2 + $0x60] sm:$0xf]  ;;  %579 = vst [vmem:[#allocation2 + $0x64] sm:$0x1] %v578_v23  ;;  %v416_v46 = vld [vmem:[#allocation2 + $0x6c] sm:$0x1]  ;;  %v587_v58 = vsel %vm4549_vm6, %v518_v19, %v586_v5 }
  0x62   : > { %v1108_v48 = vrot.slane %v1106_v12, 4  ;;  %v1111_v49 = vrot.slane %v1109_v1, 5  ;;  %v1120_v51 = vshrl.u32 %v1067_v41, 16  ;;  %v1123_v52 = vshll.u32 %v1067_v41, 16  ;;  %582 = vst [vmem:[#allocation2 + $0x68] sm:$0xf] %v581_v29 }
  0x63   : > { %v592_v50 = vld [vmem:[#allocation2 + $0x78] sm:$0xf]  ;;  %v420_v56 = vld [vmem:[#allocation2 + $0x74] sm:$0x1]  ;;  %v3797_v57 = vcombine.low %v1065_v25, %v1067_v41  ;;  %v1099_v60 = vrot.slane %v1098_v42, 4  ;;  %v524_v59 = vshll.u32 %v4726_v47, 16 }
  0x64   : > { %v424_v61 = vld [vmem:[#allocation2 + $0x7c] sm:$0x1]  ;;  %v428_v62 = vld [vmem:[#allocation2 + $0x84] sm:$0x1]  ;;  %v1122_v53 = vrot.slane %v1120_v51, 4  ;;  %v1125_v0 = vrot.slane %v1123_v52, 5  ;;  %v1112_v2 = vor.u32 %v1111_v49, %v1108_v48 }
  0x65   : > { %588 = vst [vmem:[#allocation2 + $0x70] sm:$0xf] %v587_v58  ;;  %v527_v4 = vrot.slane %v4747_v55, 4  ;;  %v4782_v6 = vld [vmem:[#allocation2 + $0x8] sm:$0xf]  ;;  %4074 = vmatmul.mubr.msk.bf16.vlgmr.msra.gmra.mxu0 %vm887_vm9, %v3797_v57  ;;  %v526_v8 = vor.u32 %v524_v59, %v4747_v55  ;;  %v529_v9 = vshrl.u32 %v470_v40, 16 }
  0x66   : > { %v532_v10 = vshll.u32 %v470_v40, 16  ;;  %v417_v3 = vsel %vm4519_vm4, 0, %v416_v46  ;;  %v4788_v47 = vld [vmem:[#allocation2 + $0x10] sm:$0xf]  ;;  %v1062_v14 = vld [vmem:[#allocation2 + $0x4c] sm:$0x1]  ;;  %v1126_v20 = vor.u32 %v1125_v0, %v1122_v53  ;;  %4092 = vmatpush3.bf16.msra.mxu0 %v4720_v44 }
  0x67   : > { %v1064_v18 = vld [vmem:[#allocation2 + $0x54] sm:$0x1]  ;;  %v1113_v16 = vrot.slane %v1112_v2, 4  ;;  %v598_v63 = vld [vmem:[#allocation2 + $0x80] sm:$0xf]  ;;  %v421_v17 = vsel %vm4519_vm4, 0, %v420_v56  ;;  %v3814_v22 = vcombine.low %v4782_v6, %v4788_v47  ;;  %v593_v31 = vsel %vm4549_vm6, %v526_v8, %v592_v50 }
  0x68   : > { %418 = vst [vmem:[#allocation2 + $0x6c] sm:$0x1] %v417_v3  ;;  %v1087_v15 = vshll.u32 %v1062_v14, 16  ;;  %v1101_v24 = vshll.u32 %v1064_v18, 16  ;;  %v1066_v27 = vld [vmem:[#allocation2 + $0x5c] sm:$0x1] }
  0x69   : > { %v4795_v30 = vrot.slane %v529_v9, 7  ;;  %422 = vst [vmem:[#allocation2 + $0x74] sm:$0x1] %v421_v17  ;;  %v1068_v21 = vld [vmem:[#allocation2 + $0x64] sm:$0x1]  ;;  %v1115_v32 = vshll.u32 %v1066_v27, 16 }
  0x6a   : > { %v1127_v44 = vrot.slane %v1126_v20, 4  ;;  %594 = vst [vmem:[#allocation2 + $0x78] sm:$0xf] %v593_v31  ;;  %v425_v33 = vsel %vm4519_vm4, 0, %v424_v61  ;;  %v429_v34 = vsel %vm4519_vm4, 0, %v428_v62  ;;  %v1089_v37 = vrot.slane %v1087_v15, 5 }
  0x6b   : > { %v1103_v38 = vrot.slane %v1101_v24, 5  ;;  %v1129_v26 = vshll.u32 %v1068_v21, 16  ;;  %v1069_v25 = vld [vmem:[#allocation2 + $0x68] sm:$0xf]  ;;  %v534_v35 = vor.u32 %v532_v10, %v4795_v30  ;;  %426 = vst [vmem:[#allocation2 + $0x7c] sm:$0x1] %v425_v33 }
  0x6c   : > { %430 = vst [vmem:[#allocation2 + $0x84] sm:$0x1] %v429_v34  ;;  %v1117_v5 = vrot.slane %v1115_v32, 5  ;;  %v1134_v12 = vshrl.u32 %v1069_v25, 16  ;;  %v1137_v1 = vshll.u32 %v1069_v25, 16  ;;  %v535_v23 = vrot.slane %v4795_v30, 4 }
  0x6d   : > { %v1090_v40 = vsel %vm4605_vm10, %v4768_v39, %v1089_v37  ;;  %v1104_v41 = vsel %vm4605_vm10, %v1099_v60, %v1103_v38  ;;  %v1131_v42 = vrot.slane %v1129_v26, 5  ;;  %v1071_v19 = vld [vmem:[#allocation2 + $0x70] sm:$0xf]  ;;  %v599_v29 = vsel %vm4549_vm6, %v534_v35, %v598_v63  ;;  %v4822_v53 = vld [vmem:[#allocation2 + $0x18] sm:$0xf] }
  0x6e   : > { %v3804_v46 = vcombine.low %v1090_v40, %v1104_v41  ;;  %v1118_v48 = vsel %vm4605_vm10, %v1113_v16, %v1117_v5  ;;  %v1136_v49 = vrot.slane %v1134_v12, 4  ;;  %v1139_v51 = vrot.slane %v1137_v1, 5  ;;  %600 = vst [vmem:[#allocation2 + $0x80] sm:$0xf] %v599_v29  ;;  %v1399_v30 = vld [vmem:[#allocation2 + $0x20] sm:$0xf] }
  0x6f   : > { %v1132_v52 = vsel %vm4605_vm10, %v1127_v44, %v1131_v42  ;;  %v1148_v50 = vshrl.u32 %v1071_v19, 16  ;;  %v1151_v39 = vshll.u32 %v1071_v19, 16  ;;  %v3798_v56 = vcombine.low %v1069_v25, %v1071_v19  ;;  %v583_v57 = vld [vmem:[#allocation2 + $0x6c] sm:$0x1]  ;;  %v1396_v5 = vld [vmem:[#allocation2 + $0x14] sm:$0x1] }
  0x70   : > { %4083 = vmatprep.mubr.msk.bf16.mxu1 %vm887_vm9, %v3804_v46  ;;  %v3805_v60 = vcombine.low %v1118_v48, %v1132_v52  ;;  %v584_v58 = vsel %vm4519_vm4, %v511_v11, %v583_v57  ;;  %v589_v59 = vld [vmem:[#allocation2 + $0x74] sm:$0x1]  ;;  %v1140_v61 = vor.u32 %v1139_v51, %v1136_v49  ;;  %v1410_v62 = vshrl.u32 %v4782_v6, 16  ;;  %v1394_v37 = vld [vmem:[#allocation2 + $0xc] sm:$0x1] }
  0x71   : > { %v1150_v0 = vrot.slane %v1148_v50, 4  ;;  %v1153_v2 = vrot.slane %v1151_v39, 5  ;;  %4077 = vmatprep.mubr.msk.bf16.mxu0 %vm887_vm9, %v3798_v56  ;;  %v1073_v8 = vld [vmem:[#allocation2 + $0x78] sm:$0xf]  ;;  %585 = vst [vmem:[#allocation2 + $0x6c] sm:$0x1] %v584_v58  ;;  %v590_v54 = vsel %vm4519_vm4, %v519_v43, %v589_v59  ;;  %v3815_v46 = vcombine.low %v4822_v53, %v1399_v30 }
  0x72   : > { %v1413_v9 = vshll.u32 %v4782_v6, 16  ;;  %4084 = vmatmul.mubr.msk.bf16.vlgmr.msra.gmra.mxu1 %vm887_vm9, %v3805_v60  ;;  %v1162_v11 = vshrl.u32 %v1073_v8, 16  ;;  %v1165_v10 = vshll.u32 %v1073_v8, 16  ;;  %591 = vst [vmem:[#allocation2 + $0x74] sm:$0x1] %v590_v54  ;;  %v4831_v3 = vrot.slane %v1140_v61, 4 }
  0x73   : > { %v595_v14 = vld [vmem:[#allocation2 + $0x7c] sm:$0x1]  ;;  %v1412_v18 = vrot.slane %v1410_v62, 4  ;;  %4102 = vmatpush3.bf16.msra.mxu1 %v4723_v45  ;;  %v1154_v16 = vor.u32 %v1153_v2, %v1150_v0  ;;  %v601_v43 = vld [vmem:[#allocation2 + $0x84] sm:$0x1]  ;;  %v1424_v63 = vshrl.u32 %v4788_v47, 16 }
  0x74   : > { %v596_v13 = vsel %vm4519_vm4, %v527_v4, %v595_v14  ;;  %v1415_v20 = vrot.slane %v1413_v9, 5  ;;  %v1164_v17 = vrot.slane %v1162_v11, 4  ;;  %v1167_v15 = vrot.slane %v1165_v10, 5  ;;  %v1398_v39 = vld [vmem:[#allocation2 + $0x1c] sm:$0x1] }
  0x75   : > { %597 = vst [vmem:[#allocation2 + $0x7c] sm:$0x1] %v596_v13  ;;  %v602_v24 = vsel %vm4519_vm4, %v535_v23, %v601_v43  ;;  %v1427_v27 = vshll.u32 %v4788_v47, 16  ;;  %v1075_v45 = vld [vmem:[#allocation2 + $0x80] sm:$0xf]  ;;  %v1155_v31 = vrot.slane %v1154_v16, 4 }
  0x76   : > { %603 = vst [vmem:[#allocation2 + $0x84] sm:$0x1] %v602_v24  ;;  %v1426_v55 = vrot.slane %v1424_v63, 4  ;;  %v1438_v21 = vshrl.u32 %v4822_v53, 16  ;;  %v1441_v4 = vshll.u32 %v4822_v53, 16  ;;  %v1176_v32 = vshrl.u32 %v1075_v45, 16 }
  0x77   : > { %v1179_v44 = vshll.u32 %v1075_v45, 16  ;;  %v3799_v33 = vcombine.low %v1073_v8, %v1075_v45  ;;  %v1168_v34 = vor.u32 %v1167_v15, %v1164_v17  ;;  %v1429_v38 = vrot.slane %v1427_v27, 5  ;;  %v1400_v10 = vld [vmem:[#allocation2 + $0x24] sm:$0x1]  ;;  %v4296_v36 = vld [vmem:[#allocation3 + $0x4c] sm:$0x1] }
  0x78   : > { %v1440_v26 = vrot.slane %v1438_v21, 4  ;;  %v1443_v25 = vrot.slane %v1441_v4, 5  ;;  %v1452_v35 = vshrl.u32 %v1399_v30, 16  ;;  %v1178_v12 = vrot.slane %v1176_v32, 4  ;;  %v1070_v23 = vld [vmem:[#allocation2 + $0x6c] sm:$0x1] }
  0x79   : > { %v1181_v1 = vrot.slane %v1179_v44, 5  ;;  %4078 = vmatmul.mubr.msk.bf16.gmra.mxu0 %vm887_vm9, %v3799_v33  ;;  %v1169_v40 = vrot.slane %v1168_v34, 4  ;;  %v1455_v41 = vshll.u32 %v1399_v30, 16  ;;  %v1072_v42 = vld [vmem:[#allocation2 + $0x74] sm:$0x1]  ;;  %v1143_v19 = vshll.u32 %v1070_v23, 16 }
  0x7a   : > { %4093 = vmatprep.mubr.msk.bf16.mxu0 %vm887_vm9, %v3814_v22  ;;  %v1454_v29 = vrot.slane %v1452_v35, 4  ;;  %v1416_v48 = vor.u32 %v1415_v20, %v1412_v18  ;;  %v1157_v49 = vshll.u32 %v1072_v42, 16  ;;  %v1419_v50 = vshll.u32 %v1394_v37, 16  ;;  %v1401_v18 = vld [vmem:[#allocation2 + $0x28] sm:$0xf] }
  0x7b   : > { %v1182_v51 = vor.u32 %v1181_v1, %v1178_v12  ;;  %v1457_v52 = vrot.slane %v1455_v41, 5  ;;  %v1145_v56 = vrot.slane %v1143_v19, 5  ;;  %v1430_v58 = vor.u32 %v1429_v38, %v1426_v55  ;;  %v1403_v20 = vld [vmem:[#allocation2 + $0x30] sm:$0xf]  ;;  %v471_v55 = vld [vmem:[%s4526_s18 + $0x3c] sm:$0xf] }
  0x7c   : > { %v1074_v57 = vld [vmem:[#allocation2 + $0x7c] sm:$0x1]  ;;  %v1417_v60 = vrot.slane %v1416_v48, 4  ;;  %v1433_v59 = vshll.u32 %v1396_v5, 16  ;;  %v1159_v61 = vrot.slane %v1157_v49, 5  ;;  %v1421_v47 = vrot.slane %v1419_v50, 5 }
  0x7d   : > { %v1076_v62 = vld [vmem:[#allocation2 + $0x84] sm:$0x1]  ;;  %v1171_v0 = vshll.u32 %v1074_v57, 16  ;;  %v1183_v6 = vrot.slane %v1182_v51, 4  ;;  %v1146_v22 = vsel %vm4605_vm10, %v4831_v3, %v1145_v56  ;;  %v1431_v2 = vrot.slane %v1430_v58, 4  ;;  %s4360_s18 = smov [#allocation4]  }
  0x7e   : > { %v1185_v53 = vshll.u32 %v1076_v62, 16  ;;  %v1435_v8 = vrot.slane %v1433_v59, 5  ;;  %v1160_v54 = vsel %vm4605_vm10, %v1155_v31, %v1159_v61  ;;  %v1422_v11 = vsel %vm4605_vm10, %v1417_v60, %v1421_v47  ;;  %v1402_v38 = vld [vmem:[#allocation2 + $0x2c] sm:$0x1]  ;;  %v1404_v12 = vld [vmem:[#allocation2 + $0x34] sm:$0x1] }
  0x7f   : > { %v1173_v9 = vrot.slane %v1171_v0, 5  ;;  %v1444_v14 = vor.u32 %v1443_v25, %v1440_v26  ;;  %v3806_v16 = vcombine.low %v1146_v22, %v1160_v54  ;;  %v1447_v3 = vshll.u32 %v1398_v39, 16  ;;  %v1405_v61 = vld [vmem:[#allocation2 + $0x38] sm:$0xf]  ;;  %s4301_s20 = sshll.u32 %s4360_s18, 4  ;;  %s4302_s20 = int_to_ptr.vmem [resolvable:$false] %s4301_s20 }
  0x80   : > { %v1187_v13 = vrot.slane %v1185_v53, 5  ;;  %v1436_v43 = vsel %vm4605_vm10, %v1431_v2, %v1435_v8  ;;  %v1458_v24 = vor.u32 %v1457_v52, %v1454_v29  ;;  %v1461_v45 = vshll.u32 %v1400_v10, 16  ;;  %v396_v29 = vld [vmem:[#allocation2 + $0x44] sm:$0x1]  ;;  %v1406_v10 = vld [vmem:[#allocation2 + $0x3c] sm:$0x1]  ;;  %p4304_p0 = scmp.lt.s32.totalorder %s5652_s27, %s4302_s20 }
  0x81   : > { %v1174_v63 = vsel %vm4605_vm10, %v1169_v40, %v1173_v9  ;;  %4094 = vmatmul.mubr.msk.bf16.vlgmr.msra.gmra.mxu0 %vm887_vm9, %v3815_v46  ;;  %v3822_v17 = vcombine.low %v1422_v11, %v1436_v43  ;;  %v1445_v15 = vrot.slane %v1444_v14, 4  ;;  %4087 = vmatprep.mubr.msk.bf16.mxu1 %vm887_vm9, %v3806_v16  ;;  %v1449_v30 = vrot.slane %v1447_v3, 5  ;;  %v727_v46 = vld [vmem:[#allocation2 + $0x40] sm:$0xf]  ;;  %s4303_s21 = scalar_lea.vmem %s4302_s20, 2048 }
  0x82   : > { %v1188_v27 = vsel %vm4605_vm10, %v1183_v6, %v1187_v13  ;;  %v1466_v31 = vshrl.u32 %v1401_v18, 16  ;;  %v1459_v4 = vrot.slane %v1458_v24, 4  ;;  %v1469_v32 = vshll.u32 %v1401_v18, 16  ;;  %p4305_p1 = scmp.lt.s32.totalorder %s4303_s21, %s4297_s11 }
  0x83   : > { %v3807_v21 = vcombine.low %v1174_v63, %v1188_v27  ;;  %v1480_v44 = vshrl.u32 %v1403_v20, 16  ;;  %v1463_v33 = vrot.slane %v1461_v45, 5  ;;  %v1483_v37 = vshll.u32 %v1403_v20, 16 }
  0x84   : > { %v1468_v34 = vrot.slane %v1466_v31, 4  ;;  %v1471_v26 = vrot.slane %v1469_v32, 5  ;;  %v3816_v35 = vcombine.low %v1401_v18, %v1403_v20  ;;  %v661_v5 = vshrl.u32 %v471_v55, 16  ;;  %p4306_p2 = por %p4305_p1, %p4304_p0 }
  0x85   : > { %4088 = vmatmul.mubr.msk.bf16.gmra.mxu1 %vm887_vm9, %v3807_v21  ;;  %v1482_v25 = vrot.slane %v1480_v44, 4  ;;  %v1450_v1 = vsel %vm4605_vm10, %v1445_v15, %v1449_v30  ;;  %v1464_v23 = vsel %vm4605_vm10, %v1459_v4, %v1463_v33  ;;  %v1485_v40 = vrot.slane %v1483_v37, 5  ;;  %v1932_v4 = vld [vmem:[%s5704_s4] sm:$0xf]  ;;  %v3840_v44 = vld [vmem:[%s5704_s4 + $0x4] sm:$0xf] }
  0x86   : > { %4103 = vmatprep.mubr.msk.bf16.mxu1 %vm887_vm9, %v3822_v17  ;;  %v664_v41 = vshll.u32 %v471_v55, 16  ;;  %4097 = vmatprep.mubr.msk.bf16.mxu0 %vm887_vm9, %v3816_v35  ;;  %v663_v42 = vrot.slane %v661_v5, 7  ;;  %v1472_v19 = vor.u32 %v1471_v26, %v1468_v34  ;;  %v1475_v48 = vshll.u32 %v1402_v38, 16  ;;  %v3865_v34 = vld [vmem:[%s5704_s4 + $0x8] sm:$0xf]  ;;  %p4307_p3 = pnand %p4306_p2, %p4300_p13 }
  0x87   : > { %v1486_v49 = vor.u32 %v1485_v40, %v1482_v25  ;;  %v1489_v51 = vshll.u32 %v1404_v12, 16  ;;  %v3823_v52 = vcombine.low %v1450_v1, %v1464_v23  ;;  %v397_v58 = vsel %vm4519_vm4, 0, %v396_v29  ;;  %4218 = vmatprep.subr.msk.bf16.mxu1 %vm900_vm0, %v1932_v4  ;;  %4217 = vmatprep.subr.msk.bf16.mxu0 %vm900_vm0, %v3840_v44  ;;  %v3875_v38 = vld [vmem:[%s5704_s4 + $0x10] sm:$0xf] }
  0x88   : > { %v666_v50 = vor.u32 %v664_v41, %v663_v42  ;;  %v1473_v39 = vrot.slane %v1472_v19, 4  ;;  %v1477_v56 = vrot.slane %v1475_v48, 5  ;;  %398 = vst [vmem:[#allocation2 + $0x44] sm:$0x1] %v397_v58  ;;  %v1494_v47 = vshrl.u32 %v1405_v61, 16 }
  0x89   : > { %v1487_v57 = vrot.slane %v1486_v49, 4  ;;  %v1491_v60 = vrot.slane %v1489_v51, 5  ;;  %v1497_v22 = vshll.u32 %v1405_v61, 16  ;;  %v667_v53 = vrot.slane %v663_v42, 4 }
  0x8a   : > { %v728_v59 = vsel %vm4549_vm6, %v666_v50, %v727_v46  ;;  %v1478_v62 = vsel %vm4605_vm10, %v1473_v39, %v1477_v56  ;;  %v1496_v2 = vrot.slane %v1494_v47, 4  ;;  %v1503_v20 = vshll.u32 %v1406_v10, 16  ;;  %v4919_v39 = vld [vmem:[#allocation3] sm:$0xf] }
  0x8b   : > { %729 = vst [vmem:[#allocation2 + $0x40] sm:$0xf] %v728_v59  ;;  %v1492_v0 = vsel %vm4605_vm10, %v1487_v57, %v1491_v60  ;;  %v1499_v8 = vrot.slane %v1497_v22, 5  ;;  %v2180_v32 = vsel %vm900_vm0, %v1932_v4, 0  ;;  %v2080_v33 = vsel %vm900_vm0, %v3840_v44, 0 }
  0x8c   : > { %v3824_v6 = vcombine.low %v1478_v62, %v1492_v0  ;;  %v1505_v15 = vrot.slane %v1503_v20, 5  ;;  %4112 = vmatpush3.bf16.msra.mxu0 %v2080_v33  ;;  %v1942_v60 = vshrl.u32 %v4919_v39, 16  ;;  %v1945_v58 = vshll.u32 %v4919_v39, 16  ;;  %v1933_v22 = vld [vmem:[#allocation3 + $0x4] sm:$0x1] }
  0x8d   : > { %4104 = vmatmul.mubr.msk.bf16.vlgmr.msra.gmra.mxu1 %vm887_vm9, %v3823_v52  ;;  %v1500_v3 = vor.u32 %v1499_v8, %v1496_v2  ;;  %4219 = vmatprep.subr.msk.bf16.mxu0 %vm900_vm0, %v3865_v34  ;;  %v1951_v8 = vshll.u32 %v1933_v22, 16  ;;  %vm2271_vm11 = vcmask 1042432   ;;  %vm2272_vm12 = vcmask 1046532  }
  0x8e   : > { %4107 = vmatprep.mubr.msk.bf16.mxu1 %vm887_vm9, %v3824_v6  ;;  %4122 = vmatpush3.bf16.msra.mxu1 %v2180_v32  ;;  %v1944_v0 = vrot.slane %v1942_v60, 4  ;;  %v1947_v6 = vrot.slane %v1945_v58, 5  ;;  %vm4941_vm13 = vmor %vm2271_vm11, %vm2272_vm12 }
  0x8f   : > { %v730_v54 = vld [vmem:[#allocation2 + $0x44] sm:$0x1]  ;;  %v1501_v17 = vrot.slane %v1500_v3, 4  ;;  %4220 = vmatprep.subr.msk.bf16.mxu1 %vm900_vm0, %v3875_v38 }
  0x90   : > { %v731_v11 = vsel %vm4519_vm4, %v667_v53, %v730_v54  ;;  %v1948_v2 = vor.u32 %v1947_v6, %v1944_v0 }
  0x91   : > { %732 = vst [vmem:[#allocation2 + $0x44] sm:$0x1] %v731_v11  ;;  %v1506_v45 = vsel %vm4605_vm10, %v1501_v17, %v1505_v15  ;;  %v2906_v11 = vld [vmem:[#allocation3 + $0x48] sm:$0xf]  ;;  %v4936_v15 = vsel %vm900_vm0, %v3865_v34, 0 }
  0x92   : > { %v1407_v9 = vld [vmem:[#allocation2 + $0x40] sm:$0xf]  ;;  %v3019_v3 = vshll.u32 %v2906_v11, 16 }
  0x93   : > { %v1508_v14 = vshrl.u32 %v1407_v9, 16  ;;  %v1511_v18 = vshll.u32 %v1407_v9, 16  ;;  %v3817_v16 = vcombine.low %v1405_v61, %v1407_v9  ;;  %v2247_v9 = vld [vmem:[#allocation3] sm:$0xe] }
  0x94   : > { %v3021_v4 = vrot.slane %v3019_v3, 5 }
  0x95   : > { %v1510_v13 = vrot.slane %v1508_v14, 4  ;;  %v1513_v43 = vrot.slane %v1511_v18, 5  ;;  %4098 = vmatmul.mubr.msk.bf16.gmra.mxu0 %vm887_vm9, %v3817_v16  ;;  %v4931_v14 = vrot.slane %v1948_v2, 4  ;;  %v4933_v18 = vrot.slane %v1951_v8, 5  ;;  %v4971_v2 = vld [vmem:[%s5704_s4 + $0x18] sm:$0xf] }
  0x96   : > { %v3857_v16 = vrot.slane %v2247_v9, 9  ;;  %v2916_v8 = vld [vmem:[#allocation3 + $0x4c] sm:$0x1] }
  0x97   : > { %v1514_v63 = vor.u32 %v1513_v43, %v1510_v13  ;;  %v2276_v13 = vrot.slane %v1933_v22, 5  ;;  %v3016_v43 = vshrl.u32 %v2906_v11, 16  ;;  %v4966_v22 = vld [vmem:[%s5704_s4 + $0x1c] sm:$0xf] }
  0x98   : > { %v1408_v24 = vld [vmem:[#allocation2 + $0x44] sm:$0x1] }
  0x99   : > { %v1515_v27 = vrot.slane %v1514_v63, 4  ;;  %v1517_v30 = vshll.u32 %v1408_v24, 16  ;;  %v4939_v24 = vsel %vm900_vm0, %v3875_v38, 0 }
  0x9b   : > { %v1519_v31 = vrot.slane %v1517_v30, 5 }
  0x9d   : > { %v1520_v55 = vsel %vm4605_vm10, %v1515_v27, %v1519_v31  ;;  %v4956_v31 = vld [vmem:[%s5704_s4 + $0xc] sm:$0xf] }
  0x9e   : > { %v3825_v21 = vcombine.low %v1506_v45, %v1520_v55  ;;  %v4951_v45 = vsel %vm4941_vm13, %v3857_v16, %v2276_v13  ;;  %v4961_v55 = vld [vmem:[%s5704_s4 + $0x14] sm:$0xf]  ;;  %v5011_v16 = vld [vmem:[%s5702_s2] ss:$0 sm:$0xff] }
  0xa0   : > { %4108 = vmatmul.mubr.msk.bf16.gmra.mxu1 %vm887_vm9, %v3825_v21  ;;  %v3018_v21 = vrot.slane %v3016_v43, 4 }
  0xfa   : > { %v4055_v37 = vpop.f32.mrf.mxu0 }
  0xfc   : > { %v938_v26 = vpop.f32.mrf.mxu0 }
  0xfe   : > { %v4056_v25 = vpop.f32.mrf.mxu0 }
 0x100   : > { %v941_v35 = vpop.f32.mrf.mxu0 }
 0x10b   : > { %v4065_v5 = vpop.f32.mrf.mxu1  ;;  %v4909_v12 = vpop.f32.mrf.mxu0 }
 0x10c   : > { %v1039_v32 = vadd.f32 %v4065_v5, %v4055_v37 }
 0x10d   : > { %v1030_v1 = vpop.f32.mrf.mxu1  ;;  %v4911_v23 = vpop.f32.mrf.mxu0 }
 0x10e   : > { %v1031_v44 = vadd.f32 %v1030_v1, %v938_v26  ;;  %v3025_v1 = vshll.u32 %v2916_v8, 16 }
 0x10f   : > { %v4066_v40 = vpop.f32.mrf.mxu1  ;;  %v4913_v41 = vpop.f32.mrf.mxu0 }
 0x110   : > { %v1042_v60 = vadd.f32 %v4066_v40, %v4056_v25  ;;  %v4978_v25 = vsel %vm900_vm0, %v4956_v31, 0 }
 0x111   : > { %v1033_v42 = vpop.f32.mrf.mxu1  ;;  %v4915_v19 = vpop.f32.mrf.mxu0 }
 0x112   : > { %v1034_v58 = vadd.f32 %v1033_v42, %v941_v35  ;;  %v4982_v35 = vsel %vm900_vm0, %v4961_v55, 0 }
 0x120   : > { %v4069_v29 = vpop.f32.mrf.mxu1 }
 0x121   : > { %v1055_v37 = vadd.f32 %v4069_v29, %v4909_v12  ;;  %v3935_v29 = vld [vmem:[%s5704_s4 + $0x20] sm:$0xf] }
 0x122   : > { %v4917_v46 = vpop.f32.mrf.mxu1  ;;  %v5014_v43 = vsel %vm900_vm0, %v3935_v29, 0 }
 0x123   : > { %v1047_v40 = vadd.f32 %v4917_v46, %v4911_v23  ;;  %v5000_v23 = vsel %vm900_vm0, %v4966_v22, 0 }
 0x124   : > { %v4070_v49 = vpop.f32.mrf.mxu1 }
 0x125   : > { %v4075_v48 = vpop.f32.mrf.mxu0  ;;  %v4987_v42 = vadd.f32 %v4070_v49, %v4913_v41  ;;  %v5004_v41 = vsel %vm900_vm0, %v4971_v2, 0 }
 0x126   : > { %v1049_v52 = vpop.f32.mrf.mxu1 }
 0x127   : > { %v1262_v51 = vpop.f32.mrf.mxu0  ;;  %v4990_v12 = vadd.f32 %v1049_v52, %v4915_v19 }
 0x129   : > { %v4076_v50 = vpop.f32.mrf.mxu0 }
 0x12b   : > { %v1265_v56 = vpop.f32.mrf.mxu0 }
 0x132   : > { %v4085_v57 = vpop.f32.mrf.mxu1 }
 0x133   : > { %v1363_v33 = vadd.f32 %v4085_v57, %v4075_v48  ;;  %v3547_v48 = vld [vmem:[%s5707_s7] sm:$0xf] }
 0x134   : > { %v1354_v61 = vpop.f32.mrf.mxu1  ;;  %v5017_v3 = vsel %vm900_vm0, %v3547_v48, 0 }
 0x135   : > { %v1355_v34 = vadd.f32 %v1354_v61, %v1262_v51  ;;  %v3022_v51 = vor.u32 %v3021_v4, %v3018_v21  ;;  %v5021_v4 = vrot.slane %v3025_v1, 5 }
 0x136   : > { %v4086_v47 = vpop.f32.mrf.mxu1 }
 0x137   : > { %v1366_v0 = vadd.f32 %v4086_v47, %v4076_v50  ;;  %v3419_v50 = vld [vmem:[#allocation2 + $0x48] sm:$0xf]  ;;  %v1385_v57 = vadd.f32 %v1355_v34, %v1031_v44  ;;  %v3420_v47 = vld [vmem:[#allocation2 + $0x4c] sm:$0x1] }
 0x138   : > { %v1357_v54 = vpop.f32.mrf.mxu1  ;;  %v3436_v21 = vshrl.u32 %v3419_v50, 16  ;;  %v3439_v44 = vshll.u32 %v3419_v50, 16 }
 0x139   : > { %v4923_v59 = vpop.f32.mrf.mxu0  ;;  %v1358_v6 = vadd.f32 %v1357_v54, %v1265_v56  ;;  %v1387_v56 = vadd.f32 %v1363_v33, %v1039_v32  ;;  %v1388_v19 = vadd.f32 %v1366_v0, %v1042_v60  ;;  %v3421_v54 = vld [vmem:[#allocation2 + $0x50] sm:$0xf]  ;;  %v3445_v33 = vshll.u32 %v3420_v47, 16 }
 0x13a   : > { %v3450_v34 = vshrl.u32 %v3421_v54, 16  ;;  %v3453_v60 = vshll.u32 %v3421_v54, 16 }
 0x13b   : > { %v4925_v62 = vpop.f32.mrf.mxu0  ;;  %v1386_v46 = vadd.f32 %v1358_v6, %v1034_v58  ;;  %v5036_v54 = vrot.slane %v3445_v33, 5 }
 0x13d   : > { %v4927_v53 = vpop.f32.mrf.mxu0 }
 0x13f   : > { %v4929_v10 = vpop.f32.mrf.mxu0 }
 0x141   : > { %v4095_v17 = vpop.f32.mrf.mxu0 }
 0x143   : > { %v1594_v26 = vpop.f32.mrf.mxu0 }
 0x145   : > { %v4089_v20 = vpop.f32.mrf.mxu1  ;;  %v4096_v11 = vpop.f32.mrf.mxu0 }
 0x146   : > { %v1379_v49 = vadd.f32 %v4089_v20, %v4923_v59 }
 0x147   : > { %v1370_v63 = vpop.f32.mrf.mxu1  ;;  %v1597_v29 = vpop.f32.mrf.mxu0 }
 0x148   : > { %v1371_v9 = vadd.f32 %v1370_v63, %v4925_v62  ;;  %v3422_v62 = vld [vmem:[#allocation2 + $0x54] sm:$0x1]  ;;  %v5026_v63 = vld [vmem:[%s5703_s3] ss:$0 sm:$0xff]  ;;  %v5028_v58 = vadd.f32 %v1379_v49, %v1055_v37  ;;  %v3423_v37 = vld [vmem:[#allocation2 + $0x58] sm:$0xf] }
 0x149   : > { %v4090_v38 = vpop.f32.mrf.mxu1  ;;  %v3441_v49 = vrot.slane %v3439_v44, 5 }
 0x14a   : > { %v1382_v1 = vadd.f32 %v4090_v38, %v4927_v53 }
 0x14b   : > { %v4974_v5 = vpop.f32.mrf.mxu1 }
 0x14d   : > { %v4105_v61 = vpop.f32.mrf.mxu1 }
 0x14e   : > { %v1695_v52 = vadd.f32 %v4105_v61, %v4095_v17  ;;  %v5019_v17 = vrot.slane %v3022_v51, 4  ;;  %v3438_v51 = vrot.slane %v3436_v21, 4  ;;  %v1374_v21 = vadd.f32 %v4974_v5, %v4929_v10 }
 0x14f   : > { %v1686_v13 = vpop.f32.mrf.mxu1 }
 0x150   : > { %v1719_v59 = vadd.f32 %v1695_v52, %v1387_v56  ;;  %v1687_v20 = vadd.f32 %v1686_v13, %v1594_v26  ;;  %v5031_v26 = vadd.f32 %v1371_v9, %v1047_v40  ;;  %v3459_v56 = vshll.u32 %v3422_v62, 16  ;;  %v3424_v13 = vld [vmem:[#allocation2 + $0x5c] sm:$0x1] }
 0x151   : > { %v4106_v32 = vpop.f32.mrf.mxu1  ;;  %v3467_v62 = vshll.u32 %v3423_v37, 16 }
 0x152   : > { %v1734_v0 = vmul.f32 %v5011_v16, %v1719_v59  ;;  %v1717_v6 = vadd.f32 %v1687_v20, %v1385_v57  ;;  %v1698_v8 = vadd.f32 %v4106_v32, %v4096_v11  ;;  %v3452_v57 = vrot.slane %v3450_v34, 4 }
 0x153   : > { %v1689_v48 = vpop.f32.mrf.mxu1  ;;  %v3455_v11 = vrot.slane %v3453_v60, 5  ;;  %v5042_v59 = vrot.slane %v3459_v56, 5  ;;  %v3464_v20 = vshrl.u32 %v3423_v37, 16  ;;  %v5049_v60 = vadd.f32 %v1382_v1, %v4987_v42  ;;  %v1888_v56 = vld [vmem:[#allocation3 + $0x18] sm:$0xf] }
 0x154   : > { %v1749_v61 = vadd.f32 %v5026_v63, %v1734_v0  ;;  %v1732_v50 = vmul.f32 %v5011_v16, %v1717_v6  ;;  %v1720_v52 = vadd.f32 %v1698_v8, %v1388_v19  ;;  %v1690_v47 = vadd.f32 %v1689_v48, %v1597_v29  ;;  %v5044_v19 = vld [vmem:[#allocation2 + $0x60] sm:$0xf]  ;;  %v1891_v42 = vld [vmem:[#allocation3 + $0x1c] sm:$0x1] }
 0x155   : > { %v3456_v0 = vor.u32 %v3455_v11, %v3452_v57  ;;  %v3473_v6 = vshll.u32 %v3424_v13, 16  ;;  %v3478_v29 = vshrl.u32 %v5044_v19, 16  ;;  %v5053_v48 = vadd.f32 %v1374_v21, %v4990_v12  ;;  %v1876_v11 = vld [vmem:[#allocation3 + $0x8] sm:$0xf]  ;;  %v1879_v21 = vld [vmem:[#allocation3 + $0xc] sm:$0x1] }
 0x156   : > { %v1757_v40 = vmax.f32 %v1749_v61, 0.0  ;;  %v1747_v9 = vadd.f32 %v5026_v63, %v1732_v50  ;;  %v1735_v53 = vmul.f32 %v5011_v16, %v1720_v52  ;;  %v1718_v38 = vadd.f32 %v1690_v47, %v1386_v46 }
 0x157   : > { %v3442_v46 = vor.u32 %v3441_v49, %v3438_v51  ;;  %v3466_v50 = vrot.slane %v3464_v20, 4  ;;  %v3469_v52 = vrot.slane %v3467_v62, 5  ;;  %v4099_v49 = vpop.f32.mrf.mxu0  ;;  %v3426_v62 = vld [vmem:[#allocation2 + $0x64] sm:$0x1] }
 0x158   : > { %v3964_v32 = vpack.c.bf16 %v1757_v40, %v1757_v40  ;;  %v1755_v44 = vmax.f32 %v1747_v9, 0.0  ;;  %v1750_v33 = vadd.f32 %v5026_v63, %v1735_v53  ;;  %v1733_v34 = vmul.f32 %v5011_v16, %v1718_v38 }
 0x159   : > { %v5056_v9 = vrot.slane %v3442_v46, 4  ;;  %v5058_v53 = vrot.slane %v3456_v0, 4 }
 0x15a   : > { %v1812_v8 = vshrl.u32 %v3964_v32, 16  ;;  %v3962_v10 = vpack.c.bf16 %v1755_v44, %v1755_v44  ;;  %v1758_v5 = vmax.f32 %v1750_v33, 0.0  ;;  %v1748_v61 = vadd.f32 %v5026_v63, %v1733_v34 }
 0x15b   : > { %v1815_v37 = vshll.u32 %v3964_v32, 16  ;;  %v3470_v33 = vor.u32 %v3469_v52, %v3466_v50  ;;  %v5060_v32 = vrot.slane %v3473_v6, 5  ;;  %v5062_v34 = vrot.slane %v3478_v29, 4 }
 0x15c   : > { %v1814_v47 = vrot.slane %v1812_v8, 7  ;;  %v1796_v1 = vshrl.u32 %v3962_v10, 16  ;;  %v3965_v51 = vpack.c.bf16 %v1758_v5, %v1758_v5  ;;  %v1799_v57 = vshll.u32 %v3962_v10, 16  ;;  %v5064_v8 = vld [vmem:[#allocation2 + $0x68] sm:$0xf] }
 0x15d   : > { %v1756_v40 = vmax.f32 %v1748_v61, 0.0  ;;  %v1610_v61 = vpop.f32.mrf.mxu0  ;;  %v3481_v6 = vshll.u32 %v5044_v19, 16  ;;  %v1885_v19 = vld [vmem:[#allocation3 + $0x14] sm:$0x1] }
 0x15e   : > { %v1817_v12 = vor.u32 %v1815_v37, %v1814_v47  ;;  %v1818_v38 = vrot.slane %v1814_v47, 4  ;;  %v1798_v13 = vrot.slane %v1796_v1, 7  ;;  %v1820_v44 = vshrl.u32 %v3965_v51, 16  ;;  %v1897_v1 = vld [vmem:[#allocation3 + $0x24] sm:$0x1] }
 0x15f   : > { %v3963_v20 = vpack.c.bf16 %v1756_v40, %v1756_v40  ;;  %v1823_v37 = vshll.u32 %v3965_v51, 16  ;;  %v3487_v40 = vshll.u32 %v3426_v62, 16  ;;  %v5084_v62 = vrot.slane %v3470_v33, 4 }
 0x160   : > { %v1889_v46 = vsel %vm4549_vm6, %v1817_v12, %v1888_v56  ;;  %v1892_v0 = vsel %vm4519_vm4, %v1818_v38, %v1891_v42  ;;  %v1801_v10 = vor.u32 %v1799_v57, %v1798_v13  ;;  %v1802_v5 = vrot.slane %v1798_v13, 4  ;;  %v1894_v56 = vld [vmem:[#allocation3 + $0x20] sm:$0xf]  ;;  %v4109_v13 = vpop.f32.mrf.mxu1 }
 0x161   : > { %1890 = vst [vmem:[#allocation3 + $0x18] sm:$0xf] %v1889_v46  ;;  %1893 = vst [vmem:[#allocation3 + $0x1c] sm:$0x1] %v1892_v0  ;;  %v1822_v47 = vrot.slane %v1820_v44, 7  ;;  %v1804_v50 = vshrl.u32 %v3963_v20, 16  ;;  %v1711_v46 = vadd.f32 %v4109_v13, %v4099_v49 }
 0x162   : > { %v1877_v29 = vsel %vm4549_vm6, %v1801_v10, %v1876_v11  ;;  %v1880_v52 = vsel %vm4519_vm4, %v1802_v5, %v1879_v21  ;;  %v3492_v42 = vshrl.u32 %v5064_v8, 16  ;;  %v1807_v51 = vshll.u32 %v3963_v20, 16  ;;  %v1882_v44 = vld [vmem:[#allocation3 + $0x10] sm:$0xf]  ;;  %v4100_v10 = vpop.f32.mrf.mxu0  ;;  %v1915_v13 = vld [vmem:[#allocation3 + $0x3c] sm:$0x1] }
 0x163   : > { %1878 = vst [vmem:[#allocation3 + $0x8] sm:$0xf] %v1877_v29  ;;  %1881 = vst [vmem:[#allocation3 + $0xc] sm:$0x1] %v1880_v52  ;;  %v1825_v57 = vor.u32 %v1823_v37, %v1822_v47  ;;  %v1826_v12 = vrot.slane %v1822_v47, 4  ;;  %v1806_v38 = vrot.slane %v1804_v50, 7  ;;  %v3448_v11 = vsel %vm4605_vm10, %v5056_v9, %v5036_v54  ;;  %v1702_v47 = vpop.f32.mrf.mxu1 }
 0x164   : > { %v3462_v21 = vsel %vm4605_vm10, %v5058_v53, %v5042_v59  ;;  %v1723_v54 = vadd.f32 %v1711_v46, %v5028_v58  ;;  %v1703_v9 = vadd.f32 %v1702_v47, %v1610_v61  ;;  %v5091_v37 = vrot.slane %v3481_v6, 5 }
 0x165   : > { %v1895_v0 = vsel %vm4549_vm6, %v1825_v57, %v1894_v56  ;;  %v1898_v20 = vsel %vm4519_vm4, %v1826_v12, %v1897_v1  ;;  %v1809_v49 = vor.u32 %v1807_v51, %v1806_v38  ;;  %v1810_v5 = vrot.slane %v1806_v38, 4  ;;  %v4110_v50 = vpop.f32.mrf.mxu1  ;;  %v1613_v12 = vpop.f32.mrf.mxu0 }
 0x166   : > { %1896 = vst [vmem:[#allocation3 + $0x20] sm:$0xf] %v1895_v0  ;;  %1899 = vst [vmem:[#allocation3 + $0x24] sm:$0x1] %v1898_v20  ;;  %v5093_v59 = vrot.slane %v3487_v40, 5  ;;  %v5099_v29 = vrot.slane %v3492_v42, 4  ;;  %v1738_v58 = vmul.f32 %v5011_v16, %v1723_v54  ;;  %v1721_v61 = vadd.f32 %v1703_v9, %v5031_v26 }
 0x167   : > { %v1883_v53 = vsel %vm4549_vm6, %v1809_v49, %v1882_v44  ;;  %v1886_v33 = vsel %vm4519_vm4, %v1810_v5, %v1885_v19  ;;  %v1714_v6 = vadd.f32 %v4110_v50, %v4100_v10  ;;  %v5108_v57 = vcombine.low %v3448_v11, %v3462_v21  ;;  %v1705_v38 = vpop.f32.mrf.mxu1 }
 0x168   : > { %5721 = vst [vmem:[#allocation7_spill] sm:$0xff] %v5093_v59  ;;  %1884 = vst [vmem:[#allocation3 + $0x10] sm:$0xf] %v1883_v53  ;;  %v1927_v56 = vld [vmem:[#allocation3 + $0x18] sm:$0xf]  ;;  %v1753_v19 = vadd.f32 %v5026_v63, %v1738_v58  ;;  %v1736_v26 = vmul.f32 %v5011_v16, %v1721_v61  ;;  %v1706_v0 = vadd.f32 %v1705_v38, %v1613_v12 }
 0x169   : > { %1887 = vst [vmem:[#allocation3 + $0x14] sm:$0x1] %v1886_v33  ;;  %v5104_v1 = vld [vmem:[#allocation3 + $0x1c] sm:$0x1]  ;;  %v5106_v40 = vld [vmem:[#allocation3 + $0x18] sm:$0xf]  ;;  %v1724_v46 = vadd.f32 %v1714_v6, %v5049_v60 }
 0x16a   : > { %5722 = vst [vmem:[#allocation8_spill] sm:$0xff] %v5108_v57  ;;  %v1984_v42 = vshrl.u32 %v1927_v56, 16  ;;  %v1987_v51 = vshll.u32 %v1927_v56, 16  ;;  %v1925_v20 = vld [vmem:[#allocation3 + $0x8] sm:$0xf]  ;;  %v1761_v47 = vmax.f32 %v1753_v19, 0.0  ;;  %v1751_v54 = vadd.f32 %v5026_v63, %v1736_v26 }
 0x16b   : > { %v5115_v10 = vld [vmem:[#allocation3 + $0xc] sm:$0x1]  ;;  %v1956_v11 = vshrl.u32 %v1925_v20, 16  ;;  %v1959_v21 = vshll.u32 %v1925_v20, 16  ;;  %v3849_v49 = vcombine.low %v4919_v39, %v1925_v20  ;;  %v1739_v9 = vmul.f32 %v5011_v16, %v1724_v46 }
 0x16c   : > { %v5118_v5 = vrot.slane %v1984_v42, 4  ;;  %v1722_v53 = vadd.f32 %v1706_v0, %v5053_v48  ;;  %v5124_v60 = vrot.slane %v1987_v51, 5  ;;  %v1965_v61 = vshll.u32 %v5115_v10, 16 }
 0x16d   : > { %v1958_v33 = vrot.slane %v1956_v11, 4  ;;  %v1961_v50 = vrot.slane %v1959_v21, 5  ;;  %4123 = vmatprep.mubr.msk.bf16.mxu1 %vm887_vm9, %v3849_v49  ;;  %v5126_v58 = vld [vmem:[#allocation3 + $0x20] sm:$0xf]  ;;  %v3968_v39 = vpack.c.bf16 %v1761_v47, %v1761_v47  ;;  %v1759_v6 = vmax.f32 %v1751_v54, 0.0 }
 0x16e   : > { %v1754_v12 = vadd.f32 %v5026_v63, %v1739_v9  ;;  %v1737_v38 = vmul.f32 %v5011_v16, %v1722_v53  ;;  %v1998_v19 = vshrl.u32 %v5126_v58, 16  ;;  %v2001_v48 = vshll.u32 %v5126_v58, 16  ;;  %v1912_v9 = vld [vmem:[#allocation3 + $0x38] sm:$0xf] }
 0x16f   : > { %v1926_v42 = vld [vmem:[#allocation3 + $0x10] sm:$0xf]  ;;  %v1962_v26 = vor.u32 %v1961_v50, %v1958_v33  ;;  %v1967_v46 = vrot.slane %v1965_v61, 5  ;;  %v1844_v0 = vshrl.u32 %v3968_v39, 16  ;;  %v1847_v51 = vshll.u32 %v3968_v39, 16 }
 0x170   : > { %v3966_v20 = vpack.c.bf16 %v1759_v6, %v1759_v6  ;;  %v1762_v11 = vmax.f32 %v1754_v12, 0.0  ;;  %v1752_v21 = vadd.f32 %v5026_v63, %v1737_v38  ;;  %v1970_v49 = vshrl.u32 %v1926_v42, 16  ;;  %v1900_v63 = vld [vmem:[#allocation3 + $0x28] sm:$0xf] }
 0x171   : > { %v1973_v47 = vshll.u32 %v1926_v42, 16  ;;  %v3850_v54 = vcombine.low %v1926_v42, %v1927_v56  ;;  %v1846_v52 = vrot.slane %v1844_v0, 7  ;;  %v5135_v33 = vrot.slane %v1998_v19, 4  ;;  %v1903_v56 = vld [vmem:[#allocation3 + $0x2c] sm:$0x1] }
 0x172   : > { %v1828_v44 = vshrl.u32 %v3966_v20, 16  ;;  %v1831_v16 = vshll.u32 %v3966_v20, 16  ;;  %v3969_v53 = vpack.c.bf16 %v1762_v11, %v1762_v11  ;;  %v1760_v30 = vmax.f32 %v1752_v21, 0.0  ;;  %v1918_v20 = vld [vmem:[#allocation3 + $0x40] sm:$0xf] }
 0x173   : > { %v1972_v57 = vrot.slane %v1970_v49, 4  ;;  %v1975_v59 = vrot.slane %v1973_v47, 5  ;;  %4124 = vmatmul.mubr.msk.bf16.vlgmr.msra.gmra.mxu1 %vm887_vm9, %v3850_v54  ;;  %v1849_v50 = vor.u32 %v1847_v51, %v1846_v52  ;;  %v1850_v61 = vrot.slane %v1846_v52, 4  ;;  %v5146_v11 = vld [vmem:[#allocation3 + $0x14] sm:$0x1] }
 0x174   : > { %v1830_v39 = vrot.slane %v1828_v44, 7  ;;  %v1852_v6 = vshrl.u32 %v3969_v53, 16  ;;  %4142 = vmatpush3.bf16.msra.mxu1 %v4939_v24  ;;  %v1855_v12 = vshll.u32 %v3969_v53, 16  ;;  %v3967_v38 = vpack.c.bf16 %v1760_v30, %v1760_v30  ;;  %v1921_v49 = vld [vmem:[#allocation3 + $0x44] sm:$0x1] }
 0x175   : > { %v5138_v42 = vrot.slane %v2001_v48, 5  ;;  %v1963_v0 = vrot.slane %v1962_v26, 4  ;;  %4222 = vmatprep.subr.msk.bf16.mxu1 %vm900_vm0, %v4961_v55  ;;  %v1913_v19 = vsel %vm4549_vm6, %v1849_v50, %v1912_v9  ;;  %v1916_v52 = vsel %vm4519_vm4, %v1850_v61, %v1915_v13  ;;  %v5150_v55 = vld [vmem:[#allocation3 + $0x8] sm:$0xf]  ;;  %v1906_v47 = vld [vmem:[#allocation3 + $0x30] sm:$0xf] }
 0x176   : > { %v1833_v44 = vor.u32 %v1831_v16, %v1830_v39  ;;  %v1834_v51 = vrot.slane %v1830_v39, 4  ;;  %1914 = vst [vmem:[#allocation3 + $0x38] sm:$0xf] %v1913_v19  ;;  %1917 = vst [vmem:[#allocation3 + $0x3c] sm:$0x1] %v1916_v52  ;;  %v1854_v24 = vrot.slane %v1852_v6, 7  ;;  %v5723_v9 = vsel %vm4605_vm10, %v4931_v14, %v4933_v18 }
 0x177   : > { %v1836_v30 = vshrl.u32 %v3967_v38, 16  ;;  %v1839_v48 = vshll.u32 %v3967_v38, 16  ;;  %v1968_v26 = vsel %vm4605_vm10, %v1963_v0, %v1967_v46  ;;  %v1909_v54 = vld [vmem:[#allocation3 + $0x34] sm:$0x1]  ;;  %v1976_v53 = vor.u32 %v1975_v59, %v1972_v57  ;;  %v5169_v18 = vld [vmem:[#allocation3 + $0x10] sm:$0xf] }
 0x178   : > { %v1901_v21 = vsel %vm4549_vm6, %v1833_v44, %v1900_v63  ;;  %v1904_v13 = vsel %vm4519_vm4, %v1834_v51, %v1903_v56  ;;  %v3841_v16 = vcombine.low %v5723_v9, %v1968_v26  ;;  %v1857_v46 = vor.u32 %v1855_v12, %v1854_v24  ;;  %v5162_v63 = vld [vmem:[#allocation3 + $0xc] sm:$0x1] }
 0x179   : > { %1902 = vst [vmem:[#allocation3 + $0x28] sm:$0xf] %v1901_v21  ;;  %1905 = vst [vmem:[#allocation3 + $0x2c] sm:$0x1] %v1904_v13  ;;  %v1858_v50 = vrot.slane %v1854_v24, 4  ;;  %v1838_v61 = vrot.slane %v1836_v30, 7  ;;  %v1990_v56 = vor.u32 %v5124_v60, %v5118_v5 }
 0x17a   : > { %v1979_v39 = vshll.u32 %v5146_v11, 16  ;;  %4113 = vmatprep.mubr.msk.bf16.mxu0 %vm887_vm9, %v3841_v16  ;;  %v1977_v6 = vrot.slane %v1976_v53, 4  ;;  %v5724_v38 = vshll.u32 %v5104_v1, 16  ;;  %v2427_v59 = vshrl.u32 %v5150_v55, 16  ;;  %v5181_v30 = vld [vmem:[#allocation3 + $0x14] sm:$0x1] }
 0x17b   : > { %v1919_v57 = vsel %vm4549_vm6, %v1857_v46, %v1918_v20  ;;  %v1922_v12 = vsel %vm4519_vm4, %v1858_v50, %v1921_v49  ;;  %v1841_v0 = vor.u32 %v1839_v48, %v1838_v61  ;;  %v1842_v19 = vrot.slane %v1838_v61, 4  ;;  %v5190_v16 = vld [vmem:[#allocation3 + $0x24] sm:$0x1] }
 0x17c   : > { %v1995_v14 = vrot.slane %v5724_v38, 5  ;;  %1920 = vst [vmem:[#allocation3 + $0x40] sm:$0xf] %v1919_v57  ;;  %1923 = vst [vmem:[#allocation3 + $0x44] sm:$0x1] %v1922_v12  ;;  %v1981_v52 = vrot.slane %v1979_v39, 5 }
 0x17d   : > { %v1991_v44 = vrot.slane %v1990_v56, 4  ;;  %v2429_v5 = vrot.slane %v2427_v59, 4  ;;  %v2430_v60 = vshll.u32 %v5150_v55, 16  ;;  %v1907_v51 = vsel %vm4549_vm6, %v1841_v0, %v1906_v47  ;;  %v1931_v26 = vld [vmem:[#allocation3 + $0x38] sm:$0xf] }
 0x17e   : > { %v1910_v24 = vsel %vm4519_vm4, %v1842_v19, %v1909_v54  ;;  %v2436_v20 = vshll.u32 %v5162_v63, 16  ;;  %v2441_v48 = vshrl.u32 %v5169_v18, 16  ;;  %1908 = vst [vmem:[#allocation3 + $0x30] sm:$0xf] %v1907_v51  ;;  %v1982_v21 = vsel %vm4605_vm10, %v1977_v6, %v1981_v52 }
 0x17f   : > { %1911 = vst [vmem:[#allocation3 + $0x34] sm:$0x1] %v1910_v24  ;;  %v1996_v13 = vsel %vm4605_vm10, %v1991_v44, %v1995_v14  ;;  %v2432_v28 = vrot.slane %v2430_v60, 5  ;;  %v2444_v49 = vshll.u32 %v5169_v18, 16  ;;  %v2040_v7 = vshrl.u32 %v1931_v26, 16 }
 0x180   : > { %v2043_v47 = vshll.u32 %v1931_v26, 16  ;;  %v3842_v54 = vcombine.low %v1982_v21, %v1996_v13  ;;  %v2438_v9 = vrot.slane %v2436_v20, 5  ;;  %v1929_v53 = vld [vmem:[#allocation3 + $0x28] sm:$0xf]  ;;  %v2443_v50 = vrot.slane %v2441_v48, 4 }
 0x181   : > { %v2433_v46 = vor.u32 %v2432_v28, %v2429_v5  ;;  %v2446_v61 = vrot.slane %v2444_v49, 5  ;;  %v2450_v39 = vshll.u32 %v5181_v30, 16  ;;  %v2012_v56 = vshrl.u32 %v1929_v53, 16  ;;  %v5197_v59 = vld [vmem:[#allocation3 + $0x2c] sm:$0x1] }
 0x182   : > { %v2015_v6 = vshll.u32 %v1929_v53, 16  ;;  %v3851_v38 = vcombine.low %v5126_v58, %v1929_v53  ;;  %v5194_v14 = vrot.slane %v2040_v7, 4  ;;  %4114 = vmatmul.mubr.msk.bf16.vlgmr.msra.gmra.mxu0 %vm887_vm9, %v3842_v54  ;;  %v5199_v57 = vrot.slane %v2043_v47, 5  ;;  %v5211_v24 = vld [vmem:[#allocation3 + $0x1c] sm:$0x1] }
 0x183   : > { %4132 = vmatpush3.bf16.msra.mxu0 %v4936_v15  ;;  %v2434_v12 = vrot.slane %v2433_v46, 4  ;;  %v2447_v0 = vor.u32 %v2446_v61, %v2443_v50  ;;  %v2452_v19 = vrot.slane %v2450_v39, 5  ;;  %v2014_v52 = vrot.slane %v2012_v56, 4  ;;  %v5218_v54 = vld [vmem:[#allocation3 + $0x20] sm:$0xf] }
 0x184   : > { %v2017_v44 = vrot.slane %v2015_v6, 5  ;;  %4127 = vmatprep.mubr.msk.bf16.mxu1 %vm887_vm9, %v3851_v38  ;;  %v2004_v58 = vor.u32 %v5138_v42, %v5135_v33  ;;  %v2007_v5 = vshll.u32 %v5190_v16, 16  ;;  %4221 = vmatprep.subr.msk.bf16.mxu0 %vm900_vm0, %v4956_v31  ;;  %v2021_v15 = vshll.u32 %v5197_v59, 16 }
 0x185   : > { %v2439_v60 = vsel %vm4605_vm10, %v2434_v12, %v2438_v9  ;;  %v2448_v51 = vrot.slane %v2447_v0, 4  ;;  %v5725_v20 = vshrl.u32 %v5106_v40, 16  ;;  %v1930_v21 = vld [vmem:[#allocation3 + $0x30] sm:$0xf]  ;;  %v2458_v42 = vshll.u32 %v5106_v40, 16 }
 0x186   : > { %v2005_v13 = vrot.slane %v2004_v58, 4  ;;  %v2009_v28 = vrot.slane %v2007_v5, 5  ;;  %v2018_v33 = vor.u32 %v2017_v44, %v2014_v52  ;;  %v2026_v49 = vshrl.u32 %v1930_v21, 16  ;;  %v5220_v9 = vld [vmem:[#allocation3 + $0x24] sm:$0x1] }
 0x187   : > { %v2457_v48 = vrot.slane %v5725_v20, 4  ;;  %v2029_v7 = vshll.u32 %v1930_v21, 16  ;;  %v3852_v31 = vcombine.low %v1930_v21, %v1931_v26  ;;  %v2453_v47 = vsel %vm4605_vm10, %v2448_v51, %v2452_v19  ;;  %v5226_v38 = vld [vmem:[#allocation3 + $0x34] sm:$0x1]  ;;  %v5234_v44 = vld [vmem:[#allocation3 + $0x3c] sm:$0x1] }
 0x188   : > { %v3876_v53 = vcombine.low %v2439_v60, %v2453_v47  ;;  %v2010_v46 = vsel %vm4605_vm10, %v2005_v13, %v2009_v28  ;;  %v2019_v50 = vrot.slane %v2018_v33, 4  ;;  %v2023_v61 = vrot.slane %v2021_v15, 5  ;;  %v5236_v15 = vld [vmem:[#allocation3 + $0x28] sm:$0xf]  ;;  %v5239_v33 = vld [vmem:[#allocation3 + $0x2c] sm:$0x1] }
 0x189   : > { %v2028_v39 = vrot.slane %v2026_v49, 4  ;;  %v2031_v56 = vrot.slane %v2029_v7, 5  ;;  %4128 = vmatmul.mubr.msk.bf16.gmra.mxu1 %vm887_vm9, %v3852_v31  ;;  %v2460_v6 = vrot.slane %v2458_v42, 5  ;;  %v2464_v26 = vshll.u32 %v5211_v24, 16 }
 0x18a   : > { %4143 = vmatprep.mubr.msk.bf16.mxu1 %vm887_vm9, %v3876_v53  ;;  %v2024_v12 = vsel %vm4605_vm10, %v2019_v50, %v2023_v61  ;;  %v2469_v0 = vshrl.u32 %v5218_v54, 16  ;;  %v2472_v19 = vshll.u32 %v5218_v54, 16  ;;  %v2478_v52 = vshll.u32 %v5220_v9, 16  ;;  %v5245_v53 = vld [vmem:[#allocation3 + $0x30] sm:$0xf] }
 0x18b   : > { %v3843_v58 = vcombine.low %v2010_v46, %v2024_v12  ;;  %v2461_v5 = vor.u32 %v2460_v6, %v2457_v48  ;;  %v2466_v60 = vrot.slane %v2464_v26, 5  ;;  %v2032_v51 = vor.u32 %v2031_v56, %v2028_v39  ;;  %v5251_v6 = vld [vmem:[#allocation3 + $0x34] sm:$0x1] }
 0x18c   : > { %v2471_v20 = vrot.slane %v2469_v0, 4  ;;  %v2474_v21 = vrot.slane %v2472_v19, 5  ;;  %v2480_v13 = vrot.slane %v2478_v52, 5  ;;  %v2035_v28 = vshll.u32 %v5226_v38, 16  ;;  %v2248_v19 = vld [vmem:[#allocation3 + $0x8] sm:$0xe] }
 0x18d   : > { %4117 = vmatprep.mubr.msk.bf16.mxu0 %vm887_vm9, %v3843_v58  ;;  %v2462_v42 = vrot.slane %v2461_v5, 4  ;;  %v2033_v49 = vrot.slane %v2032_v51, 4  ;;  %v2046_v7 = vor.u32 %v5199_v57, %v5194_v14  ;;  %v2049_v48 = vshll.u32 %v5234_v44, 16  ;;  %v5260_v51 = vld [vmem:[#allocation3 + $0x38] sm:$0xf] }
 0x18e   : > { %v2475_v31 = vor.u32 %v2474_v21, %v2471_v20  ;;  %v2037_v47 = vrot.slane %v2035_v28, 5  ;;  %v2483_v46 = vshrl.u32 %v5236_v15, 16  ;;  %v2486_v50 = vshll.u32 %v5236_v15, 16 }
 0x18f   : > { %v2467_v61 = vsel %vm4605_vm10, %v2462_v42, %v2466_v60  ;;  %v2047_v39 = vrot.slane %v2046_v7, 4  ;;  %v2051_v56 = vrot.slane %v2049_v48, 5  ;;  %v2492_v26 = vshll.u32 %v5239_v33, 16  ;;  %v5267_v7 = vld [vmem:[#allocation3 + $0x3c] sm:$0x1] }
 0x190   : > { %v2476_v14 = vrot.slane %v2475_v31, 4  ;;  %v2038_v57 = vsel %vm4605_vm10, %v2033_v49, %v2037_v47  ;;  %v2485_v12 = vrot.slane %v2483_v46, 4  ;;  %v2488_v0 = vrot.slane %v2486_v50, 5  ;;  %v5265_v49 = vld [vmem:[#allocation3 + $0x40] sm:$0xf] }
 0x191   : > { %v2052_v52 = vsel %vm4605_vm10, %v2047_v39, %v2051_v56  ;;  %v2494_v58 = vrot.slane %v2492_v26, 5  ;;  %v2497_v5 = vshrl.u32 %v5245_v53, 16  ;;  %v2500_v60 = vshll.u32 %v5245_v53, 16  ;;  %v2249_v26 = vld [vmem:[#allocation3 + $0x10] sm:$0xe] }
 0x192   : > { %v2481_v20 = vsel %vm4605_vm10, %v2476_v14, %v2480_v13  ;;  %v3844_v21 = vcombine.low %v2038_v57, %v2052_v52  ;;  %v2489_v28 = vor.u32 %v2488_v0, %v2485_v12  ;;  %v2506_v42 = vshll.u32 %v5251_v6, 16  ;;  %v5273_v57 = vld [vmem:[#allocation3 + $0x44] sm:$0x1] }
 0x193   : > { %v3877_v48 = vcombine.low %v2467_v61, %v2481_v20  ;;  %v2499_v31 = vrot.slane %v2497_v5, 4  ;;  %v2502_v47 = vrot.slane %v2500_v60, 5  ;;  %v3858_v46 = vrot.slane %v2248_v19, 9  ;;  %v2250_v60 = vld [vmem:[#allocation3 + $0x18] sm:$0xe] }
 0x194   : > { %4118 = vmatmul.mubr.msk.bf16.gmra.mxu0 %vm887_vm9, %v3844_v21  ;;  %v2490_v50 = vrot.slane %v2489_v28, 4  ;;  %v2508_v39 = vrot.slane %v2506_v42, 5  ;;  %v2280_v56 = vrot.slane %v5115_v10, 5  ;;  %v2511_v13 = vshrl.u32 %v5260_v51, 16 }
 0x195   : > { %4144 = vmatmul.mubr.msk.bf16.vlgmr.msra.gmra.mxu1 %vm887_vm9, %v3877_v48  ;;  %v2503_v14 = vor.u32 %v2502_v47, %v2499_v31  ;;  %v2514_v12 = vshll.u32 %v5260_v51, 16  ;;  %v2520_v61 = vshll.u32 %v5267_v7, 16  ;;  %v2525_v0 = vshrl.u32 %v5265_v49, 16 }
 0x196   : > { %v2495_v19 = vsel %vm4605_vm10, %v2490_v50, %v2494_v58  ;;  %v2281_v10 = vsel %vm4941_vm13, %v3858_v46, %v2280_v56  ;;  %v2513_v52 = vrot.slane %v2511_v13, 4  ;;  %v2528_v5 = vshll.u32 %v5265_v49, 16  ;;  %4162 = vmatpush3.bf16.msra.mxu1 %v4982_v35  ;;  %v2732_v46 = vld [vmem:[#allocation3 + $0x8] sm:$0xe]  ;;  %v2733_v13 = vld [vmem:[#allocation3 + $0x10] sm:$0xe] }
 0x197   : > { %v2504_v20 = vrot.slane %v2503_v14, 4  ;;  %v3866_v21 = vcombine.low %v4951_v45, %v2281_v10  ;;  %v2516_v28 = vrot.slane %v2514_v12, 5  ;;  %v2522_v42 = vrot.slane %v2520_v61, 5  ;;  %4224 = vmatprep.subr.msk.bf16.mxu1 %vm900_vm0, %v4971_v2 }
 0x198   : > { %v2527_v48 = vrot.slane %v2525_v0, 4  ;;  %v2530_v31 = vrot.slane %v2528_v5, 5  ;;  %v2534_v58 = vshll.u32 %v5273_v57, 16  ;;  %v3859_v47 = vrot.slane %v2249_v26, 9  ;;  %v2251_v0 = vld [vmem:[#allocation3 + $0x20] sm:$0xe] }
 0x199   : > { %v2509_v50 = vsel %vm4605_vm10, %v2504_v20, %v2508_v39  ;;  %4133 = vmatprep.mubr.msk.bf16.mxu0 %vm887_vm9, %v3866_v21  ;;  %v2517_v35 = vor.u32 %v2516_v28, %v2513_v52  ;;  %v2284_v56 = vrot.slane %v5146_v11, 5  ;;  %v3860_v45 = vrot.slane %v2250_v60, 9  ;;  %v2252_v20 = vld [vmem:[#allocation3 + $0x28] sm:$0xe]  ;;  %v2734_v21 = vld [vmem:[#allocation3 + $0x18] sm:$0xe] }
 0x19a   : > { %v3878_v14 = vcombine.low %v2495_v19, %v2509_v50  ;;  %v2531_v12 = vor.u32 %v2530_v31, %v2527_v48  ;;  %v2536_v61 = vrot.slane %v2534_v58, 5  ;;  %v2288_v2 = vrot.slane %v5104_v1, 5 }
 0x19b   : > { %v2518_v10 = vrot.slane %v2517_v35, 4  ;;  %v2285_v26 = vsel %vm4941_vm13, %v3859_v47, %v2284_v56  ;;  %v3892_v5 = vrot.slane %v2732_v46, 9  ;;  %v2758_v39 = vrot.slane %v5162_v63, 5  ;;  %v2735_v63 = vld [vmem:[#allocation3 + $0x20] sm:$0xe] }
 0x19c   : > { %4147 = vmatprep.mubr.msk.bf16.mxu1 %vm887_vm9, %v3878_v14  ;;  %v2532_v52 = vrot.slane %v2531_v12, 4  ;;  %v2289_v11 = vsel %vm4941_vm13, %v3860_v45, %v2288_v2  ;;  %v3893_v19 = vrot.slane %v2733_v13, 9  ;;  %v2762_v60 = vrot.slane %v5181_v30, 5  ;;  %v2253_v30 = vld [vmem:[#allocation3 + $0x30] sm:$0xe] }
 0x19d   : > { %v2523_v1 = vsel %vm4605_vm10, %v2518_v10, %v2522_v42  ;;  %v3867_v28 = vcombine.low %v2285_v26, %v2289_v11  ;;  %v2759_v48 = vsel %vm4941_vm13, %v3892_v5, %v2758_v39  ;;  %v3861_v31 = vrot.slane %v2251_v0, 9  ;;  %v2254_v35 = vld [vmem:[#allocation3 + $0x38] sm:$0xe]  ;;  %v2736_v2 = vld [vmem:[#allocation3 + $0x28] sm:$0xe] }
 0x19e   : > { %v2537_v58 = vsel %vm4605_vm10, %v2532_v52, %v2536_v61  ;;  %v2763_v47 = vsel %vm4941_vm13, %v3893_v19, %v2762_v60  ;;  %v2292_v46 = vrot.slane %v5190_v16, 5  ;;  %v3862_v50 = vrot.slane %v2252_v20, 9  ;;  %v2737_v5 = vld [vmem:[#allocation3 + $0x30] sm:$0xe]  ;;  %v3429_v20 = vld [vmem:[#allocation2 + $0x70] sm:$0xf] }
 0x19f   : > { %v3879_v56 = vcombine.low %v2523_v1, %v2537_v58  ;;  %4134 = vmatmul.mubr.msk.bf16.vlgmr.msra.gmra.mxu0 %vm887_vm9, %v3867_v28  ;;  %v3901_v42 = vcombine.low %v2759_v48, %v2763_v47  ;;  %v2296_v45 = vrot.slane %v5197_v59, 5  ;;  %v3894_v13 = vrot.slane %v2734_v21, 9  ;;  %v2739_v19 = vld [vmem:[#allocation3 + $0x40] sm:$0xe]  ;;  %v2738_v48 = vld [vmem:[#allocation3 + $0x38] sm:$0xe] }
 0x1a0   : > { %4152 = vmatpush3.bf16.msra.mxu0 %v4978_v25  ;;  %v2293_v14 = vsel %vm4941_vm13, %v3861_v31, %v2292_v46  ;;  %v2766_v12 = vrot.slane %v5211_v24, 5  ;;  %v3895_v61 = vrot.slane %v2735_v63, 9  ;;  %v2770_v16 = vrot.slane %v5220_v9, 5  ;;  %v5341_v31 = vld [vmem:[#allocation3 + $0x10] sm:$0xf] }
 0x1a1   : > { %4148 = vmatmul.mubr.msk.bf16.gmra.mxu1 %vm887_vm9, %v3879_v56  ;;  %v2297_v0 = vsel %vm4941_vm13, %v3862_v50, %v2296_v45  ;;  %v3863_v10 = vrot.slane %v2253_v30, 9  ;;  %v2300_v59 = vrot.slane %v5226_v38, 5  ;;  %v3864_v26 = vrot.slane %v2254_v35, 9  ;;  %4223 = vmatprep.subr.msk.bf16.mxu0 %vm900_vm0, %v4966_v22  ;;  %v5343_v58 = vld [vmem:[#allocation3 + $0x18] sm:$0xf] }
 0x1a2   : > { %4163 = vmatprep.mubr.msk.bf16.mxu1 %vm887_vm9, %v3901_v42  ;;  %v3868_v25 = vcombine.low %v2293_v14, %v2297_v0  ;;  %v2771_v24 = vsel %vm4941_vm13, %v3895_v61, %v2770_v16  ;;  %v2304_v9 = vrot.slane %v5234_v44, 5  ;;  %v3484_v39 = vor.u32 %v5091_v37, %v5062_v34 }
 0x1a3   : > { %v2301_v38 = vsel %vm4941_vm13, %v3863_v10, %v2300_v59  ;;  %v3896_v52 = vrot.slane %v2736_v2, 9  ;;  %v2774_v11 = vrot.slane %v5239_v33, 5  ;;  %v5726_v22 = vshll.u32 %v5064_v8, 16  ;;  %v5368_v2 = vld [vmem:[#allocation3 + $0x30] sm:$0xf] }
 0x1a4   : > { %4137 = vmatprep.mubr.msk.bf16.mxu0 %vm887_vm9, %v3868_v25  ;;  %v2767_v44 = vsel %vm4941_vm13, %v3894_v13, %v2766_v12  ;;  %v2305_v21 = vsel %vm4941_vm13, %v3864_v26, %v2304_v9  ;;  %v3897_v1 = vrot.slane %v2737_v5, 9  ;;  %v2778_v28 = vrot.slane %v5251_v6, 5  ;;  %v5355_v13 = vld [vmem:[#allocation3 + $0x20] sm:$0xf]  ;;  %v5361_v12 = vld [vmem:[#allocation3 + $0x28] sm:$0xf] }
 0x1a5   : > { %v5333_v60 = vrot.slane %v5726_v22, 5  ;;  %v3902_v33 = vcombine.low %v2767_v44, %v2771_v24  ;;  %v3869_v63 = vcombine.low %v2301_v38, %v2305_v21  ;;  %v3506_v8 = vshrl.u32 %v3429_v20, 16  ;;  %v5378_v25 = vld [vmem:[#allocation3 + $0x38] sm:$0xf] }
 0x1a6   : > { %v3509_v47 = vshll.u32 %v3429_v20, 16  ;;  %v2779_v46 = vsel %vm4941_vm13, %v3897_v1, %v2778_v28  ;;  %v3884_v50 = vcombine.low %v5150_v55, %v5169_v18  ;;  %v3899_v30 = vrot.slane %v2739_v19, 9  ;;  %v4293_v20 = vld [vmem:[%s5707_s7] sm:$0xf]  ;;  %v5392_v19 = vld [vmem:[#allocation3 + $0x14] sm:$0x1] }
 0x1a7   : > { %v2786_v35 = vrot.slane %v5273_v57, 5  ;;  %4138 = vmatmul.mubr.msk.bf16.gmra.mxu0 %vm887_vm9, %v3869_v63  ;;  %v2775_v6 = vsel %vm4941_vm13, %v3896_v52, %v2774_v11  ;;  %v3898_v56 = vrot.slane %v2738_v48, 9  ;;  %v2918_v42 = vshrl.u32 %v5341_v31, 16  ;;  %v5398_v28 = vld [vmem:[#allocation3 + $0x1c] sm:$0x1] }
 0x1a8   : > { %v2921_v45 = vshll.u32 %v5341_v31, 16  ;;  %v3903_v14 = vcombine.low %v2775_v6, %v2779_v46  ;;  %4153 = vmatprep.mubr.msk.bf16.mxu0 %vm887_vm9, %v3884_v50  ;;  %v2782_v55 = vrot.slane %v5267_v7, 5  ;;  %v2932_v18 = vshrl.u32 %v5343_v58, 16 }
 0x1a9   : > { %v2935_v57 = vshll.u32 %v5343_v58, 16  ;;  %4164 = vmatmul.mubr.msk.bf16.vlgmr.msra.gmra.mxu1 %vm887_vm9, %v3902_v33  ;;  %v2787_v61 = vsel %vm4941_vm13, %v3899_v30, %v2786_v35  ;;  %v3885_v16 = vcombine.low %v5106_v40, %v5218_v54  ;;  %v5370_v0 = vrot.slane %v3506_v8, 4 }
 0x1aa   : > { %v5372_v10 = vrot.slane %v3509_v47, 5  ;;  %4167 = vmatprep.mubr.msk.bf16.mxu1 %vm887_vm9, %v3903_v14  ;;  %v2920_v7 = vrot.slane %v2918_v42, 4  ;;  %v2923_v59 = vrot.slane %v2921_v45, 5  ;;  %4182 = vmatpush3.bf16.msra.mxu1 %v5004_v41  ;;  %v2946_v26 = vshrl.u32 %v5355_v13, 16 }
 0x1ab   : > { %v2949_v5 = vshll.u32 %v5355_v13, 16  ;;  %v2934_v24 = vrot.slane %v2932_v18, 4  ;;  %v2937_v40 = vrot.slane %v2935_v57, 5  ;;  %v2960_v54 = vshrl.u32 %v5361_v12, 16  ;;  %4226 = vmatprep.subr.msk.bf16.mxu1 %vm900_vm0, %v4293_v20  ;;  %v5419_v57 = vld [vmem:[#allocation3 + $0x34] sm:$0x1] }
 0x1ac   : > { %v2963_v9 = vshll.u32 %v5361_v12, 16  ;;  %v2783_v41 = vsel %vm4941_vm13, %v3898_v56, %v2782_v55  ;;  %v3919_v38 = vcombine.low %v5341_v31, %v5343_v58  ;;  %v2974_v52 = vshrl.u32 %v5368_v2, 16  ;;  %v5400_v58 = vld [vmem:[#allocation3 + $0x40] sm:$0xf]  ;;  %v4294_v55 = vld [vmem:[%s5704_s4 + $0x20] sm:$0xf] }
 0x1ad   : > { %v2977_v11 = vshll.u32 %v5368_v2, 16  ;;  %v3904_v22 = vcombine.low %v2783_v41, %v2787_v61  ;;  %v3886_v44 = vcombine.low %v5236_v15, %v5245_v53  ;;  %v2988_v21 = vshrl.u32 %v5378_v25, 16  ;;  %v5404_v15 = vld [vmem:[#allocation2 + $0x6c] sm:$0x1] }
 0x1ae   : > { %v2991_v1 = vshll.u32 %v5378_v25, 16  ;;  %v2948_v48 = vrot.slane %v2946_v26, 4  ;;  %v2951_v33 = vrot.slane %v2949_v5, 5  ;;  %v2962_v63 = vrot.slane %v2960_v54, 4  ;;  %v5431_v5 = vld [vmem:[#allocation3 + $0x24] sm:$0x1] }
 0x1af   : > { %v2924_v31 = vor.u32 %v2923_v59, %v2920_v7  ;;  %4154 = vmatmul.mubr.msk.bf16.vlgmr.msra.gmra.mxu0 %vm887_vm9, %v3885_v16  ;;  %v2965_v8 = vrot.slane %v2963_v9, 5  ;;  %v2976_v47 = vrot.slane %v2974_v52, 4  ;;  %v2927_v46 = vshll.u32 %v5392_v19, 16  ;;  %v5438_v54 = vld [vmem:[#allocation3 + $0x3c] sm:$0x1] }
 0x1b0   : > { %v2938_v50 = vor.u32 %v2937_v40, %v2934_v24  ;;  %4172 = vmatpush3.bf16.msra.mxu0 %v5000_v23  ;;  %4157 = vmatprep.mubr.msk.bf16.mxu0 %vm887_vm9, %v3886_v44  ;;  %v2979_v53 = vrot.slane %v2977_v11, 5  ;;  %v2990_v30 = vrot.slane %v2988_v21, 4  ;;  %v2941_v6 = vshll.u32 %v5398_v28, 16  ;;  %v5415_v23 = vld [vmem:[#allocation3 + $0x2c] sm:$0x1] }
 0x1b1   : > { %v2925_v35 = vrot.slane %v2924_v31, 4  ;;  %4168 = vmatmul.mubr.msk.bf16.gmra.mxu1 %vm887_vm9, %v3904_v22  ;;  %v2993_v56 = vrot.slane %v2991_v1, 5  ;;  %v2929_v42 = vrot.slane %v2927_v46, 5  ;;  %v3002_v14 = vshrl.u32 %v5400_v58, 16  ;;  %4225 = vmatprep.subr.msk.bf16.mxu0 %vm900_vm0, %v4294_v55  ;;  %v3431_v52 = vld [vmem:[#allocation2 + $0x78] sm:$0xf] }
 0x1b2   : > { %v2939_v45 = vrot.slane %v2938_v50, 4  ;;  %4183 = vmatprep.mubr.msk.bf16.mxu1 %vm887_vm9, %v3919_v38  ;;  %v3005_v18 = vshll.u32 %v5400_v58, 16  ;;  %v5424_v61 = vrot.slane %v3484_v39, 4  ;;  %v3498_v16 = vor.u32 %v5333_v60, %v5099_v29  ;;  %v3430_v60 = vld [vmem:[#allocation2 + $0x74] sm:$0x1] }
 0x1b3   : > { %v3501_v7 = vshll.u32 %v5404_v15, 16  ;;  %v2930_v59 = vsel %vm4605_vm10, %v2925_v35, %v2929_v42  ;;  %v2943_v26 = vrot.slane %v2941_v6, 5  ;;  %v2966_v24 = vor.u32 %v2965_v8, %v2962_v63  ;;  %v5452_v46 = vld [vmem:[#allocation3 + $0x44] sm:$0x1] }
 0x1b4   : > { %v3512_v40 = vor.u32 %v5372_v10, %v5370_v0  ;;  %v3887_v34 = vcombine.low %v5260_v51, %v5265_v49  ;;  %v2952_v37 = vor.u32 %v2951_v33, %v2948_v48  ;;  %v2969_v39 = vshll.u32 %v5415_v23, 16  ;;  %v3433_v49 = vld [vmem:[#allocation2 + $0x80] sm:$0xf] }
 0x1b5   : > { %v2980_v29 = vor.u32 %v2979_v53, %v2976_v47  ;;  %v2944_v9 = vsel %vm4605_vm10, %v2939_v45, %v2943_v26  ;;  %v3004_v20 = vrot.slane %v3002_v14, 4  ;;  %v2983_v41 = vshll.u32 %v5419_v57, 16  ;;  %v3223_v45 = vld [vmem:[#allocation3 + $0x10] sm:$0xe] }
 0x1b6   : > { %v2994_v38 = vor.u32 %v2993_v56, %v2990_v30  ;;  %v3911_v11 = vcombine.low %v2930_v59, %v2944_v9  ;;  %v3007_v0 = vrot.slane %v3005_v18, 5  ;;  %v2955_v10 = vshll.u32 %v5431_v5, 16  ;;  %v3432_v59 = vld [vmem:[#allocation2 + $0x7c] sm:$0x1] }
 0x1b7   : > { %v2967_v51 = vrot.slane %v2966_v24, 4  ;;  %v3920_v22 = vcombine.low %v5355_v13, %v5361_v12  ;;  %4158 = vmatmul.mubr.msk.bf16.gmra.mxu0 %vm887_vm9, %v3887_v34  ;;  %v2981_v44 = vrot.slane %v2980_v29, 4  ;;  %v2997_v21 = vshll.u32 %v5438_v54, 16  ;;  %v4295_v29 = vld [vmem:[#allocation3 + $0x48] sm:$0xf] }
 0x1b8   : > { %v3515_v1 = vshll.u32 %v3430_v60, 16  ;;  %v3921_v48 = vcombine.low %v5368_v2, %v5378_v25  ;;  %4173 = vmatprep.mubr.msk.bf16.mxu0 %vm887_vm9, %v3911_v11  ;;  %v2953_v33 = vrot.slane %v2952_v37, 4  ;;  %v2971_v63 = vrot.slane %v2969_v39, 5  ;;  %v3224_v39 = vld [vmem:[#allocation3 + $0x18] sm:$0xe] }
 0x1b9   : > { %v3520_v31 = vshrl.u32 %v3431_v52, 16  ;;  %4184 = vmatmul.mubr.msk.bf16.vlgmr.msra.gmra.mxu1 %vm887_vm9, %v3920_v22  ;;  %v2985_v8 = vrot.slane %v2983_v41, 5  ;;  %v2995_v47 = vrot.slane %v2994_v38, 4  ;;  %v3523_v13 = vshll.u32 %v3431_v52, 16  ;;  %v3434_v41 = vld [vmem:[#allocation2 + $0x84] sm:$0x1] }
 0x1ba   : > { %v3534_v12 = vshrl.u32 %v3433_v49, 16  ;;  %4187 = vmatprep.mubr.msk.bf16.mxu1 %vm887_vm9, %v3921_v48  ;;  %v2957_v50 = vrot.slane %v2955_v10, 5  ;;  %v2972_v15 = vsel %vm4605_vm10, %v2967_v51, %v2971_v63  ;;  %4202 = vmatpush3.bf16.msra.mxu1 %v5017_v3  ;;  %v3008_v2 = vor.u32 %v3007_v0, %v3004_v20  ;;  %v5727_v52 = vld [vmem:[#allocation7_spill] sm:$0xff]  ;;  %v3226_v10 = vld [vmem:[#allocation3 + $0x28] sm:$0xe] }
 0x1bb   : > { %v3537_v25 = vshll.u32 %v3433_v49, 16  ;;  %v2986_v53 = vsel %vm4605_vm10, %v2981_v44, %v2985_v8  ;;  %v2999_v30 = vrot.slane %v2997_v21, 5  ;;  %v3499_v35 = vrot.slane %v3498_v16, 4  ;;  %v3227_v44 = vld [vmem:[#allocation3 + $0x30] sm:$0xe] }
 0x1bc   : > { %v3503_v6 = vrot.slane %v3501_v7, 5  ;;  %v2958_v56 = vsel %vm4605_vm10, %v2953_v33, %v2957_v50  ;;  %v3011_v42 = vshll.u32 %v5452_v46, 16  ;;  %v3513_v14 = vrot.slane %v3512_v40, 4  ;;  %v3225_v63 = vld [vmem:[#allocation3 + $0x20] sm:$0xe] }
 0x1bd   : > { %v3517_v55 = vrot.slane %v3515_v1, 5  ;;  %v3912_v18 = vcombine.low %v2958_v56, %v2972_v15  ;;  %v3000_v3 = vsel %vm4605_vm10, %v2995_v47, %v2999_v30  ;;  %v3522_v26 = vrot.slane %v3520_v31, 4 }
 0x1be   : > { %v3525_v24 = vrot.slane %v3523_v13, 5  ;;  %v3913_v34 = vcombine.low %v2986_v53, %v3000_v3  ;;  %v3009_v37 = vrot.slane %v3008_v2, 4  ;;  %v3536_v16 = vrot.slane %v3534_v12, 4  ;;  %v3228_v13 = vld [vmem:[#allocation3 + $0x38] sm:$0xe] }
 0x1bf   : > { %v3539_v7 = vrot.slane %v3537_v25, 5  ;;  %v3922_v60 = vcombine.low %v5400_v58, %v4295_v29  ;;  %4174 = vmatmul.mubr.msk.bf16.vlgmr.msra.gmra.mxu0 %vm887_vm9, %v3912_v18  ;;  %v3028_v40 = vsel %vm4605_vm10, %v5019_v17, %v5021_v4  ;;  %v3927_v9 = vrot.slane %v3223_v45, 9  ;;  %v3229_v45 = vld [vmem:[#allocation3 + $0x40] sm:$0xe] }
 0x1c0   : > { %v3249_v20 = vrot.slane %v5392_v19, 5  ;;  %4192 = vmatpush3.bf16.msra.mxu0 %v5014_v43  ;;  %4177 = vmatprep.mubr.msk.bf16.mxu0 %vm887_vm9, %v3913_v34  ;;  %v3013_v38 = vrot.slane %v3011_v42, 5  ;;  %v3476_v58 = vsel %vm4605_vm10, %v5084_v62, %v5060_v32  ;;  %v3490_v11 = vsel %vm4605_vm10, %v5424_v61, %v5727_v52  ;;  %v5728_v62 = vld [vmem:[#allocation8_spill] sm:$0xff]  ;;  %v3230_v42 = vld [vmem:[#allocation3 + $0x48] sm:$0xe] }
 0x1c1   : > { %v3529_v17 = vshll.u32 %v3432_v59, 16  ;;  %4188 = vmatmul.mubr.msk.bf16.gmra.mxu1 %vm887_vm9, %v3922_v60  ;;  %v3928_v4 = vrot.slane %v3224_v39, 9  ;;  %v3253_v19 = vrot.slane %v5398_v28, 5  ;;  %v3504_v43 = vsel %vm4605_vm10, %v3499_v35, %v3503_v6 }
 0x1c2   : > { %v3518_v0 = vsel %vm4605_vm10, %v3513_v14, %v3517_v55  ;;  %v3014_v32 = vsel %vm4605_vm10, %v3009_v37, %v3013_v38  ;;  %4203 = vmatprep.mubr.msk.bf16.mxu1 %vm887_vm9, %v5728_v62  ;;  %v3526_v61 = vor.u32 %v3525_v24, %v3522_v26  ;;  %v3540_v51 = vor.u32 %v3539_v7, %v3536_v16 }
 0x1c3   : > { %v3543_v49 = vshll.u32 %v3434_v41, 16  ;;  %v3250_v22 = vsel %vm4941_vm13, %v3927_v9, %v3249_v20  ;;  %v3947_v28 = vcombine.low %v3476_v58, %v3490_v11  ;;  %v3948_v21 = vcombine.low %v3504_v43, %v3518_v0 }
 0x1c4   : > { %v3531_v1 = vrot.slane %v3529_v17, 5  ;;  %v3914_v48 = vcombine.low %v3014_v32, %v3028_v40  ;;  %v3254_v33 = vsel %vm4941_vm13, %v3928_v4, %v3253_v19  ;;  %v3930_v31 = vrot.slane %v3226_v10, 9 }
 0x1c5   : > { %v3261_v8 = vrot.slane %v5415_v23, 5  ;;  %v3936_v47 = vcombine.low %v3250_v22, %v3254_v33  ;;  %v3527_v12 = vrot.slane %v3526_v61, 4  ;;  %v3541_v50 = vrot.slane %v3540_v51, 4 }
 0x1c6   : > { %v3545_v15 = vrot.slane %v3543_v49, 5  ;;  %v3931_v2 = vrot.slane %v3227_v44, 9  ;;  %v3265_v25 = vrot.slane %v5419_v57, 5  ;;  %v3929_v53 = vrot.slane %v3225_v63, 9 }
 0x1c7   : > { %4178 = vmatmul.mubr.msk.bf16.gmra.mxu0 %vm887_vm9, %v3914_v48  ;;  %v3257_v30 = vrot.slane %v5431_v5, 5  ;;  %v3932_v35 = vrot.slane %v3228_v13, 9  ;;  %v3269_v23 = vrot.slane %v5438_v54, 5  ;;  %v3262_v6 = vsel %vm4941_vm13, %v3930_v31, %v3261_v8 }
 0x1c8   : > { %4193 = vmatprep.mubr.msk.bf16.mxu0 %vm887_vm9, %v3936_v47  ;;  %v3532_v56 = vsel %vm4605_vm10, %v3527_v12, %v3531_v1  ;;  %v3546_v57 = vsel %vm4605_vm10, %v3541_v50, %v3545_v15  ;;  %v3266_v5 = vsel %vm4941_vm13, %v3931_v2, %v3265_v25  ;;  %v3934_v3 = vrot.slane %v3230_v42, 9 }
 0x1c9   : > { %4204 = vmatmul.mubr.msk.bf16.vlgmr.msra.gmra.mxu1 %vm887_vm9, %v3947_v28  ;;  %v3258_v14 = vsel %vm4941_vm13, %v3929_v53, %v3257_v30  ;;  %v3270_v55 = vsel %vm4941_vm13, %v3932_v35, %v3269_v23  ;;  %v3949_v18 = vcombine.low %v3532_v56, %v3546_v57  ;;  %v3933_v26 = vrot.slane %v3229_v45, 9 }
 0x1ca   : > { %4207 = vmatprep.mubr.msk.bf16.mxu1 %vm887_vm9, %v3948_v21  ;;  %v3937_v54 = vcombine.low %v3258_v14, %v3262_v6  ;;  %v3938_v59 = vcombine.low %v3266_v5, %v3270_v55  ;;  %v3273_v24 = vrot.slane %v5452_v46, 5  ;;  %v3277_v34 = vrot.slane %v4296_v36, 5 }
 0x1cc   : > { %v3274_v37 = vsel %vm4941_vm13, %v3933_v26, %v3273_v24  ;;  %v3278_v39 = vsel %vm4941_vm13, %v3934_v3, %v3277_v34 }
 0x1cd   : > { %v3939_v16 = vcombine.low %v3274_v37, %v3278_v39 }
 0x1cf   : > { %4194 = vmatmul.mubr.msk.bf16.vlgmr.msra.gmra.mxu0 %vm887_vm9, %v3937_v54 }
 0x1d0   : > { %4197 = vmatprep.mubr.msk.bf16.mxu0 %vm887_vm9, %v3938_v59 }
 0x1d1   : > { %4208 = vmatmul.mubr.msk.bf16.gmra.mxu1 %vm887_vm9, %v3949_v18 }
 0x1d7   : > { %4198 = vmatmul.mubr.msk.bf16.gmra.mxu0 %vm887_vm9, %v3939_v16 }
 0x233   : > { %v4125_v7 = vpop.f32.mrf.mxu1 }
 0x235   : > { %v2216_v29 = vpop.f32.mrf.mxu1 }
 0x237   : > { %v4126_v46 = vpop.f32.mrf.mxu1 }
 0x239   : > { %v2219_v40 = vpop.f32.mrf.mxu1 }
 0x242   : > { %v4115_v60 = vpop.f32.mrf.mxu0 }
 0x243   : > { %v2225_v37 = vadd.f32 %v4125_v7, %v4115_v60 }
 0x244   : > { %v2116_v9 = vpop.f32.mrf.mxu0 }
 0x245   : > { %v2217_v39 = vadd.f32 %v2216_v29, %v2116_v9 }
 0x246   : > { %v4116_v38 = vpop.f32.mrf.mxu0 }
 0x248   : > { %v2119_v52 = vpop.f32.mrf.mxu0 }
 0x249   : > { %v5525_v20 = vpop.f32.mrf.mxu1 }
 0x24b   : > { %v5527_v41 = vpop.f32.mrf.mxu1 }
 0x24d   : > { %v5529_v58 = vpop.f32.mrf.mxu1 }
 0x24f   : > { %v5531_v11 = vpop.f32.mrf.mxu1 }
 0x250   : > { %5729 = vst [vmem:[#allocation7_spill] sm:$0xff] %v5531_v11 }
 0x254   : > { %v4119_v27 = vpop.f32.mrf.mxu0 }
 0x255   : > { %v4145_v17 = vpop.f32.mrf.mxu1 }
 0x256   : > { %v2132_v4 = vpop.f32.mrf.mxu0 }
 0x257   : > { %v2601_v19 = vpop.f32.mrf.mxu1 }
 0x258   : > { %v4120_v43 = vpop.f32.mrf.mxu0 }
 0x259   : > { %v4146_v0 = vpop.f32.mrf.mxu1 }
 0x25a   : > { %v2135_v32 = vpop.f32.mrf.mxu0 }
 0x25b   : > { %v2604_v62 = vpop.f32.mrf.mxu1 }
 0x25f   : > { %v4135_v10 = vpop.f32.mrf.mxu0 }
 0x260   : > { %v2402_v7 = vadd.f32 %v4135_v10, %v2225_v37 }
 0x261   : > { %v4149_v61 = vpop.f32.mrf.mxu1  ;;  %v2369_v51 = vpop.f32.mrf.mxu0 }
 0x263   : > { %v2617_v49 = vpop.f32.mrf.mxu1  ;;  %v4136_v22 = vpop.f32.mrf.mxu0 }
 0x265   : > { %v4150_v28 = vpop.f32.mrf.mxu1  ;;  %v2372_v44 = vpop.f32.mrf.mxu0 }
 0x267   : > { %v2620_v21 = vpop.f32.mrf.mxu1  ;;  %v5533_v1 = vpop.f32.mrf.mxu0 }
 0x268   : > { %5730 = vst [vmem:[#allocation8_spill] sm:$0xff] %v5533_v1  ;;  %v2233_v1 = vadd.f32 %v5527_v41, %v2132_v4 }
 0x269   : > { %v4165_v48 = vpop.f32.mrf.mxu1  ;;  %v2385_v33 = vpop.f32.mrf.mxu0 }
 0x26b   : > { %v2851_v63 = vpop.f32.mrf.mxu1  ;;  %v5535_v31 = vpop.f32.mrf.mxu0 }
 0x26c   : > { %5731 = vst [vmem:[#allocation9_spill] sm:$0xff] %v5535_v31 }
 0x26d   : > { %v4166_v8 = vpop.f32.mrf.mxu1  ;;  %v2388_v47 = vpop.f32.mrf.mxu0 }
 0x26f   : > { %v2854_v13 = vpop.f32.mrf.mxu1  ;;  %v4155_v12 = vpop.f32.mrf.mxu0 }
 0x270   : > { %v2710_v16 = vadd.f32 %v4155_v12, %v4145_v17 }
 0x271   : > { %v4169_v50 = vpop.f32.mrf.mxu1  ;;  %v2701_v15 = vpop.f32.mrf.mxu0 }
 0x272   : > { %v2884_v17 = vadd.f32 %v4165_v48, %v2710_v16 }
 0x273   : > { %v2867_v2 = vpop.f32.mrf.mxu1  ;;  %v4156_v25 = vpop.f32.mrf.mxu0 }
 0x274   : > { %v2892_v12 = vadd.f32 %v2884_v17, %v2402_v7 }
 0x275   : > { %v5537_v53 = vpop.f32.mrf.mxu1  ;;  %v2704_v30 = vpop.f32.mrf.mxu0 }
 0x276   : > { %5732 = vst [vmem:[#allocation10_spill] sm:$0xff] %v5537_v53  ;;  %v2713_v53 = vadd.f32 %v4156_v25, %v4146_v0  ;;  %v2705_v11 = vadd.f32 %v2704_v30, %v2604_v62  ;;  %v2404_v62 = vadd.f32 %v2385_v33, %v2233_v1  ;;  %v5581_v1 = vld [vmem:[%s5705_s5] ss:$0 sm:$0xff] }
 0x277   : > { %v5539_v35 = vpop.f32.mrf.mxu1  ;;  %v4159_v23 = vpop.f32.mrf.mxu0 }
 0x278   : > { %5733 = vst [vmem:[#allocation11_spill] sm:$0xff] %v5539_v35  ;;  %v2220_v35 = vadd.f32 %v2219_v40, %v2119_v52  ;;  %v2726_v60 = vadd.f32 %v4159_v23, %v4149_v61  ;;  %v2400_v40 = vadd.f32 %v2369_v51, %v2217_v39  ;;  %v2885_v0 = vadd.f32 %v4166_v8, %v2713_v53  ;;  %v5743_v51 = vld [vmem:[#allocation9_spill] sm:$0xff] }
 0x279   : > { %v4185_v6 = vpop.f32.mrf.mxu1  ;;  %v2717_v56 = vpop.f32.mrf.mxu0  ;;  %v2883_v10 = vadd.f32 %v2854_v13, %v2705_v11  ;;  %v5576_v11 = vld [vmem:[%s5709_s9] ss:$0 sm:$0xff] }
 0x27a   : > { %v2718_v29 = vadd.f32 %v2717_v56, %v2617_v49  ;;  %v2401_v52 = vadd.f32 %v2372_v44, %v2220_v35  ;;  %v2888_v44 = vadd.f32 %v4169_v50, %v2726_v60 }
 0x27b   : > { %v3192_v57 = vpop.f32.mrf.mxu1  ;;  %v4160_v42 = vpop.f32.mrf.mxu0 }
 0x27c   : > { %v2886_v48 = vadd.f32 %v2867_v2, %v2718_v29 }
 0x27d   : > { %v5541_v5 = vpop.f32.mrf.mxu1  ;;  %v2720_v45 = vpop.f32.mrf.mxu0  ;;  %v5744_v25 = vld [vmem:[#allocation10_spill] sm:$0xff] }
 0x27e   : > { %5734 = vst [vmem:[#allocation12_spill] sm:$0xff] %v5541_v5  ;;  %v2228_v5 = vadd.f32 %v4126_v46, %v4116_v38 }
 0x27f   : > { %v5543_v14 = vpop.f32.mrf.mxu1  ;;  %v4175_v54 = vpop.f32.mrf.mxu0  ;;  %v5745_v30 = vld [vmem:[#allocation11_spill] sm:$0xff] }
 0x280   : > { %5735 = vst [vmem:[#allocation13_spill] sm:$0xff] %v5543_v14  ;;  %v2702_v14 = vadd.f32 %v2701_v15, %v2601_v19  ;;  %v2403_v38 = vadd.f32 %v4136_v22, %v2228_v5  ;;  %v3201_v61 = vadd.f32 %v4185_v6, %v4175_v54 }
 0x281   : > { %v5545_v55 = vpop.f32.mrf.mxu1  ;;  %v3092_v18 = vpop.f32.mrf.mxu0 }
 0x282   : > { %5736 = vst [vmem:[#allocation14_spill] sm:$0xff] %v5545_v55  ;;  %v2882_v19 = vadd.f32 %v2851_v63, %v2702_v14  ;;  %v2893_v13 = vadd.f32 %v2885_v0, %v2403_v38 }
 0x283   : > { %v5547_v3 = vpop.f32.mrf.mxu1  ;;  %v4176_v59 = vpop.f32.mrf.mxu0 }
 0x284   : > { %5737 = vst [vmem:[#allocation15_spill] sm:$0xff] %v5547_v3  ;;  %v2241_v3 = vadd.f32 %v5525_v20, %v4119_v27  ;;  %v2729_v20 = vadd.f32 %v4160_v42, %v4150_v28  ;;  %v2721_v27 = vadd.f32 %v2720_v45, %v2620_v21  ;;  %v3193_v21 = vadd.f32 %v3192_v57, %v3092_v18  ;;  %v5589_v45 = vld [vmem:[%s5706_s6] ss:$0 sm:$0xff] }
 0x285   : > { %v5549_v26 = vpop.f32.mrf.mxu1  ;;  %v3095_v24 = vpop.f32.mrf.mxu0  ;;  %v2890_v33 = vadd.f32 %v2882_v19, %v2400_v40  ;;  %v5746_v2 = vld [vmem:[#allocation12_spill] sm:$0xff]  ;;  %v2891_v57 = vadd.f32 %v2883_v10, %v2401_v52  ;;  %v2894_v18 = vadd.f32 %v2886_v48, %v2404_v62 }
 0x286   : > { %5738 = vst [vmem:[#allocation16_spill] sm:$0xff] %v5549_v26  ;;  %v2244_v26 = vadd.f32 %v5529_v58, %v4120_v43  ;;  %v5566_v58 = vld [vmem:[%s5708_s8] ss:$0 sm:$0xff]  ;;  %v5742_v43 = vld [vmem:[#allocation8_spill] sm:$0xff]  ;;  %v2889_v53 = vadd.f32 %v5744_v25, %v2729_v20  ;;  %v2887_v35 = vadd.f32 %v5745_v30, %v2721_v27  ;;  %v3204_v23 = vadd.f32 %v5746_v2, %v4176_v59 }
 0x287   : > { %v5551_v36 = vpop.f32.mrf.mxu1  ;;  %v5553_v34 = vpop.f32.mrf.mxu0  ;;  %v5747_v42 = vld [vmem:[#allocation13_spill] sm:$0xff] }
 0x288   : > { %5739 = vst [vmem:[#allocation17_spill] sm:$0xff] %v5551_v36  ;;  %5740 = vst [vmem:[#allocation18_spill] sm:$0xff] %v5553_v34  ;;  %v5741_v36 = vld [vmem:[#allocation7_spill] sm:$0xff]  ;;  %v2407_v49 = vadd.f32 %v5743_v51, %v2244_v26  ;;  %v3196_v5 = vadd.f32 %v5747_v42, %v3095_v24 }
 0x289   : > { %v5555_v31 = vpop.f32.mrf.mxu0  ;;  %v4205_v55 = vpop.f32.mrf.mxu1  ;;  %v2236_v34 = vadd.f32 %v5741_v36, %v2135_v32  ;;  %v2406_v32 = vadd.f32 %v5742_v43, %v2241_v3  ;;  %v5749_v24 = vld [vmem:[#allocation14_spill] sm:$0xff] }
 0x28a   : > { %v3649_v8 = vmul.f32 %v4205_v55, %v5566_v58  ;;  %v2897_v60 = vadd.f32 %v2889_v53, %v2407_v49 }
 0x28b   : > { %v5561_v9 = vpop.f32.mrf.mxu0  ;;  %v3609_v46 = vpop.f32.mrf.mxu1  ;;  %v2405_v22 = vadd.f32 %v2388_v47, %v2236_v34  ;;  %v2896_v55 = vadd.f32 %v2888_v44, %v2406_v32  ;;  %v5750_v17 = vld [vmem:[#allocation15_spill] sm:$0xff] }
 0x28c   : > { %v3647_v14 = vmul.f32 %v5566_v58, %v3609_v46  ;;  %v3664_v3 = vadd.f32 %v5576_v11, %v3649_v8  ;;  %v3209_v19 = vadd.f32 %v5750_v17, %v5555_v31 }
 0x28d   : > { %v3111_v41 = vpop.f32.mrf.mxu0  ;;  %v4206_v4 = vpop.f32.mrf.mxu1  ;;  %v2895_v29 = vadd.f32 %v2887_v35, %v2405_v22 }
 0x28e   : > { %v3650_v39 = vmul.f32 %v4206_v4, %v5566_v58  ;;  %v3662_v0 = vadd.f32 %v5576_v11, %v3647_v14 }
 0x28f   : > { %v4195_v63 = vpop.f32.mrf.mxu0  ;;  %v3612_v28 = vpop.f32.mrf.mxu1  ;;  %v5748_v34 = vld [vmem:[#allocation18_spill] sm:$0xff]  ;;  %v5752_v49 = vld [vmem:[#allocation17_spill] sm:$0xff] }
 0x290   : > { %v3375_v15 = vadd.f32 %v4195_v63, %v3201_v61  ;;  %v3217_v37 = vadd.f32 %v5749_v24, %v5748_v34  ;;  %v3648_v20 = vmul.f32 %v5566_v58, %v3612_v28  ;;  %v5751_v61 = vld [vmem:[#allocation16_spill] sm:$0xff]  ;;  %v3212_v22 = vadd.f32 %v5752_v49, %v3111_v41 }
 0x291   : > { %v3342_v47 = vpop.f32.mrf.mxu0  ;;  %v4209_v50 = vpop.f32.mrf.mxu1  ;;  %v3220_v51 = vadd.f32 %v5751_v61, %v5561_v9  ;;  %v3665_v31 = vadd.f32 %v5576_v11, %v3650_v39 }
 0x292   : > { %v3383_v6 = vadd.f32 %v3375_v15, %v2892_v12  ;;  %v3373_v56 = vadd.f32 %v3342_v47, %v3193_v21  ;;  %v3653_v27 = vmul.f32 %v4209_v50, %v5566_v58  ;;  %v3663_v15 = vadd.f32 %v5576_v11, %v3648_v20 }
 0x293   : > { %v4196_v54 = vpop.f32.mrf.mxu0  ;;  %v3625_v7 = vpop.f32.mrf.mxu1 }
 0x294   : > { %v3398_v59 = vmul.f32 %v5581_v1, %v3383_v6  ;;  %v3381_v26 = vadd.f32 %v3373_v56, %v2890_v33  ;;  %v3376_v36 = vadd.f32 %v4196_v54, %v3204_v23  ;;  %v3668_v25 = vadd.f32 %v5576_v11, %v3653_v27 }
 0x295   : > { %v3345_v16 = vpop.f32.mrf.mxu0  ;;  %v4210_v63 = vpop.f32.mrf.mxu1  ;;  %v3651_v50 = vmul.f32 %v5566_v58, %v3625_v7 }
 0x296   : > { %v3413_v46 = vadd.f32 %v5589_v45, %v3398_v59  ;;  %v3396_v40 = vmul.f32 %v5581_v1, %v3381_v26  ;;  %v3384_v38 = vadd.f32 %v3376_v36, %v2893_v13  ;;  %v3374_v52 = vadd.f32 %v3345_v16, %v3196_v5 }
 0x297   : > { %v4199_v4 = vpop.f32.mrf.mxu0  ;;  %v3654_v23 = vmul.f32 %v4210_v63, %v5566_v58  ;;  %v3628_v6 = vpop.f32.mrf.mxu1  ;;  %v3666_v34 = vadd.f32 %v5576_v11, %v3651_v50 }
 0x298   : > { %v3672_v43 = vadd.f32 %v3664_v3, %v3413_v46  ;;  %v3411_v32 = vadd.f32 %v5589_v45, %v3396_v40  ;;  %v3399_v62 = vmul.f32 %v5581_v1, %v3384_v38  ;;  %v3382_v10 = vadd.f32 %v3374_v52, %v2891_v57 }
 0x299   : > { %v3379_v44 = vadd.f32 %v4199_v4, %v3217_v37  ;;  %v3358_v48 = vpop.f32.mrf.mxu0  ;;  %v3652_v59 = vmul.f32 %v5566_v58, %v3628_v6  ;;  %v3669_v37 = vadd.f32 %v5576_v11, %v3654_v23 }
 0x29a   : > { %v3680_v28 = vmax.f32 %v3672_v43, 0.0  ;;  %v3670_v21 = vadd.f32 %v3662_v0, %v3411_v32  ;;  %v3414_v8 = vadd.f32 %v5589_v45, %v3399_v62  ;;  %v3397_v12 = vmul.f32 %v5581_v1, %v3382_v10 }
 0x29b   : > { %v3387_v53 = vadd.f32 %v3379_v44, %v2896_v55  ;;  %v3377_v30 = vadd.f32 %v3358_v48, %v3209_v19  ;;  %v4200_v9 = vpop.f32.mrf.mxu0 }
 0x29c   : > { %3688 = vst.msk [vmem:[%s5616_s25 + $0x10] sm:$0xff] %vm887_vm9, %v3680_v28  ;;  %v3678_v41 = vmax.f32 %v3670_v21, 0.0  ;;  %v3673_v35 = vadd.f32 %v3665_v31, %v3414_v8  ;;  %v3412_v33 = vadd.f32 %v5589_v45, %v3397_v12  ;;  %v3380_v47 = vadd.f32 %v4200_v9, %v3220_v51 }
 0x29d   : > { %v3402_v13 = vmul.f32 %v5581_v1, %v3387_v53  ;;  %v3385_v2 = vadd.f32 %v3377_v30, %v2894_v18  ;;  %v3361_v56 = vpop.f32.mrf.mxu0 }
 0x29e   : > { %3686 = vst.msk [vmem:[%s5616_s25] sm:$0xff] %vm887_vm9, %v3678_v41  ;;  %v3681_v57 = vmax.f32 %v3673_v35, 0.0  ;;  %v3671_v42 = vadd.f32 %v3663_v15, %v3412_v33  ;;  %v3388_v5 = vadd.f32 %v3380_v47, %v2897_v60  ;;  %v3378_v14 = vadd.f32 %v3361_v56, %v3212_v22 }
 0x29f   : > { %v3417_v54 = vadd.f32 %v5589_v45, %v3402_v13  ;;  %v3400_v55 = vmul.f32 %v5581_v1, %v3385_v2 }
 0x2a0   : > { %3689 = vst.msk [vmem:[%s5616_s25 + $0x18] sm:$0xff] %vm887_vm9, %v3681_v57  ;;  %v3679_v3 = vmax.f32 %v3671_v42, 0.0  ;;  %v3403_v18 = vmul.f32 %v5581_v1, %v3388_v5  ;;  %v3386_v26 = vadd.f32 %v3378_v14, %v2895_v29  ;;  %v3667_v29 = vadd.f32 %v5576_v11, %v3652_v59 }
 0x2a1   : > { %v3676_v36 = vadd.f32 %v3668_v25, %v3417_v54  ;;  %v3415_v24 = vadd.f32 %v5589_v45, %v3400_v55 }
 0x2a2   : > { %3687 = vst.msk [vmem:[%s5616_s25 + $0x8] sm:$0xff] %vm887_vm9, %v3679_v3  ;;  %v3418_v39 = vadd.f32 %v5589_v45, %v3403_v18  ;;  %v3401_v16 = vmul.f32 %v5581_v1, %v3386_v26 }
 0x2a3   : > { %v3684_v7 = vmax.f32 %v3676_v36, 0.0  ;;  %v3674_v58 = vadd.f32 %v3666_v34, %v3415_v24 }
 0x2a4   : > { %v3677_v60 = vadd.f32 %v3669_v37, %v3418_v39  ;;  %v3416_v46 = vadd.f32 %v5589_v45, %v3401_v16 }
 0x2a5   : > { %3692 = vst.msk [vmem:[%s5616_s25 + $0x30] sm:$0xff] %vm887_vm9, %v3684_v7  ;;  %v3682_v40 = vmax.f32 %v3674_v58, 0.0 }
 0x2a6   : > { %v3685_v38 = vmax.f32 %v3677_v60, 0.0  ;;  %v3675_v52 = vadd.f32 %v3667_v29, %v3416_v46 }
 0x2a7   : > { %3690 = vst.msk [vmem:[%s5616_s25 + $0x20] sm:$0xff] %vm887_vm9, %v3682_v40 }
 0x2a8   : > { %3693 = vst.msk [vmem:[%s5616_s25 + $0x38] sm:$0xff] %vm887_vm9, %v3685_v38  ;;  %v3683_v11 = vmax.f32 %v3675_v52, 0.0 }
 0x2aa   : > { %3691 = vst.msk [vmem:[%s5616_s25 + $0x28] sm:$0xff] %vm887_vm9, %v3683_v11 }
 0x2ab   : > { %4310 = shalt.err (!%p4307_p3)
}
 0x2ac   : > { %s4311_s12 = scalar_lea.hbm %s5650_s30, 1024  ;;  %s4315_s28 = scalar_lea.hbm %s5710_s10, 2048 }
 0x2ad   : > { %p4312_p4 = scmp.ne.s32.totalorder %s5650_s30, %s4311_s12  ;;  %p4316_p9 = scmp.lt.s32.totalorder %s5650_s30, %s5710_s10 }
 0x2ae   : > { %p4317_p10 = scmp.lt.s32.totalorder %s4315_s28, %s4311_s12 }
 0x2af   : > { %p4313_p7 = pnand %p4312_p4, %p4456_p5 }
 0x2b0   : > { %p4318_p11 = por %p4317_p10, %p4316_p9 }
 0x2b1   : > { %p4314_p8 = pneg %p4313_p7 }
 0x2b3   : > { %p4319_p12 = pnand %p4318_p11, %p4314_p8 }
 0x2b5   : > { %4322 = shalt.err (!%p4319_p12)
}
 0x2b6   : > { %s4361_s11 = smov 128   ;;  %s4362_s20 = smov 8  }
 0x2b7   : > { %4227 = dma.vmem_to_hbm [thread:$0]  (%p4456_p5), %s5652_s27, 1024, %s5650_s30, %s5660_s17, %s4361_s11, %s4361_s11, %s4362_s20  }
 0x2b8 PF: > { %p4233_p13 = scmp.ge.s32.totalorder %s4357_s16, 2  ;;  %s3723_s21 = sand.u32 1, %s4345_s13  }
 0x2b9   : > { %s3724_s12 = scalar_lea.sflag [#allocation5], %s3723_s21 }
 0x2ba   : > { %p4230_p0 = pnand %p4233_p13, %p4460_p6 }
 0x2bc   : > { %p4231_p1 = pneg %p4230_p0 }
 0x2be   : > { %4340 = dma.done.wait (%p4231_p1), %s3724_s12, 1024  }
 0x2bf   : > { %4342 = vsyncadd (%p4231_p1), %s3724_s12, 4294966272  ;;  %p20_p2 = scmp.ge.s32.totalorder %s4443_s19, 4   ;;  %s5753_s13 = smov %s4349_s14 }
 0x2c0   : > { %s5754_s14 = smov %s4353_s15  ;;  %s5755_s15 = smov %s4454_s22 }
 0x2c1   : > { %s5756_s16 = smov %s4443_s19  ;;  %22 = sbr.rel (!%p20_p2) target bundleno = 3 (0x3), region = 112 }
 0x2c6   :  { %3729 = vsyncpa [#allocation5], 1 }
 0x2c7   :  { %3731 = vsyncpa [#allocation5 + $0x1], 1 }

</bundles_post_ra>
